<compile_context>
chip_gen: v5e
topology: v5e:2x2
jax: 0.10.0
libtpu: 0.0.40
codegen_flags: <defaults>
</compile_context>

<pallas_src>
import numpy as np
import jax
import jax.numpy as jnp
from jax.experimental import pallas as pl
from jax.experimental.pallas import tpu as pltpu


def _round_up(x, m):
    return (x + m - 1) // m * m


# ---------------------------------------------------------------------------
# Kernel 1: SEnSeI-style spectral embedding (74 -> 64 -> 32, mean over bands).
# TODO(synk): exact SEnSeIv2Encoding / SpectralEmbedding internals are
# approximated (value-modulated descriptor -> shared MLP -> mean pooling).
# Layout: x (C, tm) pixels-along-lanes; output (E, tm) lane-dense.
# ---------------------------------------------------------------------------
def _spectral_embed_kernel(x_ref, dw1t_ref, b1_ref, w2t_ref, b2_ref, out_ref):
    C = x_ref.shape[0]
    dw1t = dw1t_ref[...]                       # (H1, C) = (desc @ w1)^T
    b1 = b1_ref[...]                           # (H1, 1)
    acc = jnp.zeros((dw1t.shape[0], x_ref.shape[1]), jnp.float32)
    for c in range(C):                         # C is tiny and static
        # feat @ w1 == v * (desc[c] @ w1): pure broadcast multiply, no MXU.
        h = dw1t[:, c:c + 1] * x_ref[c:c + 1, :] + b1     # (H1, tm)
        acc = acc + jnp.maximum(h, 0.0)
    # single second-layer matmul for all bands (matmul distributes over sum)
    emb = jnp.dot(w2t_ref[...], acc, preferred_element_type=jnp.float32)  # (E, tm)
    out_ref[...] = (emb * (1.0 / C) + b2_ref[...]).astype(out_ref.dtype)


def spectral_embedding_tokens(img, desc, w1, b1, w2, b2, *, tm=1024):
    """Returns patch tokens (B, T, E*16) ready for the Segformer stage."""
    B, C, H, W = img.shape
    assert H % 4 == 0 and W % 4 == 0
    h4, w4 = H // 4, W // 4
    T = h4 * w4
    H1 = w1.shape[1]
    E = w2.shape[1]

    # Token-major pixel ordering (b, ph, pw, dh, dw) so the kernel output
    # reshapes straight into 4x4 patches (layout plumbing done on the tiny
    # 4-channel input instead of the 32-channel embedding).
    x = (jnp.transpose(img, (0, 2, 3, 1))                 # (B, H, W, C)
         .reshape(B, h4, 4, w4, 4, C)
         .transpose(0, 1, 3, 2, 4, 5)                     # (B, ph, pw, dh, dw, C)
         .reshape(B * T * 16, C))
    N = x.shape[0]
    tm_eff = min(tm, _round_up(N, 128))
    N_pad = _round_up(N, tm_eff)
    if N_pad != N:                                        # padded tail tile
        x = jnp.pad(x, ((0, N_pad - N), (0, 0)))
    xT = jnp.transpose(x)                                 # (C, N_pad), lane-dense pixels

    dw1t = jnp.transpose(jnp.dot(desc, w1))               # (H1, C) algebraic fold
    w2t = jnp.transpose(w2)                               # (E, H1)

    embT = pl.pallas_call(
        _spectral_embed_kernel,
        out_shape=jax.ShapeDtypeStruct((E, N_pad), jnp.bfloat16),
        grid_spec=pltpu.PrefetchScalarGridSpec(
            num_scalar_prefetch=0,
            grid=(N_pad // tm_eff,),
            in_specs=[
                pl.BlockSpec((C, tm_eff), lambda i: (0, i)),
                pl.BlockSpec((H1, C), lambda i: (0, 0)),
                pl.BlockSpec((H1, 1), lambda i: (0, 0)),
                pl.BlockSpec((E, H1), lambda i: (0, 0)),
                pl.BlockSpec((E, 1), lambda i: (0, 0)),
            ],
            out_specs=pl.BlockSpec((E, tm_eff), lambda i: (0, i)),
        ),
        compiler_params=pltpu.CompilerParams(dimension_semantics=("parallel",)),
    )(xT, dw1t, b1, w2t, b2)

    embT = embT[:, :N]
    # Single small patchify pass: (E, B, T, 16) -> (B, T, E*16); ordering
    # p = e*16 + (dh*4+dw) matches the original (E, 4, 4) flatten.
    patches = embT.reshape(E, B, T, 16).transpose(1, 2, 0, 3).reshape(B, T, E * 16)
    return patches


# ---------------------------------------------------------------------------
# Kernel 2: Segformer-style patch-embed + transformer block + linear head,
# batched over Bblk batch elements per grid step (feeds the MXU with
# M = Bblk*T rows).  bf16 matmul operands, f32 accumulation / LN / softmax.
# ---------------------------------------------------------------------------
def _segformer_kernel(x_ref, wp_ref, bp_ref, ln1_ref,
                      wq_ref, wk_ref, wv_ref, wo_ref,
                      ln2_ref, wm1_ref, bm1_ref, wm2_ref, bm2_ref,
                      lnf_ref, wh_ref, bh_ref, out_ref):
    Bblk, T, P = x_ref.shape
    D = wp_ref.shape[1]
    K = wh_ref.shape[1]
    scale = float(D) ** -0.5

    def layernorm(z, prm):
        g = prm[0:1, :]
        b = prm[1:2, :]
        mu = jnp.mean(z, axis=-1, keepdims=True)
        var = jnp.mean(jnp.square(z - mu), axis=-1, keepdims=True)
        return (z - mu) * jax.lax.rsqrt(var + 1e-6) * g + b

    def mm(a, w):  # bf16 operands, f32 accumulation on the MXU
        return jnp.dot(a.astype(jnp.bfloat16), w, preferred_element_type=jnp.float32)

    # patch embedding over all Bblk*T tokens at once
    x = mm(x_ref[...].reshape(Bblk * T, P), wp_ref[...]) + bp_ref[...]

    # --- self-attention block ---
    h = layernorm(x, ln1_ref[...])
    q = mm(h, wq_ref[...])
    k = mm(h, wk_ref[...])
    v = mm(h, wv_ref[...])
    qb = q.reshape(Bblk, T, D).astype(jnp.bfloat16)
    kb = k.reshape(Bblk, T, D).astype(jnp.bfloat16)
    vb = v.reshape(Bblk, T, D).astype(jnp.bfloat16)
    s = jnp.einsum('bqd,bkd->bqk', qb, kb,
                   preferred_element_type=jnp.float32) * scale
    s = s - jnp.max(s, axis=-1, keepdims=True)
    p = jnp.exp(s)
    attn = p * pl.reciprocal(jnp.sum(p, axis=-1, keepdims=True), approx=True)
    ctx = jnp.einsum('bqk,bkd->bqd', attn.astype(jnp.bfloat16), vb,
                     preferred_element_type=jnp.float32)
    x = x + mm(ctx.reshape(Bblk * T, D), wo_ref[...])

    # --- MLP block ---
    h = layernorm(x, ln2_ref[...])
    m = mm(h, wm1_ref[...]) + bm1_ref[...]
    m = jax.nn.gelu(m, approximate=True)
    x = x + mm(m, wm2_ref[...]) + bm2_ref[...]

    # --- decode head ---
    h = layernorm(x, lnf_ref[...])
    out = mm(h, wh_ref[...]) + bh_ref[...]
    out_ref[...] = out.reshape(Bblk, T, K)


def segformer_block(patches, p):
    B, T, P = patches.shape
    D = p["wp"].shape[1]
    Dm = p["wm1"].shape[1]
    K = p["wh"].shape[1]

    # batch enough elements per grid step to target >=256 matmul rows
    bblk = min(B, max(1, 256 // T))
    while B % bblk:
        bblk -= 1

    full2 = lambda b: (0, 0)
    return pl.pallas_call(
        _segformer_kernel,
        out_shape=jax.ShapeDtypeStruct((B, T, K), jnp.float32),
        grid_spec=pltpu.PrefetchScalarGridSpec(
            num_scalar_prefetch=0,
            grid=(B // bblk,),
            in_specs=[
                pl.BlockSpec((bblk, T, P), lambda b: (b, 0, 0)),
                pl.BlockSpec((P, D), full2),
                pl.BlockSpec((1, D), full2),
                pl.BlockSpec((2, D), full2),
                pl.BlockSpec((D, D), full2),
                pl.BlockSpec((D, D), full2),
                pl.BlockSpec((D, D), full2),
                pl.BlockSpec((D, D), full2),
                pl.BlockSpec((2, D), full2),
                pl.BlockSpec((D, Dm), full2),
                pl.BlockSpec((1, Dm), full2),
                pl.BlockSpec((Dm, D), full2),
                pl.BlockSpec((1, D), full2),
                pl.BlockSpec((2, D), full2),
                pl.BlockSpec((D, K), full2),
                pl.BlockSpec((1, K), full2),
            ],
            out_specs=pl.BlockSpec((bblk, T, K), lambda b: (b, 0, 0)),
        ),
        compiler_params=pltpu.CompilerParams(dimension_semantics=("parallel",)),
    )(patches, p["wp"], p["bp"], p["ln1"], p["wq"], p["wk"], p["wv"], p["wo"],
      p["ln2"], p["wm1"], p["bm1"], p["wm2"], p["bm2"], p["lnf"], p["wh"], p["bh"])


# ---------------------------------------------------------------------------
# Kernel 3: separable bilinear upsample (Uh @ L @ Uw^T per class) fused with
# the class-axis softmax.  O(HW*(h4+w4)) instead of the dense O((HW)^2)
# Kronecker matrix (which cannot be blocked into v7x's 64 MiB VMEM).
# ---------------------------------------------------------------------------
def _upsample_softmax_kernel(lg_ref, uh_ref, uwt_ref, out_ref):
    K = lg_ref.shape[1]
    uh = uh_ref[...]                                  # (H, h4)
    uwt = uwt_ref[...]                                # (w4, W)
    planes = []
    for c in range(K):                                # K = 7, static
        t = jnp.dot(lg_ref[0, c], uwt, preferred_element_type=jnp.float32)   # (h4, W)
        planes.append(jnp.dot(uh, t, preferred_element_type=jnp.float32))    # (H, W)
    m = planes[0]
    for c in range(1, K):
        m = jnp.maximum(m, planes[c])
    es = [jnp.exp(pc - m) for pc in planes]
    ssum = es[0]
    for c in range(1, K):
        ssum = ssum + es[c]
    inv = pl.reciprocal(ssum, approx=True)            # EUP seed
    inv = inv * (2.0 - ssum * inv)                    # one Newton step -> near exact
    for c in range(K):
        out_ref[0, c] = es[c] * inv


def upsample_softmax(logits_planes, uh, uwt):
    B, K, h4, w4 = logits_planes.shape
    H = uh.shape[0]
    W = uwt.shape[1]
    return pl.pallas_call(
        _upsample_softmax_kernel,
        out_shape=jax.ShapeDtypeStruct((B, K, H, W), jnp.float32),
        grid_spec=pltpu.PrefetchScalarGridSpec(
            num_scalar_prefetch=0,
            grid=(B,),
            in_specs=[
                pl.BlockSpec((1, K, h4, w4), lambda b: (b, 0, 0, 0)),
                pl.BlockSpec((H, h4), lambda b: (0, 0)),
                pl.BlockSpec((w4, W), lambda b: (0, 0)),
            ],
            out_specs=pl.BlockSpec((1, K, H, W), lambda b: (b, 0, 0, 0)),
        ),
        compiler_params=pltpu.CompilerParams(dimension_semantics=("parallel",)),
    )(logits_planes, uh, uwt)


# ---------------------------------------------------------------------------
# Parameter setup (deterministic, synthetic) and full forward.
# ---------------------------------------------------------------------------
def _bilinear_matrix(out_size, in_size):
    # align_corners=False bilinear weights (matches F.interpolate upsampling;
    # antialias=True is a no-op when upsampling).
    scale = in_size / out_size
    M = np.zeros((out_size, in_size), np.float32)
    for i in range(out_size):
        src = (i + 0.5) * scale - 0.5
        x0 = int(np.floor(src))
        frac = src - x0
        x0c = min(max(x0, 0), in_size - 1)
        x1c = min(max(x0 + 1, 0), in_size - 1)
        M[i, x0c] += 1.0 - frac
        M[i, x1c] += frac
    return M


def init_params(key, *, C=4, F=74, H1=64, E=32, D=64, Dm=256, K=7, H=16, W=16):
    ks = jax.random.split(key, 12)
    s = 0.08
    P = E * 16  # 4x4 patch of the 32-channel embedding
    bf16 = jnp.bfloat16
    ln = lambda d: jnp.stack([jnp.ones((d,), jnp.float32), jnp.zeros((d,), jnp.float32)])
    params = {
        # SEnSeIv2-style band descriptor encoding (emb_size=74), synthetic
        "desc": jax.random.normal(ks[0], (C, F), jnp.float32),
        # SpectralEmbedding MLP (biases stored column-shaped for the kernel)
        "w1": jax.random.normal(ks[1], (F, H1), jnp.float32) * s,
        "b1": jnp.zeros((H1, 1), jnp.float32),
        "w2": jax.random.normal(ks[2], (H1, E), jnp.float32) * s,
        "b2": jnp.zeros((E, 1), jnp.float32),
        # Segformer-ish stage: matmul weights in bf16, biases/LN in f32
        "wp": (jax.random.normal(ks[3], (P, D), jnp.float32) * s).astype(bf16),
        "bp": jnp.zeros((1, D), jnp.float32),
        "ln1": ln(D),
        "wq": (jax.random.normal(ks[4], (D, D), jnp.float32) * s).astype(bf16),
        "wk": (jax.random.normal(ks[5], (D, D), jnp.float32) * s).astype(bf16),
        "wv": (jax.random.normal(ks[6], (D, D), jnp.float32) * s).astype(bf16),
        "wo": (jax.random.normal(ks[7], (D, D), jnp.float32) * s).astype(bf16),
        "ln2": ln(D),
        "wm1": (jax.random.normal(ks[8], (D, Dm), jnp.float32) * s).astype(bf16),
        "bm1": jnp.zeros((1, Dm), jnp.float32),
        "wm2": (jax.random.normal(ks[9], (Dm, D), jnp.float32) * s).astype(bf16),
        "bm2": jnp.zeros((1, D), jnp.float32),
        "lnf": ln(D),
        "wh": (jax.random.normal(ks[10], (D, K), jnp.float32) * s).astype(bf16),
        "bh": jnp.zeros((1, K), jnp.float32),
        # separable bilinear interpolation factors
        "uh": jnp.asarray(_bilinear_matrix(H, H // 4)),        # (H, h4)
        "uwt": jnp.asarray(_bilinear_matrix(W, W // 4).T),     # (w4, W)
    }
    return params


def cloud_mask_forward(img, p):
    B, C, H, W = img.shape
    h4, w4 = H // 4, W // 4
    # 1) spectral embedding, emitted directly as patch tokens (B, T, E*16)
    patches = spectral_embedding_tokens(img, p["desc"], p["w1"], p["b1"],
                                        p["w2"], p["b2"])
    # 2) transformer stage + head -> (B, T, 7)
    logits_tok = segformer_block(patches, p)
    K = logits_tok.shape[2]
    logits_planes = logits_tok.transpose(0, 2, 1).reshape(B, K, h4, w4)  # tiny
    # 3) separable bilinear upsample + class softmax -> (B, 7, H, W)
    probs = upsample_softmax(logits_planes, p["uh"], p["uwt"])
    # torch's .squeeze(): also drops a batch dim of 1 (kept for parity)
    return jnp.squeeze(probs)


if __name__ == "__main__":
    B, C, H, W = 2, 4, 16, 16
    key = jax.random.PRNGKey(0)
    k_img, k_par = jax.random.split(key, 2)
    img = jax.random.uniform(k_img, (B, C, H, W), jnp.float32)
    params = init_params(k_par, C=C, H=H, W=W)

    out = jax.jit(cloud_mask_forward)(img, params)
    out = jax.block_until_ready(out)

    assert out.shape == (B, 7, H, W), out.shape
    assert bool(jnp.all(jnp.isfinite(out)))
    sums = jnp.sum(out, axis=1)
    assert bool(jnp.all(jnp.abs(sums - 1.0) < 1e-3)), "softmax does not sum to 1"
    print("KERNEL_OK")
</pallas_src>

<mosaic_0001>
module attributes {stable_mosaic.version = 11 : i64} {
  func.func @_spectral_embed_kernel(%arg0: i32, %arg1: memref<4x512xf32, #tpu.memory_space<vmem>>, %arg2: memref<64x4xf32, #tpu.memory_space<vmem>>, %arg3: memref<64x1xf32, #tpu.memory_space<vmem>>, %arg4: memref<32x64xf32, #tpu.memory_space<vmem>>, %arg5: memref<32x1xf32, #tpu.memory_space<vmem>>, %arg6: memref<32x512xbf16, #tpu.memory_space<vmem>>) attributes {dimension_semantics = [#tpu.dimension_semantics<parallel>], iteration_bounds = array<i64: 1>, scalar_prefetch = 0 : i64, scratch_operands = 0 : i64, tpu.core_type = #tpu.core_type<tc>, window_params = [{transform_indices = @transform_0, window_bounds = array<i64: 4, 512>}, {pipeline_mode = #tpu.pipeline_mode<synchronous>, transform_indices = @transform_1, window_bounds = array<i64: 64, 4>}, {pipeline_mode = #tpu.pipeline_mode<synchronous>, transform_indices = @transform_2, window_bounds = array<i64: 64, 1>}, {pipeline_mode = #tpu.pipeline_mode<synchronous>, transform_indices = @transform_3, window_bounds = array<i64: 32, 64>}, {pipeline_mode = #tpu.pipeline_mode<synchronous>, transform_indices = @transform_4, window_bounds = array<i64: 32, 1>}, {transform_indices = @transform_5, window_bounds = array<i64: 32, 512>}]} {
    %c0 = arith.constant 0 : index
    %c0_0 = arith.constant 0 : index
    %0 = vector.load %arg2[%c0, %c0_0] : memref<64x4xf32, #tpu.memory_space<vmem>>, vector<64x4xf32>
    %c0_1 = arith.constant 0 : index
    %c0_2 = arith.constant 0 : index
    %1 = vector.load %arg3[%c0_1, %c0_2] : memref<64x1xf32, #tpu.memory_space<vmem>>, vector<64x1xf32>
    %cst = arith.constant 0.000000e+00 : f32
    %2 = vector.broadcast %cst : f32 to vector<64x512xf32>
    %3 = vector.extract_strided_slice %0 {offsets = [0, 0], sizes = [64, 1], strides = [1, 1]} : vector<64x4xf32> to vector<64x1xf32>
    %c0_3 = arith.constant 0 : index
    %c0_4 = arith.constant 0 : index
    %4 = vector.load %arg1[%c0_3, %c0_4] : memref<4x512xf32, #tpu.memory_space<vmem>>, vector<1x512xf32>
    %5 = vector.broadcast %3 : vector<64x1xf32> to vector<64x512xf32>
    %6 = vector.broadcast %4 : vector<1x512xf32> to vector<64x512xf32>
    %7 = arith.mulf %5, %6 : vector<64x512xf32>
    %8 = vector.broadcast %1 : vector<64x1xf32> to vector<64x512xf32>
    %9 = arith.addf %7, %8 : vector<64x512xf32>
    %cst_5 = arith.constant 0.000000e+00 : f32
    %10 = vector.broadcast %cst_5 : f32 to vector<64x512xf32>
    %11 = arith.maximumf %9, %10 : vector<64x512xf32>
    %12 = arith.addf %2, %11 : vector<64x512xf32>
    %13 = vector.extract_strided_slice %0 {offsets = [0, 1], sizes = [64, 1], strides = [1, 1]} : vector<64x4xf32> to vector<64x1xf32>
    %c1 = arith.constant 1 : index
    %c0_6 = arith.constant 0 : index
    %14 = vector.load %arg1[%c1, %c0_6] : memref<4x512xf32, #tpu.memory_space<vmem>>, vector<1x512xf32>
    %15 = vector.broadcast %13 : vector<64x1xf32> to vector<64x512xf32>
    %16 = vector.broadcast %14 : vector<1x512xf32> to vector<64x512xf32>
    %17 = arith.mulf %15, %16 : vector<64x512xf32>
    %18 = vector.broadcast %1 : vector<64x1xf32> to vector<64x512xf32>
    %19 = arith.addf %17, %18 : vector<64x512xf32>
    %cst_7 = arith.constant 0.000000e+00 : f32
    %20 = vector.broadcast %cst_7 : f32 to vector<64x512xf32>
    %21 = arith.maximumf %19, %20 : vector<64x512xf32>
    %22 = arith.addf %12, %21 : vector<64x512xf32>
    %23 = vector.extract_strided_slice %0 {offsets = [0, 2], sizes = [64, 1], strides = [1, 1]} : vector<64x4xf32> to vector<64x1xf32>
    %c2 = arith.constant 2 : index
    %c0_8 = arith.constant 0 : index
    %24 = vector.load %arg1[%c2, %c0_8] : memref<4x512xf32, #tpu.memory_space<vmem>>, vector<1x512xf32>
    %25 = vector.broadcast %23 : vector<64x1xf32> to vector<64x512xf32>
    %26 = vector.broadcast %24 : vector<1x512xf32> to vector<64x512xf32>
    %27 = arith.mulf %25, %26 : vector<64x512xf32>
    %28 = vector.broadcast %1 : vector<64x1xf32> to vector<64x512xf32>
    %29 = arith.addf %27, %28 : vector<64x512xf32>
    %cst_9 = arith.constant 0.000000e+00 : f32
    %30 = vector.broadcast %cst_9 : f32 to vector<64x512xf32>
    %31 = arith.maximumf %29, %30 : vector<64x512xf32>
    %32 = arith.addf %22, %31 : vector<64x512xf32>
    %33 = vector.extract_strided_slice %0 {offsets = [0, 3], sizes = [64, 1], strides = [1, 1]} : vector<64x4xf32> to vector<64x1xf32>
    %c3 = arith.constant 3 : index
    %c0_10 = arith.constant 0 : index
    %34 = vector.load %arg1[%c3, %c0_10] : memref<4x512xf32, #tpu.memory_space<vmem>>, vector<1x512xf32>
    %35 = vector.broadcast %33 : vector<64x1xf32> to vector<64x512xf32>
    %36 = vector.broadcast %34 : vector<1x512xf32> to vector<64x512xf32>
    %37 = arith.mulf %35, %36 : vector<64x512xf32>
    %38 = vector.broadcast %1 : vector<64x1xf32> to vector<64x512xf32>
    %39 = arith.addf %37, %38 : vector<64x512xf32>
    %cst_11 = arith.constant 0.000000e+00 : f32
    %40 = vector.broadcast %cst_11 : f32 to vector<64x512xf32>
    %41 = arith.maximumf %39, %40 : vector<64x512xf32>
    %42 = arith.addf %32, %41 : vector<64x512xf32>
    %c0_12 = arith.constant 0 : index
    %c0_13 = arith.constant 0 : index
    %43 = vector.load %arg4[%c0_12, %c0_13] : memref<32x64xf32, #tpu.memory_space<vmem>>, vector<32x64xf32>
    %cst_14 = arith.constant dense<0.000000e+00> : vector<32x512xf32>
    %44 = tpu.matmul %43, %42, %cst_14 {dimension_numbers = #tpu.dot_dimension_numbers<[1], [0], [0], [1], [0, 0, 1, 1], [], []>} : vector<32x64xf32>, vector<64x512xf32>, vector<32x512xf32> -> vector<32x512xf32>
    %cst_15 = arith.constant 2.500000e-01 : f32
    %45 = vector.broadcast %cst_15 : f32 to vector<32x512xf32>
    %46 = arith.mulf %44, %45 : vector<32x512xf32>
    %c0_16 = arith.constant 0 : index
    %c0_17 = arith.constant 0 : index
    %47 = vector.load %arg5[%c0_16, %c0_17] : memref<32x1xf32, #tpu.memory_space<vmem>>, vector<32x1xf32>
    %48 = vector.broadcast %47 : vector<32x1xf32> to vector<32x512xf32>
    %49 = arith.addf %46, %48 : vector<32x512xf32>
    %50 = arith.truncf %49 : vector<32x512xf32> to vector<32x512xbf16>
    %c0_18 = arith.constant 0 : index
    %c0_19 = arith.constant 0 : index
    %51 = vector.load %arg6[%c0_18, %c0_19] : memref<32x512xbf16, #tpu.memory_space<vmem>>, vector<32x512xbf16>
    tpu.vector_store %arg6[%c0_18, %c0_19], %50 {strides = array<i32>} : memref<32x512xbf16, #tpu.memory_space<vmem>>, vector<32x512xbf16>,
    return
  }
  func.func @transform_0(%arg0: i32) -> (i32, i32) {
    %c0_i32 = arith.constant 0 : i32
    %c0_i32_0 = arith.constant 0 : i32
    return %c0_i32, %arg0 : i32, i32
  }
  func.func @transform_1(%arg0: i32) -> (i32, i32) {
    %c0_i32 = arith.constant 0 : i32
    %c0_i32_0 = arith.constant 0 : i32
    %c0_i32_1 = arith.constant 0 : i32
    return %c0_i32, %c0_i32_0 : i32, i32
  }
  func.func @transform_2(%arg0: i32) -> (i32, i32) {
    %c0_i32 = arith.constant 0 : i32
    %c0_i32_0 = arith.constant 0 : i32
    %c0_i32_1 = arith.constant 0 : i32
    return %c0_i32, %c0_i32_0 : i32, i32
  }
  func.func @transform_3(%arg0: i32) -> (i32, i32) {
    %c0_i32 = arith.constant 0 : i32
    %c0_i32_0 = arith.constant 0 : i32
    %c0_i32_1 = arith.constant 0 : i32
    return %c0_i32, %c0_i32_0 : i32, i32
  }
  func.func @transform_4(%arg0: i32) -> (i32, i32) {
    %c0_i32 = arith.constant 0 : i32
    %c0_i32_0 = arith.constant 0 : i32
    %c0_i32_1 = arith.constant 0 : i32
    return %c0_i32, %c0_i32_0 : i32, i32
  }
  func.func @transform_5(%arg0: i32) -> (i32, i32) {
    %c0_i32 = arith.constant 0 : i32
    %c0_i32_0 = arith.constant 0 : i32
    return %c0_i32, %arg0 : i32, i32
  }
}

module attributes {stable_mosaic.version = 11 : i64} {
  func.func @_segformer_kernel(%arg0: i32, %arg1: memref<2x16x512xbf16, #tpu.memory_space<vmem>>, %arg2: memref<512x64xbf16, #tpu.memory_space<vmem>>, %arg3: memref<1x64xf32, #tpu.memory_space<vmem>>, %arg4: memref<2x64xf32, #tpu.memory_space<vmem>>, %arg5: memref<64x64xbf16, #tpu.memory_space<vmem>>, %arg6: memref<64x64xbf16, #tpu.memory_space<vmem>>, %arg7: memref<64x64xbf16, #tpu.memory_space<vmem>>, %arg8: memref<64x64xbf16, #tpu.memory_space<vmem>>, %arg9: memref<2x64xf32, #tpu.memory_space<vmem>>, %arg10: memref<64x256xbf16, #tpu.memory_space<vmem>>, %arg11: memref<1x256xf32, #tpu.memory_space<vmem>>, %arg12: memref<256x64xbf16, #tpu.memory_space<vmem>>, %arg13: memref<1x64xf32, #tpu.memory_space<vmem>>, %arg14: memref<2x64xf32, #tpu.memory_space<vmem>>, %arg15: memref<64x7xbf16, #tpu.memory_space<vmem>>, %arg16: memref<1x7xf32, #tpu.memory_space<vmem>>, %arg17: memref<2x16x7xf32, #tpu.memory_space<vmem>>) attributes {dimension_semantics = [#tpu.dimension_semantics<parallel>], iteration_bounds = array<i64: 1>, scalar_prefetch = 0 : i64, scratch_operands = 0 : i64, tpu.core_type = #tpu.core_type<tc>, window_params = [{transform_indices = @transform_0, window_bounds = array<i64: 2, 16, 512>}, {pipeline_mode = #tpu.pipeline_mode<synchronous>, transform_indices = @transform_1, window_bounds = array<i64: 512, 64>}, {pipeline_mode = #tpu.pipeline_mode<synchronous>, transform_indices = @transform_2, window_bounds = array<i64: 1, 64>}, {pipeline_mode = #tpu.pipeline_mode<synchronous>, transform_indices = @transform_3, window_bounds = array<i64: 2, 64>}, {pipeline_mode = #tpu.pipeline_mode<synchronous>, transform_indices = @transform_4, window_bounds = array<i64: 64, 64>}, {pipeline_mode = #tpu.pipeline_mode<synchronous>, transform_indices = @transform_5, window_bounds = array<i64: 64, 64>}, {pipeline_mode = #tpu.pipeline_mode<synchronous>, transform_indices = @transform_6, window_bounds = array<i64: 64, 64>}, {pipeline_mode = #tpu.pipeline_mode<synchronous>, transform_indices = @transform_7, window_bounds = array<i64: 64, 64>}, {pipeline_mode = #tpu.pipeline_mode<synchronous>, transform_indices = @transform_8, window_bounds = array<i64: 2, 64>}, {pipeline_mode = #tpu.pipeline_mode<synchronous>, transform_indices = @transform_9, window_bounds = array<i64: 64, 256>}, {pipeline_mode = #tpu.pipeline_mode<synchronous>, transform_indices = @transform_10, window_bounds = array<i64: 1, 256>}, {pipeline_mode = #tpu.pipeline_mode<synchronous>, transform_indices = @transform_11, window_bounds = array<i64: 256, 64>}, {pipeline_mode = #tpu.pipeline_mode<synchronous>, transform_indices = @transform_12, window_bounds = array<i64: 1, 64>}, {pipeline_mode = #tpu.pipeline_mode<synchronous>, transform_indices = @transform_13, window_bounds = array<i64: 2, 64>}, {pipeline_mode = #tpu.pipeline_mode<synchronous>, transform_indices = @transform_14, window_bounds = array<i64: 64, 7>}, {pipeline_mode = #tpu.pipeline_mode<synchronous>, transform_indices = @transform_15, window_bounds = array<i64: 1, 7>}, {transform_indices = @transform_16, window_bounds = array<i64: 2, 16, 7>}]} {
    %c0 = arith.constant 0 : index
    %c0_0 = arith.constant 0 : index
    %c0_1 = arith.constant 0 : index
    %0 = vector.load %arg1[%c0, %c0_0, %c0_1] : memref<2x16x512xbf16, #tpu.memory_space<vmem>>, vector<2x16x512xbf16>
    %1 = vector.shape_cast %0 : vector<2x16x512xbf16> to vector<32x512xbf16>
    %c0_2 = arith.constant 0 : index
    %c0_3 = arith.constant 0 : index
    %2 = vector.load %arg2[%c0_2, %c0_3] : memref<512x64xbf16, #tpu.memory_space<vmem>>, vector<512x64xbf16>
    %cst = arith.constant dense<0.000000e+00> : vector<32x64xf32>
    %3 = tpu.matmul %1, %2, %cst {dimension_numbers = #tpu.dot_dimension_numbers<[1], [0], [0], [1], [0, 0, 1, 1], [], []>} : vector<32x512xbf16>, vector<512x64xbf16>, vector<32x64xf32> -> vector<32x64xf32>
    %c0_4 = arith.constant 0 : index
    %c0_5 = arith.constant 0 : index
    %4 = vector.load %arg3[%c0_4, %c0_5] : memref<1x64xf32, #tpu.memory_space<vmem>>, vector<1x64xf32>
    %5 = vector.broadcast %4 : vector<1x64xf32> to vector<32x64xf32>
    %6 = arith.addf %3, %5 : vector<32x64xf32>
    %c0_6 = arith.constant 0 : index
    %c0_7 = arith.constant 0 : index
    %7 = vector.load %arg4[%c0_6, %c0_7] : memref<2x64xf32, #tpu.memory_space<vmem>>, vector<2x64xf32>
    %8 = vector.extract_strided_slice %7 {offsets = [0, 0], sizes = [1, 64], strides = [1, 1]} : vector<2x64xf32> to vector<1x64xf32>
    %9 = vector.extract_strided_slice %7 {offsets = [1, 0], sizes = [1, 64], strides = [1, 1]} : vector<2x64xf32> to vector<1x64xf32>
    %cst_8 = arith.constant dense<0.000000e+00> : vector<32xf32>
    %10 = vector.multi_reduction <add>, %6, %cst_8 [1] : vector<32x64xf32> to vector<32xf32>
    %11 = vector.shape_cast %10 : vector<32xf32> to vector<32x1xf32>
    %cst_9 = arith.constant 6.400000e+01 : f32
    %12 = vector.broadcast %cst_9 : f32 to vector<32x1xf32>
    %13 = arith.divf %11, %12 : vector<32x1xf32>
    %14 = vector.broadcast %13 : vector<32x1xf32> to vector<32x64xf32>
    %15 = arith.subf %6, %14 : vector<32x64xf32>
    %16 = arith.mulf %15, %15 : vector<32x64xf32>
    %cst_10 = arith.constant dense<0.000000e+00> : vector<32xf32>
    %17 = vector.multi_reduction <add>, %16, %cst_10 [1] : vector<32x64xf32> to vector<32xf32>
    %18 = vector.shape_cast %17 : vector<32xf32> to vector<32x1xf32>
    %cst_11 = arith.constant 6.400000e+01 : f32
    %19 = vector.broadcast %cst_11 : f32 to vector<32x1xf32>
    %20 = arith.divf %18, %19 : vector<32x1xf32>
    %21 = vector.broadcast %13 : vector<32x1xf32> to vector<32x64xf32>
    %22 = arith.subf %6, %21 : vector<32x64xf32>
    %cst_12 = arith.constant 9.99999997E-7 : f32
    %23 = vector.broadcast %cst_12 : f32 to vector<32x1xf32>
    %24 = arith.addf %20, %23 : vector<32x1xf32>
    %25 = math.rsqrt %24 : vector<32x1xf32>
    %26 = vector.broadcast %25 : vector<32x1xf32> to vector<32x64xf32>
    %27 = arith.mulf %22, %26 : vector<32x64xf32>
    %28 = vector.broadcast %8 : vector<1x64xf32> to vector<32x64xf32>
    %29 = arith.mulf %27, %28 : vector<32x64xf32>
    %30 = vector.broadcast %9 : vector<1x64xf32> to vector<32x64xf32>
    %31 = arith.addf %29, %30 : vector<32x64xf32>
    %c0_13 = arith.constant 0 : index
    %c0_14 = arith.constant 0 : index
    %32 = vector.load %arg5[%c0_13, %c0_14] : memref<64x64xbf16, #tpu.memory_space<vmem>>, vector<64x64xbf16>
    %33 = arith.truncf %31 : vector<32x64xf32> to vector<32x64xbf16>
    %cst_15 = arith.constant dense<0.000000e+00> : vector<32x64xf32>
    %34 = tpu.matmul %33, %32, %cst_15 {dimension_numbers = #tpu.dot_dimension_numbers<[1], [0], [0], [1], [0, 0, 1, 1], [], []>} : vector<32x64xbf16>, vector<64x64xbf16>, vector<32x64xf32> -> vector<32x64xf32>
    %c0_16 = arith.constant 0 : index
    %c0_17 = arith.constant 0 : index
    %35 = vector.load %arg6[%c0_16, %c0_17] : memref<64x64xbf16, #tpu.memory_space<vmem>>, vector<64x64xbf16>
    %36 = arith.truncf %31 : vector<32x64xf32> to vector<32x64xbf16>
    %cst_18 = arith.constant dense<0.000000e+00> : vector<32x64xf32>
    %37 = tpu.matmul %36, %35, %cst_18 {dimension_numbers = #tpu.dot_dimension_numbers<[1], [0], [0], [1], [0, 0, 1, 1], [], []>} : vector<32x64xbf16>, vector<64x64xbf16>, vector<32x64xf32> -> vector<32x64xf32>
    %c0_19 = arith.constant 0 : index
    %c0_20 = arith.constant 0 : index
    %38 = vector.load %arg7[%c0_19, %c0_20] : memref<64x64xbf16, #tpu.memory_space<vmem>>, vector<64x64xbf16>
    %39 = arith.truncf %31 : vector<32x64xf32> to vector<32x64xbf16>
    %cst_21 = arith.constant dense<0.000000e+00> : vector<32x64xf32>
    %40 = tpu.matmul %39, %38, %cst_21 {dimension_numbers = #tpu.dot_dimension_numbers<[1], [0], [0], [1], [0, 0, 1, 1], [], []>} : vector<32x64xbf16>, vector<64x64xbf16>, vector<32x64xf32> -> vector<32x64xf32>
    %41 = vector.shape_cast %34 : vector<32x64xf32> to vector<2x16x64xf32>
    %42 = arith.truncf %41 : vector<2x16x64xf32> to vector<2x16x64xbf16>
    %43 = vector.shape_cast %37 : vector<32x64xf32> to vector<2x16x64xf32>
    %44 = arith.truncf %43 : vector<2x16x64xf32> to vector<2x16x64xbf16>
    %45 = vector.shape_cast %40 : vector<32x64xf32> to vector<2x16x64xf32>
    %46 = arith.truncf %45 : vector<2x16x64xf32> to vector<2x16x64xbf16>
    "tpu.trace_start"() <{level = 10 : i32, message = "bqd,bkd->bqk"}> : () -> ()
    %cst_22 = arith.constant dense<0.000000e+00> : vector<2x16x16xf32>
    %47 = tpu.matmul %42, %44, %cst_22 {dimension_numbers = #tpu.dot_dimension_numbers<[2], [2], [1], [1], [0, 0, 0, 1, 1, 1], [0], [0]>} : vector<2x16x64xbf16>, vector<2x16x64xbf16>, vector<2x16x16xf32> -> vector<2x16x16xf32>
    "tpu.trace_stop"() : () -> ()
    %cst_23 = arith.constant 1.250000e-01 : f32
    %48 = vector.broadcast %cst_23 : f32 to vector<2x16x16xf32>
    %49 = arith.mulf %47, %48 : vector<2x16x16xf32>
    %cst_24 = arith.constant dense<0xFF800000> : vector<2x16xf32>
    %50 = vector.multi_reduction <maximumf>, %49, %cst_24 [2] : vector<2x16x16xf32> to vector<2x16xf32>
    %51 = vector.shape_cast %50 : vector<2x16xf32> to vector<2x16x1xf32>
    %52 = vector.broadcast %51 : vector<2x16x1xf32> to vector<2x16x16xf32>
    %53 = arith.subf %49, %52 : vector<2x16x16xf32>
    %54 = math.exp %53 : vector<2x16x16xf32>
    %cst_25 = arith.constant dense<0.000000e+00> : vector<2x16xf32>
    %55 = vector.multi_reduction <add>, %54, %cst_25 [2] : vector<2x16x16xf32> to vector<2x16xf32>
    %56 = vector.shape_cast %55 : vector<2x16xf32> to vector<2x16x1xf32>
    %57 = tpu.reciprocal %56 {approx = true} : vector<2x16x1xf32> -> vector<2x16x1xf32>
    %58 = vector.broadcast %57 : vector<2x16x1xf32> to vector<2x16x16xf32>
    %59 = arith.mulf %54, %58 : vector<2x16x16xf32>
    %60 = arith.truncf %59 : vector<2x16x16xf32> to vector<2x16x16xbf16>
    "tpu.trace_start"() <{level = 10 : i32, message = "bqk,bkd->bqd"}> : () -> ()
    %cst_26 = arith.constant dense<0.000000e+00> : vector<2x16x64xf32>
    %61 = tpu.matmul %60, %46, %cst_26 {dimension_numbers = #tpu.dot_dimension_numbers<[2], [1], [1], [2], [0, 0, 0, 1, 1, 2], [0], [0]>} : vector<2x16x16xbf16>, vector<2x16x64xbf16>, vector<2x16x64xf32> -> vector<2x16x64xf32>
    "tpu.trace_stop"() : () -> ()
    %62 = vector.shape_cast %61 : vector<2x16x64xf32> to vector<32x64xf32>
    %c0_27 = arith.constant 0 : index
    %c0_28 = arith.constant 0 : index
    %63 = vector.load %arg8[%c0_27, %c0_28] : memref<64x64xbf16, #tpu.memory_space<vmem>>, vector<64x64xbf16>
    %64 = arith.truncf %62 : vector<32x64xf32> to vector<32x64xbf16>
    %cst_29 = arith.constant dense<0.000000e+00> : vector<32x64xf32>
    %65 = tpu.matmul %64, %63, %cst_29 {dimension_numbers = #tpu.dot_dimension_numbers<[1], [0], [0], [1], [0, 0, 1, 1], [], []>} : vector<32x64xbf16>, vector<64x64xbf16>, vector<32x64xf32> -> vector<32x64xf32>
    %66 = arith.addf %6, %65 : vector<32x64xf32>
    %c0_30 = arith.constant 0 : index
    %c0_31 = arith.constant 0 : index
    %67 = vector.load %arg9[%c0_30, %c0_31] : memref<2x64xf32, #tpu.memory_space<vmem>>, vector<2x64xf32>
    %68 = vector.extract_strided_slice %67 {offsets = [0, 0], sizes = [1, 64], strides = [1, 1]} : vector<2x64xf32> to vector<1x64xf32>
    %69 = vector.extract_strided_slice %67 {offsets = [1, 0], sizes = [1, 64], strides = [1, 1]} : vector<2x64xf32> to vector<1x64xf32>
    %cst_32 = arith.constant dense<0.000000e+00> : vector<32xf32>
    %70 = vector.multi_reduction <add>, %66, %cst_32 [1] : vector<32x64xf32> to vector<32xf32>
    %71 = vector.shape_cast %70 : vector<32xf32> to vector<32x1xf32>
    %cst_33 = arith.constant 6.400000e+01 : f32
    %72 = vector.broadcast %cst_33 : f32 to vector<32x1xf32>
    %73 = arith.divf %71, %72 : vector<32x1xf32>
    %74 = vector.broadcast %73 : vector<32x1xf32> to vector<32x64xf32>
    %75 = arith.subf %66, %74 : vector<32x64xf32>
    %76 = arith.mulf %75, %75 : vector<32x64xf32>
    %cst_34 = arith.constant dense<0.000000e+00> : vector<32xf32>
    %77 = vector.multi_reduction <add>, %76, %cst_34 [1] : vector<32x64xf32> to vector<32xf32>
    %78 = vector.shape_cast %77 : vector<32xf32> to vector<32x1xf32>
    %cst_35 = arith.constant 6.400000e+01 : f32
    %79 = vector.broadcast %cst_35 : f32 to vector<32x1xf32>
    %80 = arith.divf %78, %79 : vector<32x1xf32>
    %81 = vector.broadcast %73 : vector<32x1xf32> to vector<32x64xf32>
    %82 = arith.subf %66, %81 : vector<32x64xf32>
    %cst_36 = arith.constant 9.99999997E-7 : f32
    %83 = vector.broadcast %cst_36 : f32 to vector<32x1xf32>
    %84 = arith.addf %80, %83 : vector<32x1xf32>
    %85 = math.rsqrt %84 : vector<32x1xf32>
    %86 = vector.broadcast %85 : vector<32x1xf32> to vector<32x64xf32>
    %87 = arith.mulf %82, %86 : vector<32x64xf32>
    %88 = vector.broadcast %68 : vector<1x64xf32> to vector<32x64xf32>
    %89 = arith.mulf %87, %88 : vector<32x64xf32>
    %90 = vector.broadcast %69 : vector<1x64xf32> to vector<32x64xf32>
    %91 = arith.addf %89, %90 : vector<32x64xf32>
    %c0_37 = arith.constant 0 : index
    %c0_38 = arith.constant 0 : index
    %92 = vector.load %arg10[%c0_37, %c0_38] : memref<64x256xbf16, #tpu.memory_space<vmem>>, vector<64x256xbf16>
    %93 = arith.truncf %91 : vector<32x64xf32> to vector<32x64xbf16>
    %cst_39 = arith.constant dense<0.000000e+00> : vector<32x256xf32>
    %94 = tpu.matmul %93, %92, %cst_39 {dimension_numbers = #tpu.dot_dimension_numbers<[1], [0], [0], [1], [0, 0, 1, 1], [], []>} : vector<32x64xbf16>, vector<64x256xbf16>, vector<32x256xf32> -> vector<32x256xf32>
    %c0_40 = arith.constant 0 : index
    %c0_41 = arith.constant 0 : index
    %95 = vector.load %arg11[%c0_40, %c0_41] : memref<1x256xf32, #tpu.memory_space<vmem>>, vector<1x256xf32>
    %96 = vector.broadcast %95 : vector<1x256xf32> to vector<32x256xf32>
    %97 = arith.addf %94, %96 : vector<32x256xf32>
    %98 = arith.mulf %97, %97 : vector<32x256xf32>
    %99 = arith.mulf %97, %98 : vector<32x256xf32>
    %cst_42 = arith.constant 4.471500e-02 : f32
    %100 = vector.broadcast %cst_42 : f32 to vector<32x256xf32>
    %101 = arith.mulf %100, %99 : vector<32x256xf32>
    %102 = arith.addf %97, %101 : vector<32x256xf32>
    %cst_43 = arith.constant 0.797884583 : f32
    %103 = vector.broadcast %cst_43 : f32 to vector<32x256xf32>
    %104 = arith.mulf %103, %102 : vector<32x256xf32>
    %105 = math.tanh %104 : vector<32x256xf32>
    %cst_44 = arith.constant 1.000000e+00 : f32
    %106 = vector.broadcast %cst_44 : f32 to vector<32x256xf32>
    %107 = arith.addf %106, %105 : vector<32x256xf32>
    %cst_45 = arith.constant 5.000000e-01 : f32
    %108 = vector.broadcast %cst_45 : f32 to vector<32x256xf32>
    %109 = arith.mulf %108, %107 : vector<32x256xf32>
    %110 = arith.mulf %97, %109 : vector<32x256xf32>
    %c0_46 = arith.constant 0 : index
    %c0_47 = arith.constant 0 : index
    %111 = vector.load %arg12[%c0_46, %c0_47] : memref<256x64xbf16, #tpu.memory_space<vmem>>, vector<256x64xbf16>
    %112 = arith.truncf %110 : vector<32x256xf32> to vector<32x256xbf16>
    %cst_48 = arith.constant dense<0.000000e+00> : vector<32x64xf32>
    %113 = tpu.matmul %112, %111, %cst_48 {dimension_numbers = #tpu.dot_dimension_numbers<[1], [0], [0], [1], [0, 0, 1, 1], [], []>} : vector<32x256xbf16>, vector<256x64xbf16>, vector<32x64xf32> -> vector<32x64xf32>
    %114 = arith.addf %66, %113 : vector<32x64xf32>
    %c0_49 = arith.constant 0 : index
    %c0_50 = arith.constant 0 : index
    %115 = vector.load %arg13[%c0_49, %c0_50] : memref<1x64xf32, #tpu.memory_space<vmem>>, vector<1x64xf32>
    %116 = vector.broadcast %115 : vector<1x64xf32> to vector<32x64xf32>
    %117 = arith.addf %114, %116 : vector<32x64xf32>
    %c0_51 = arith.constant 0 : index
    %c0_52 = arith.constant 0 : index
    %118 = vector.load %arg14[%c0_51, %c0_52] : memref<2x64xf32, #tpu.memory_space<vmem>>, vector<2x64xf32>
    %119 = vector.extract_strided_slice %118 {offsets = [0, 0], sizes = [1, 64], strides = [1, 1]} : vector<2x64xf32> to vector<1x64xf32>
    %120 = vector.extract_strided_slice %118 {offsets = [1, 0], sizes = [1, 64], strides = [1, 1]} : vector<2x64xf32> to vector<1x64xf32>
    %cst_53 = arith.constant dense<0.000000e+00> : vector<32xf32>
    %121 = vector.multi_reduction <add>, %117, %cst_53 [1] : vector<32x64xf32> to vector<32xf32>
    %122 = vector.shape_cast %121 : vector<32xf32> to vector<32x1xf32>
    %cst_54 = arith.constant 6.400000e+01 : f32
    %123 = vector.broadcast %cst_54 : f32 to vector<32x1xf32>
    %124 = arith.divf %122, %123 : vector<32x1xf32>
    %125 = vector.broadcast %124 : vector<32x1xf32> to vector<32x64xf32>
    %126 = arith.subf %117, %125 : vector<32x64xf32>
    %127 = arith.mulf %126, %126 : vector<32x64xf32>
    %cst_55 = arith.constant dense<0.000000e+00> : vector<32xf32>
    %128 = vector.multi_reduction <add>, %127, %cst_55 [1] : vector<32x64xf32> to vector<32xf32>
    %129 = vector.shape_cast %128 : vector<32xf32> to vector<32x1xf32>
    %cst_56 = arith.constant 6.400000e+01 : f32
    %130 = vector.broadcast %cst_56 : f32 to vector<32x1xf32>
    %131 = arith.divf %129, %130 : vector<32x1xf32>
    %132 = vector.broadcast %124 : vector<32x1xf32> to vector<32x64xf32>
    %133 = arith.subf %117, %132 : vector<32x64xf32>
    %cst_57 = arith.constant 9.99999997E-7 : f32
    %134 = vector.broadcast %cst_57 : f32 to vector<32x1xf32>
    %135 = arith.addf %131, %134 : vector<32x1xf32>
    %136 = math.rsqrt %135 : vector<32x1xf32>
    %137 = vector.broadcast %136 : vector<32x1xf32> to vector<32x64xf32>
    %138 = arith.mulf %133, %137 : vector<32x64xf32>
    %139 = vector.broadcast %119 : vector<1x64xf32> to vector<32x64xf32>
    %140 = arith.mulf %138, %139 : vector<32x64xf32>
    %141 = vector.broadcast %120 : vector<1x64xf32> to vector<32x64xf32>
    %142 = arith.addf %140, %141 : vector<32x64xf32>
    %c0_58 = arith.constant 0 : index
    %c0_59 = arith.constant 0 : index
    %143 = vector.load %arg15[%c0_58, %c0_59] : memref<64x7xbf16, #tpu.memory_space<vmem>>, vector<64x7xbf16>
    %144 = arith.truncf %142 : vector<32x64xf32> to vector<32x64xbf16>
    %cst_60 = arith.constant dense<0.000000e+00> : vector<32x7xf32>
    %145 = tpu.matmul %144, %143, %cst_60 {dimension_numbers = #tpu.dot_dimension_numbers<[1], [0], [0], [1], [0, 0, 1, 1], [], []>} : vector<32x64xbf16>, vector<64x7xbf16>, vector<32x7xf32> -> vector<32x7xf32>
    %c0_61 = arith.constant 0 : index
    %c0_62 = arith.constant 0 : index
    %146 = vector.load %arg16[%c0_61, %c0_62] : memref<1x7xf32, #tpu.memory_space<vmem>>, vector<1x7xf32>
    %147 = vector.broadcast %146 : vector<1x7xf32> to vector<32x7xf32>
    %148 = arith.addf %145, %147 : vector<32x7xf32>
    %149 = vector.shape_cast %148 : vector<32x7xf32> to vector<2x16x7xf32>
    %c0_63 = arith.constant 0 : index
    %c0_64 = arith.constant 0 : index
    %c0_65 = arith.constant 0 : index
    %150 = vector.load %arg17[%c0_63, %c0_64, %c0_65] : memref<2x16x7xf32, #tpu.memory_space<vmem>>, vector<2x16x7xf32>
    tpu.vector_store %arg17[%c0_63, %c0_64, %c0_65], %149 {strides = array<i32>} : memref<2x16x7xf32, #tpu.memory_space<vmem>>, vector<2x16x7xf32>,
    return
  }
  func.func @transform_0(%arg0: i32) -> (i32, i32, i32) {
    %c0_i32 = arith.constant 0 : i32
    %c0_i32_0 = arith.constant 0 : i32
    %c0_i32_1 = arith.constant 0 : i32
    return %arg0, %c0_i32, %c0_i32_0 : i32, i32, i32
  }
  func.func @transform_1(%arg0: i32) -> (i32, i32) {
    %c0_i32 = arith.constant 0 : i32
    %c0_i32_0 = arith.constant 0 : i32
    %c0_i32_1 = arith.constant 0 : i32
    return %c0_i32, %c0_i32_0 : i32, i32
  }
  func.func @transform_2(%arg0: i32) -> (i32, i32) {
    %c0_i32 = arith.constant 0 : i32
    %c0_i32_0 = arith.constant 0 : i32
    %c0_i32_1 = arith.constant 0 : i32
    return %c0_i32, %c0_i32_0 : i32, i32
  }
  func.func @transform_3(%arg0: i32) -> (i32, i32) {
    %c0_i32 = arith.constant 0 : i32
    %c0_i32_0 = arith.constant 0 : i32
    %c0_i32_1 = arith.constant 0 : i32
    return %c0_i32, %c0_i32_0 : i32, i32
  }
  func.func @transform_4(%arg0: i32) -> (i32, i32) {
    %c0_i32 = arith.constant 0 : i32
    %c0_i32_0 = arith.constant 0 : i32
    %c0_i32_1 = arith.constant 0 : i32
    return %c0_i32, %c0_i32_0 : i32, i32
  }
  func.func @transform_5(%arg0: i32) -> (i32, i32) {
    %c0_i32 = arith.constant 0 : i32
    %c0_i32_0 = arith.constant 0 : i32
    %c0_i32_1 = arith.constant 0 : i32
    return %c0_i32, %c0_i32_0 : i32, i32
  }
  func.func @transform_6(%arg0: i32) -> (i32, i32) {
    %c0_i32 = arith.constant 0 : i32
    %c0_i32_0 = arith.constant 0 : i32
    %c0_i32_1 = arith.constant 0 : i32
    return %c0_i32, %c0_i32_0 : i32, i32
  }
  func.func @transform_7(%arg0: i32) -> (i32, i32) {
    %c0_i32 = arith.constant 0 : i32
    %c0_i32_0 = arith.constant 0 : i32
    %c0_i32_1 = arith.constant 0 : i32
    return %c0_i32, %c0_i32_0 : i32, i32
  }
  func.func @transform_8(%arg0: i32) -> (i32, i32) {
    %c0_i32 = arith.constant 0 : i32
    %c0_i32_0 = arith.constant 0 : i32
    %c0_i32_1 = arith.constant 0 : i32
    return %c0_i32, %c0_i32_0 : i32, i32
  }
  func.func @transform_9(%arg0: i32) -> (i32, i32) {
    %c0_i32 = arith.constant 0 : i32
    %c0_i32_0 = arith.constant 0 : i32
    %c0_i32_1 = arith.constant 0 : i32
    return %c0_i32, %c0_i32_0 : i32, i32
  }
  func.func @transform_10(%arg0: i32) -> (i32, i32) {
    %c0_i32 = arith.constant 0 : i32
    %c0_i32_0 = arith.constant 0 : i32
    %c0_i32_1 = arith.constant 0 : i32
    return %c0_i32, %c0_i32_0 : i32, i32
  }
  func.func @transform_11(%arg0: i32) -> (i32, i32) {
    %c0_i32 = arith.constant 0 : i32
    %c0_i32_0 = arith.constant 0 : i32
    %c0_i32_1 = arith.constant 0 : i32
    return %c0_i32, %c0_i32_0 : i32, i32
  }
  func.func @transform_12(%arg0: i32) -> (i32, i32) {
    %c0_i32 = arith.constant 0 : i32
    %c0_i32_0 = arith.constant 0 : i32
    %c0_i32_1 = arith.constant 0 : i32
    return %c0_i32, %c0_i32_0 : i32, i32
  }
  func.func @transform_13(%arg0: i32) -> (i32, i32) {
    %c0_i32 = arith.constant 0 : i32
    %c0_i32_0 = arith.constant 0 : i32
    %c0_i32_1 = arith.constant 0 : i32
    return %c0_i32, %c0_i32_0 : i32, i32
  }
  func.func @transform_14(%arg0: i32) -> (i32, i32) {
    %c0_i32 = arith.constant 0 : i32
    %c0_i32_0 = arith.constant 0 : i32
    %c0_i32_1 = arith.constant 0 : i32
    return %c0_i32, %c0_i32_0 : i32, i32
  }
  func.func @transform_15(%arg0: i32) -> (i32, i32) {
    %c0_i32 = arith.constant 0 : i32
    %c0_i32_0 = arith.constant 0 : i32
    %c0_i32_1 = arith.constant 0 : i32
    return %c0_i32, %c0_i32_0 : i32, i32
  }
  func.func @transform_16(%arg0: i32) -> (i32, i32, i32) {
    %c0_i32 = arith.constant 0 : i32
    %c0_i32_0 = arith.constant 0 : i32
    %c0_i32_1 = arith.constant 0 : i32
    return %arg0, %c0_i32, %c0_i32_0 : i32, i32, i32
  }
}

module attributes {stable_mosaic.version = 11 : i64} {
  func.func @_upsample_softmax_kernel(%arg0: i32, %arg1: memref<1x7x4x4xf32, #tpu.memory_space<vmem>>, %arg2: memref<16x4xf32, #tpu.memory_space<vmem>>, %arg3: memref<4x16xf32, #tpu.memory_space<vmem>>, %arg4: memref<1x7x16x16xf32, #tpu.memory_space<vmem>>) attributes {dimension_semantics = [#tpu.dimension_semantics<parallel>], iteration_bounds = array<i64: 2>, scalar_prefetch = 0 : i64, scratch_operands = 0 : i64, tpu.core_type = #tpu.core_type<tc>, window_params = [{transform_indices = @transform_0, window_bounds = array<i64: 1, 7, 4, 4>}, {pipeline_mode = #tpu.pipeline_mode<synchronous>, transform_indices = @transform_1, window_bounds = array<i64: 16, 4>}, {pipeline_mode = #tpu.pipeline_mode<synchronous>, transform_indices = @transform_2, window_bounds = array<i64: 4, 16>}, {transform_indices = @transform_3, window_bounds = array<i64: 1, 7, 16, 16>}]} {
    %c0 = arith.constant 0 : index
    %c0_0 = arith.constant 0 : index
    %0 = vector.load %arg2[%c0, %c0_0] : memref<16x4xf32, #tpu.memory_space<vmem>>, vector<16x4xf32>
    %c0_1 = arith.constant 0 : index
    %c0_2 = arith.constant 0 : index
    %1 = vector.load %arg3[%c0_1, %c0_2] : memref<4x16xf32, #tpu.memory_space<vmem>>, vector<4x16xf32>
    %c0_3 = arith.constant 0 : index
    %c0_4 = arith.constant 0 : index
    %c0_5 = arith.constant 0 : index
    %c0_6 = arith.constant 0 : index
    %2 = vector.load %arg1[%c0_3, %c0_4, %c0_5, %c0_6] : memref<1x7x4x4xf32, #tpu.memory_space<vmem>>, vector<1x1x4x4xf32>
    %3 = vector.shape_cast %2 : vector<1x1x4x4xf32> to vector<4x4xf32>
    %cst = arith.constant dense<0.000000e+00> : vector<4x16xf32>
    %4 = tpu.matmul %3, %1, %cst {dimension_numbers = #tpu.dot_dimension_numbers<[1], [0], [0], [1], [0, 0, 1, 1], [], []>} : vector<4x4xf32>, vector<4x16xf32>, vector<4x16xf32> -> vector<4x16xf32>
    %cst_7 = arith.constant dense<0.000000e+00> : vector<16x16xf32>
    %5 = tpu.matmul %0, %4, %cst_7 {dimension_numbers = #tpu.dot_dimension_numbers<[1], [0], [0], [1], [0, 0, 1, 1], [], []>} : vector<16x4xf32>, vector<4x16xf32>, vector<16x16xf32> -> vector<16x16xf32>
    %c0_8 = arith.constant 0 : index
    %c1 = arith.constant 1 : index
    %c0_9 = arith.constant 0 : index
    %c0_10 = arith.constant 0 : index
    %6 = vector.load %arg1[%c0_8, %c1, %c0_9, %c0_10] : memref<1x7x4x4xf32, #tpu.memory_space<vmem>>, vector<1x1x4x4xf32>
    %7 = vector.shape_cast %6 : vector<1x1x4x4xf32> to vector<4x4xf32>
    %cst_11 = arith.constant dense<0.000000e+00> : vector<4x16xf32>
    %8 = tpu.matmul %7, %1, %cst_11 {dimension_numbers = #tpu.dot_dimension_numbers<[1], [0], [0], [1], [0, 0, 1, 1], [], []>} : vector<4x4xf32>, vector<4x16xf32>, vector<4x16xf32> -> vector<4x16xf32>
    %cst_12 = arith.constant dense<0.000000e+00> : vector<16x16xf32>
    %9 = tpu.matmul %0, %8, %cst_12 {dimension_numbers = #tpu.dot_dimension_numbers<[1], [0], [0], [1], [0, 0, 1, 1], [], []>} : vector<16x4xf32>, vector<4x16xf32>, vector<16x16xf32> -> vector<16x16xf32>
    %c0_13 = arith.constant 0 : index
    %c2 = arith.constant 2 : index
    %c0_14 = arith.constant 0 : index
    %c0_15 = arith.constant 0 : index
    %10 = vector.load %arg1[%c0_13, %c2, %c0_14, %c0_15] : memref<1x7x4x4xf32, #tpu.memory_space<vmem>>, vector<1x1x4x4xf32>
    %11 = vector.shape_cast %10 : vector<1x1x4x4xf32> to vector<4x4xf32>
    %cst_16 = arith.constant dense<0.000000e+00> : vector<4x16xf32>
    %12 = tpu.matmul %11, %1, %cst_16 {dimension_numbers = #tpu.dot_dimension_numbers<[1], [0], [0], [1], [0, 0, 1, 1], [], []>} : vector<4x4xf32>, vector<4x16xf32>, vector<4x16xf32> -> vector<4x16xf32>
    %cst_17 = arith.constant dense<0.000000e+00> : vector<16x16xf32>
    %13 = tpu.matmul %0, %12, %cst_17 {dimension_numbers = #tpu.dot_dimension_numbers<[1], [0], [0], [1], [0, 0, 1, 1], [], []>} : vector<16x4xf32>, vector<4x16xf32>, vector<16x16xf32> -> vector<16x16xf32>
    %c0_18 = arith.constant 0 : index
    %c3 = arith.constant 3 : index
    %c0_19 = arith.constant 0 : index
    %c0_20 = arith.constant 0 : index
    %14 = vector.load %arg1[%c0_18, %c3, %c0_19, %c0_20] : memref<1x7x4x4xf32, #tpu.memory_space<vmem>>, vector<1x1x4x4xf32>
    %15 = vector.shape_cast %14 : vector<1x1x4x4xf32> to vector<4x4xf32>
    %cst_21 = arith.constant dense<0.000000e+00> : vector<4x16xf32>
    %16 = tpu.matmul %15, %1, %cst_21 {dimension_numbers = #tpu.dot_dimension_numbers<[1], [0], [0], [1], [0, 0, 1, 1], [], []>} : vector<4x4xf32>, vector<4x16xf32>, vector<4x16xf32> -> vector<4x16xf32>
    %cst_22 = arith.constant dense<0.000000e+00> : vector<16x16xf32>
    %17 = tpu.matmul %0, %16, %cst_22 {dimension_numbers = #tpu.dot_dimension_numbers<[1], [0], [0], [1], [0, 0, 1, 1], [], []>} : vector<16x4xf32>, vector<4x16xf32>, vector<16x16xf32> -> vector<16x16xf32>
    %c0_23 = arith.constant 0 : index
    %c4 = arith.constant 4 : index
    %c0_24 = arith.constant 0 : index
    %c0_25 = arith.constant 0 : index
    %18 = vector.load %arg1[%c0_23, %c4, %c0_24, %c0_25] : memref<1x7x4x4xf32, #tpu.memory_space<vmem>>, vector<1x1x4x4xf32>
    %19 = vector.shape_cast %18 : vector<1x1x4x4xf32> to vector<4x4xf32>
    %cst_26 = arith.constant dense<0.000000e+00> : vector<4x16xf32>
    %20 = tpu.matmul %19, %1, %cst_26 {dimension_numbers = #tpu.dot_dimension_numbers<[1], [0], [0], [1], [0, 0, 1, 1], [], []>} : vector<4x4xf32>, vector<4x16xf32>, vector<4x16xf32> -> vector<4x16xf32>
    %cst_27 = arith.constant dense<0.000000e+00> : vector<16x16xf32>
    %21 = tpu.matmul %0, %20, %cst_27 {dimension_numbers = #tpu.dot_dimension_numbers<[1], [0], [0], [1], [0, 0, 1, 1], [], []>} : vector<16x4xf32>, vector<4x16xf32>, vector<16x16xf32> -> vector<16x16xf32>
    %c0_28 = arith.constant 0 : index
    %c5 = arith.constant 5 : index
    %c0_29 = arith.constant 0 : index
    %c0_30 = arith.constant 0 : index
    %22 = vector.load %arg1[%c0_28, %c5, %c0_29, %c0_30] : memref<1x7x4x4xf32, #tpu.memory_space<vmem>>, vector<1x1x4x4xf32>
    %23 = vector.shape_cast %22 : vector<1x1x4x4xf32> to vector<4x4xf32>
    %cst_31 = arith.constant dense<0.000000e+00> : vector<4x16xf32>
    %24 = tpu.matmul %23, %1, %cst_31 {dimension_numbers = #tpu.dot_dimension_numbers<[1], [0], [0], [1], [0, 0, 1, 1], [], []>} : vector<4x4xf32>, vector<4x16xf32>, vector<4x16xf32> -> vector<4x16xf32>
    %cst_32 = arith.constant dense<0.000000e+00> : vector<16x16xf32>
    %25 = tpu.matmul %0, %24, %cst_32 {dimension_numbers = #tpu.dot_dimension_numbers<[1], [0], [0], [1], [0, 0, 1, 1], [], []>} : vector<16x4xf32>, vector<4x16xf32>, vector<16x16xf32> -> vector<16x16xf32>
    %c0_33 = arith.constant 0 : index
    %c6 = arith.constant 6 : index
    %c0_34 = arith.constant 0 : index
    %c0_35 = arith.constant 0 : index
    %26 = vector.load %arg1[%c0_33, %c6, %c0_34, %c0_35] : memref<1x7x4x4xf32, #tpu.memory_space<vmem>>, vector<1x1x4x4xf32>
    %27 = vector.shape_cast %26 : vector<1x1x4x4xf32> to vector<4x4xf32>
    %cst_36 = arith.constant dense<0.000000e+00> : vector<4x16xf32>
    %28 = tpu.matmul %27, %1, %cst_36 {dimension_numbers = #tpu.dot_dimension_numbers<[1], [0], [0], [1], [0, 0, 1, 1], [], []>} : vector<4x4xf32>, vector<4x16xf32>, vector<4x16xf32> -> vector<4x16xf32>
    %cst_37 = arith.constant dense<0.000000e+00> : vector<16x16xf32>
    %29 = tpu.matmul %0, %28, %cst_37 {dimension_numbers = #tpu.dot_dimension_numbers<[1], [0], [0], [1], [0, 0, 1, 1], [], []>} : vector<16x4xf32>, vector<4x16xf32>, vector<16x16xf32> -> vector<16x16xf32>
    %30 = arith.maximumf %5, %9 : vector<16x16xf32>
    %31 = arith.maximumf %30, %13 : vector<16x16xf32>
    %32 = arith.maximumf %31, %17 : vector<16x16xf32>
    %33 = arith.maximumf %32, %21 : vector<16x16xf32>
    %34 = arith.maximumf %33, %25 : vector<16x16xf32>
    %35 = arith.maximumf %34, %29 : vector<16x16xf32>
    %36 = arith.subf %5, %35 : vector<16x16xf32>
    %37 = math.exp %36 : vector<16x16xf32>
    %38 = arith.subf %9, %35 : vector<16x16xf32>
    %39 = math.exp %38 : vector<16x16xf32>
    %40 = arith.subf %13, %35 : vector<16x16xf32>
    %41 = math.exp %40 : vector<16x16xf32>
    %42 = arith.subf %17, %35 : vector<16x16xf32>
    %43 = math.exp %42 : vector<16x16xf32>
    %44 = arith.subf %21, %35 : vector<16x16xf32>
    %45 = math.exp %44 : vector<16x16xf32>
    %46 = arith.subf %25, %35 : vector<16x16xf32>
    %47 = math.exp %46 : vector<16x16xf32>
    %48 = arith.subf %29, %35 : vector<16x16xf32>
    %49 = math.exp %48 : vector<16x16xf32>
    %50 = arith.addf %37, %39 : vector<16x16xf32>
    %51 = arith.addf %50, %41 : vector<16x16xf32>
    %52 = arith.addf %51, %43 : vector<16x16xf32>
    %53 = arith.addf %52, %45 : vector<16x16xf32>
    %54 = arith.addf %53, %47 : vector<16x16xf32>
    %55 = arith.addf %54, %49 : vector<16x16xf32>
    %56 = tpu.reciprocal %55 {approx = true} : vector<16x16xf32> -> vector<16x16xf32>
    %57 = arith.mulf %55, %56 : vector<16x16xf32>
    %cst_38 = arith.constant 2.000000e+00 : f32
    %58 = vector.broadcast %cst_38 : f32 to vector<16x16xf32>
    %59 = arith.subf %58, %57 : vector<16x16xf32>
    %60 = arith.mulf %56, %59 : vector<16x16xf32>
    %61 = arith.mulf %37, %60 : vector<16x16xf32>
    %c0_39 = arith.constant 0 : index
    %c0_40 = arith.constant 0 : index
    %c0_41 = arith.constant 0 : index
    %c0_42 = arith.constant 0 : index
    %62 = vector.load %arg4[%c0_39, %c0_40, %c0_41, %c0_42] : memref<1x7x16x16xf32, #tpu.memory_space<vmem>>, vector<1x1x16x16xf32>
    %63 = vector.shape_cast %62 : vector<1x1x16x16xf32> to vector<16x16xf32>
    %64 = vector.shape_cast %61 : vector<16x16xf32> to vector<1x1x16x16xf32>
    tpu.vector_store %arg4[%c0_39, %c0_40, %c0_41, %c0_42], %64 {strides = array<i32>} : memref<1x7x16x16xf32, #tpu.memory_space<vmem>>, vector<1x1x16x16xf32>,
    %65 = arith.mulf %39, %60 : vector<16x16xf32>
    %c0_43 = arith.constant 0 : index
    %c1_44 = arith.constant 1 : index
    %c0_45 = arith.constant 0 : index
    %c0_46 = arith.constant 0 : index
    %66 = vector.load %arg4[%c0_43, %c1_44, %c0_45, %c0_46] : memref<1x7x16x16xf32, #tpu.memory_space<vmem>>, vector<1x1x16x16xf32>
    %67 = vector.shape_cast %66 : vector<1x1x16x16xf32> to vector<16x16xf32>
    %68 = vector.shape_cast %65 : vector<16x16xf32> to vector<1x1x16x16xf32>
    tpu.vector_store %arg4[%c0_43, %c1_44, %c0_45, %c0_46], %68 {strides = array<i32>} : memref<1x7x16x16xf32, #tpu.memory_space<vmem>>, vector<1x1x16x16xf32>,
    %69 = arith.mulf %41, %60 : vector<16x16xf32>
    %c0_47 = arith.constant 0 : index
    %c2_48 = arith.constant 2 : index
    %c0_49 = arith.constant 0 : index
    %c0_50 = arith.constant 0 : index
    %70 = vector.load %arg4[%c0_47, %c2_48, %c0_49, %c0_50] : memref<1x7x16x16xf32, #tpu.memory_space<vmem>>, vector<1x1x16x16xf32>
    %71 = vector.shape_cast %70 : vector<1x1x16x16xf32> to vector<16x16xf32>
    %72 = vector.shape_cast %69 : vector<16x16xf32> to vector<1x1x16x16xf32>
    tpu.vector_store %arg4[%c0_47, %c2_48, %c0_49, %c0_50], %72 {strides = array<i32>} : memref<1x7x16x16xf32, #tpu.memory_space<vmem>>, vector<1x1x16x16xf32>,
    %73 = arith.mulf %43, %60 : vector<16x16xf32>
    %c0_51 = arith.constant 0 : index
    %c3_52 = arith.constant 3 : index
    %c0_53 = arith.constant 0 : index
    %c0_54 = arith.constant 0 : index
    %74 = vector.load %arg4[%c0_51, %c3_52, %c0_53, %c0_54] : memref<1x7x16x16xf32, #tpu.memory_space<vmem>>, vector<1x1x16x16xf32>
    %75 = vector.shape_cast %74 : vector<1x1x16x16xf32> to vector<16x16xf32>
    %76 = vector.shape_cast %73 : vector<16x16xf32> to vector<1x1x16x16xf32>
    tpu.vector_store %arg4[%c0_51, %c3_52, %c0_53, %c0_54], %76 {strides = array<i32>} : memref<1x7x16x16xf32, #tpu.memory_space<vmem>>, vector<1x1x16x16xf32>,
    %77 = arith.mulf %45, %60 : vector<16x16xf32>
    %c0_55 = arith.constant 0 : index
    %c4_56 = arith.constant 4 : index
    %c0_57 = arith.constant 0 : index
    %c0_58 = arith.constant 0 : index
    %78 = vector.load %arg4[%c0_55, %c4_56, %c0_57, %c0_58] : memref<1x7x16x16xf32, #tpu.memory_space<vmem>>, vector<1x1x16x16xf32>
    %79 = vector.shape_cast %78 : vector<1x1x16x16xf32> to vector<16x16xf32>
    %80 = vector.shape_cast %77 : vector<16x16xf32> to vector<1x1x16x16xf32>
    tpu.vector_store %arg4[%c0_55, %c4_56, %c0_57, %c0_58], %80 {strides = array<i32>} : memref<1x7x16x16xf32, #tpu.memory_space<vmem>>, vector<1x1x16x16xf32>,
    %81 = arith.mulf %47, %60 : vector<16x16xf32>
    %c0_59 = arith.constant 0 : index
    %c5_60 = arith.constant 5 : index
    %c0_61 = arith.constant 0 : index
    %c0_62 = arith.constant 0 : index
    %82 = vector.load %arg4[%c0_59, %c5_60, %c0_61, %c0_62] : memref<1x7x16x16xf32, #tpu.memory_space<vmem>>, vector<1x1x16x16xf32>
    %83 = vector.shape_cast %82 : vector<1x1x16x16xf32> to vector<16x16xf32>
    %84 = vector.shape_cast %81 : vector<16x16xf32> to vector<1x1x16x16xf32>
    tpu.vector_store %arg4[%c0_59, %c5_60, %c0_61, %c0_62], %84 {strides = array<i32>} : memref<1x7x16x16xf32, #tpu.memory_space<vmem>>, vector<1x1x16x16xf32>,
    %85 = arith.mulf %49, %60 : vector<16x16xf32>
    %c0_63 = arith.constant 0 : index
    %c6_64 = arith.constant 6 : index
    %c0_65 = arith.constant 0 : index
    %c0_66 = arith.constant 0 : index
    %86 = vector.load %arg4[%c0_63, %c6_64, %c0_65, %c0_66] : memref<1x7x16x16xf32, #tpu.memory_space<vmem>>, vector<1x1x16x16xf32>
    %87 = vector.shape_cast %86 : vector<1x1x16x16xf32> to vector<16x16xf32>
    %88 = vector.shape_cast %85 : vector<16x16xf32> to vector<1x1x16x16xf32>
    tpu.vector_store %arg4[%c0_63, %c6_64, %c0_65, %c0_66], %88 {strides = array<i32>} : memref<1x7x16x16xf32, #tpu.memory_space<vmem>>, vector<1x1x16x16xf32>,
    return
  }
  func.func @transform_0(%arg0: i32) -> (i32, i32, i32, i32) {
    %c0_i32 = arith.constant 0 : i32
    %c0_i32_0 = arith.constant 0 : i32
    %c0_i32_1 = arith.constant 0 : i32
    %c0_i32_2 = arith.constant 0 : i32
    return %arg0, %c0_i32, %c0_i32_0, %c0_i32_1 : i32, i32, i32, i32
  }
  func.func @transform_1(%arg0: i32) -> (i32, i32) {
    %c0_i32 = arith.constant 0 : i32
    %c0_i32_0 = arith.constant 0 : i32
    %c0_i32_1 = arith.constant 0 : i32
    return %c0_i32, %c0_i32_0 : i32, i32
  }
  func.func @transform_2(%arg0: i32) -> (i32, i32) {
    %c0_i32 = arith.constant 0 : i32
    %c0_i32_0 = arith.constant 0 : i32
    %c0_i32_1 = arith.constant 0 : i32
    return %c0_i32, %c0_i32_0 : i32, i32
  }
  func.func @transform_3(%arg0: i32) -> (i32, i32, i32, i32) {
    %c0_i32 = arith.constant 0 : i32
    %c0_i32_0 = arith.constant 0 : i32
    %c0_i32_1 = arith.constant 0 : i32
    %c0_i32_2 = arith.constant 0 : i32
    return %arg0, %c0_i32, %c0_i32_0, %c0_i32_1 : i32, i32, i32, i32
  }
}

</mosaic_0001>

<bundles_post_ra>
// kernel: cloud_mask_forward.3
= control target key start
LH: loop header
LB: loop body
LE: loop exit
PB: predicated region body
PF: predicated region fallthrough
CT: control target
= control target key end

     0   :  { %v1030_v0 = vmov 3   ;;  %v1031_v1 = vmov 0   ;;  %v1032_v10 = vmov 1   ;;  %v1033_v11 = vmov 2   ;;  %s1816_s1 = inlined_call_operand.vmem [shape: f32[64,4], index: 1, kind: input, shape index: {}]   ;;  %s1817_s2 = inlined_call_operand.vmem [shape: f32[64,1], index: 2, kind: input, shape index: {}]   ;;  %s1818_s0 = inlined_call_operand.vmem [shape: f32[4,512], index: 0, kind: input, shape index: {}]   ;;  %s1819_s4 = inlined_call_operand.vmem [shape: f32[32,1], index: 4, kind: input, shape index: {}]   ;;  %s1820_s3 = inlined_call_operand.vmem [shape: f32[32,64], index: 3, kind: input, shape index: {}]   ;;  %s1821_s5 = inlined_call_operand.vmem [shape: bf16[32,512], index: 5, kind: output, shape index: {}]  }
   0x1   :  { %1003 = vset.pattern.permute.xlu0 %v1030_v0  ;;  %1000 = vset.pattern.permute.xlu2 %v1031_v1  ;;  %v27_v2 = vld [vmem:[%s1816_s1 + $0x38] sm:$0xff]  ;;  %v24_v3 = vld [vmem:[%s1816_s1 + $0x20] sm:$0xff]  ;;  %v22_v4 = vld [vmem:[%s1816_s1 + $0x10] sm:$0xff]  ;;  %vm771_vm0 = vcmask 523264  }
   0x2   :  { %999 = vset.pattern.permute.xlu1 %v1031_v1  ;;  %627 = vperm.xlu0 %1003, %v27_v2   ;;  %v25_v5 = vld [vmem:[%s1816_s1 + $0x28] sm:$0xff]  ;;  %v1082_v6 = vld [vmem:[%s1816_s1 + $0x18] sm:$0xff]  ;;  %v1087_v7 = vld [vmem:[%s1816_s1] sm:$0xff] }
   0x3   :  { %59 = vperm.xlu2 %1000, %v24_v3   ;;  %49 = vperm.xlu1 %999, %v22_v4   ;;  %v26_v8 = vld [vmem:[%s1816_s1 + $0x30] sm:$0xff]  ;;  %v1098_v9 = vld [vmem:[%s1816_s1 + $0x8] sm:$0xff]  ;;  %v35_v12 = vld [vmem:[%s1817_s2 + $0x38] sm:$0xff] }
   0x4   :  { %v34_v13 = vld [vmem:[%s1817_s2 + $0x30] sm:$0xff]  ;;  %v33_v14 = vld [vmem:[%s1817_s2 + $0x28] sm:$0xff]  ;;  %v32_v15 = vld [vmem:[%s1817_s2 + $0x20] sm:$0xff] }
   0x5   :  { %v31_v16 = vld [vmem:[%s1817_s2 + $0x18] sm:$0xff]  ;;  %v30_v17 = vld [vmem:[%s1817_s2 + $0x10] sm:$0xff]  ;;  %v29_v19 = vld [vmem:[%s1817_s2 + $0x8] sm:$0xff] }
   0x6   :  { %v36_v22 = vld [vmem:[%s1818_s0] ss:$4 sm:$0xf]  ;;  %v977_v42 = vld [vmem:[%s1818_s0 + $0x2] ss:$4 sm:$0xf] }
   0x7   :  { %v1141_v23 = vperm.slane %v36_v22, 0  ;;  %v1143_v24 = vperm.slane %v36_v22, 1  ;;  %v1145_v25 = vperm.slane %v36_v22, 2  ;;  %v1147_v26 = vperm.slane %v36_v22, 3  ;;  %v28_v27 = vld [vmem:[%s1817_s2] sm:$0xff] }
   0x8   :  { %v1188_v45 = vperm.slane %v977_v42, 0  ;;  %v1190_v46 = vperm.slane %v977_v42, 1  ;;  %v1192_v47 = vperm.slane %v977_v42, 2  ;;  %v976_v49 = vld [vmem:[%s1818_s0 + $0x1] ss:$4 sm:$0xf] }
   0x9   :  { %v978_v54 = vld [vmem:[%s1818_s0 + $0x3] ss:$4 sm:$0xf]  ;;  %v1222_v58 = vperm.slane %v977_v42, 3 }
   0xa   :  { %1004 = vset.pattern.permute.xlu0 %v1031_v1 }
   0xb   :  { %64 = vperm.xlu2 %1000, %v25_v5   ;;  %54 = vperm.xlu1 %999, %v1082_v6  }
   0xc   :  { %39 = vperm.xlu0 %1004, %v1087_v7  }
  0x13   :  { %69 = vperm.xlu2 %1000, %v26_v8   ;;  %1001 = vset.pattern.permute.xlu1 %v1032_v10 }
  0x14   :  { %285 = vperm.xlu1 %1001, %v27_v2   ;;  %44 = vperm.xlu0 %1004, %v1098_v9  }
  0x1b   :  { %1002 = vset.pattern.permute.xlu2 %v1033_v11 }
  0x1c   :  { %456 = vperm.xlu2 %1002, %v27_v2   ;;  %281 = vperm.xlu1 %1001, %v26_v8  }
  0x1d   :  { %74 = vperm.xlu0 %1004, %v27_v2   ;;  %v1243_v2 = vperm.slane %v978_v54, 1 }
  0x24   :  { %452 = vperm.xlu2 %1002, %v26_v8   ;;  %277 = vperm.xlu1 %1001, %v25_v5  }
  0x25   :  { %155 = vperm.xlu0 %1004, %v35_v12  }
  0x2c   :  { %1006 = vset.pattern.permute.xlu2 %v1032_v10  ;;  %1005 = vset.pattern.permute.xlu1 %v1031_v1 }
  0x2d   :  { %150 = vperm.xlu0 %1004, %v34_v13   ;;  %273 = vperm.xlu2 %1006, %v24_v3  }
  0x2e   :  { %145 = vperm.xlu1 %1005, %v33_v14  }
  0x35   :  { %140 = vperm.xlu0 %1004, %v32_v15   ;;  %1008 = vset.pattern.permute.xlu2 %v1030_v0  ;;  %v1270_v15 = vperm.slane %v978_v54, 3 }
  0x36   :  { %1007 = vset.pattern.permute.xlu1 %v1033_v11  ;;  %623 = vperm.xlu2 %1008, %v26_v8  }
  0x37   :  { %448 = vperm.xlu1 %1007, %v25_v5  }
  0x3d   :  { %1013 = vset.pattern.permute.xlu0 %v1032_v10 }
  0x3e   :  { %1010 = vset.pattern.permute.xlu2 %v1033_v11  ;;  %265 = vperm.xlu0 %1013, %v22_v4  }
  0x3f   :  { %1009 = vset.pattern.permute.xlu1 %v1032_v10  ;;  %444 = vperm.xlu2 %1010, %v24_v3  }
  0x40   :  { %269 = vperm.xlu1 %1009, %v1082_v6  }
  0x46   :  { %1018 = vset.pattern.permute.xlu0 %v1033_v11 }
  0x47   :  { %1012 = vset.pattern.permute.xlu2 %v1031_v1  ;;  %436 = vperm.xlu0 %1018, %v22_v4  }
  0x48   :  { %1011 = vset.pattern.permute.xlu1 %v1030_v0  ;;  %135 = vperm.xlu2 %1012, %v31_v16  }
  0x49   :  { %619 = vperm.xlu1 %1011, %v25_v5   ;;  %v1250_v5 = vperm.slane %v976_v49, 2 }
  0x4b   :  { %1845 = vst [vmem:[#allocation21_spill] sm:$0xff] %v1250_v5 }
  0x4f   :  { %1023 = vset.pattern.permute.xlu0 %v1030_v0 }
  0x50   :  { %1015 = vset.pattern.permute.xlu2 %v1030_v0  ;;  %607 = vperm.xlu0 %1023, %v22_v4   ;;  %v1248_v4 = vperm.slane %v976_v49, 1 }
  0x51   :  { %1014 = vset.pattern.permute.xlu1 %v1033_v11  ;;  %615 = vperm.xlu2 %1015, %v24_v3  }
  0x52   :  { %440 = vperm.xlu1 %1014, %v1082_v6  }
  0x58   :  { %1027 = vset.pattern.permute.xlu0 %v1031_v1 }
  0x59   :  { %1017 = vset.pattern.permute.xlu2 %v1032_v10 }
  0x5a   :  { %1016 = vset.pattern.permute.xlu1 %v1031_v1  ;;  %261 = vperm.xlu2 %1017, %v1098_v9  }
  0x5b   :  { %130 = vperm.xlu1 %1016, %v30_v17  }
  0x5d   :  { %v60_v18 = vpop.permute.xlu2 %59 }
  0x5e   :  { %v1214_v55 = vmul.f32 %v1141_v23, %v60_v18  ;;  %v1217_v56 = vmul.f32 %v1143_v24, %v60_v18  ;;  %v1220_v57 = vmul.f32 %v1145_v25, %v60_v18  ;;  %v1225_v59 = vmul.f32 %v1147_v26, %v60_v18 }
  0x60   :  { %1838 = vst [vmem:[#allocation14_spill] sm:$0xff] %v1214_v55 }
  0x61   :  { %1839 = vst [vmem:[#allocation15_spill] sm:$0xff] %v1217_v56 }
  0x62   :  { %1020 = vset.pattern.permute.xlu2 %v1031_v1  ;;  %1840 = vst [vmem:[#allocation16_spill] sm:$0xff] %v1220_v57 }
  0x63   :  { %1019 = vset.pattern.permute.xlu1 %v1030_v0  ;;  %125 = vperm.xlu2 %1020, %v29_v19   ;;  %1841 = vst [vmem:[#allocation17_spill] sm:$0xff] %v1225_v59 }
  0x64   :  { %611 = vperm.xlu1 %1019, %v1082_v6   ;;  %v1252_v6 = vperm.slane %v976_v49, 3 }
  0x65   :  { %v65_v20 = vpop.permute.xlu2 %64 }
  0x66   :  { %v1228_v60 = vmul.f32 %v1141_v23, %v65_v20  ;;  %v1231_v61 = vmul.f32 %v1143_v24, %v65_v20  ;;  %v1234_v62 = vmul.f32 %v1145_v25, %v65_v20  ;;  %v1237_v63 = vmul.f32 %v1147_v26, %v65_v20  ;;  %1846 = vst [vmem:[#allocation22_spill] sm:$0xff] %v1252_v6 }
  0x68   :  { %1842 = vst [vmem:[#allocation18_spill] sm:$0xff] %v1231_v61 }
  0x69   :  { %1843 = vst [vmem:[#allocation19_spill] sm:$0xff] %v1234_v62 }
  0x6a   :  { %1844 = vst [vmem:[#allocation20_spill] sm:$0xff] %v1237_v63 }
  0x6b   :  { %1022 = vset.pattern.permute.xlu2 %v1033_v11 }
  0x6c   :  { %1021 = vset.pattern.permute.xlu1 %v1032_v10  ;;  %432 = vperm.xlu2 %1022, %v1098_v9   ;;  %v1263_v10 = vperm.slane %v978_v54, 2 }
  0x6d   :  { %257 = vperm.xlu1 %1021, %v1087_v7   ;;  %v70_v21 = vpop.permute.xlu2 %69 }
  0x6e   :  { %v1246_v3 = vmul.f32 %v1141_v23, %v70_v21  ;;  %v1258_v8 = vmul.f32 %v1145_v25, %v70_v21 }
  0x74   :  { %v1152_v28 = vpop.permute.xlu0 %627  ;;  %428 = vperm.xlu2 %1022, %v1087_v7  }
  0x75   :  { %1024 = vset.pattern.permute.xlu1 %v1031_v1  ;;  %v50_v29 = vpop.permute.xlu1 %49  ;;  %v668_v20 = vmul.f32 %v1243_v2, %v1152_v28 }
  0x76   :  { %v1157_v30 = vmul.f32 %v1141_v23, %v50_v29  ;;  %v1160_v31 = vmul.f32 %v1143_v24, %v50_v29  ;;  %v1163_v32 = vmul.f32 %v1145_v25, %v50_v29  ;;  %v1166_v33 = vmul.f32 %v1147_v26, %v50_v29  ;;  %120 = vperm.xlu1 %1024, %v28_v27   ;;  %v457_v34 = vpop.permute.xlu2 %456 }
  0x77   :  { %v496_v11 = vmul.f32 %v1188_v45, %v457_v34  ;;  %v497_v12 = vmul.f32 %v1190_v46, %v457_v34  ;;  %v1268_v13 = vmul.f32 %v1192_v47, %v457_v34  ;;  %v1273_v16 = vmul.f32 %v1222_v58, %v457_v34 }
  0x78   :  { %1826 = vst [vmem:[#allocation2_spill] sm:$0xff] %v1157_v30 }
  0x79   :  { %1827 = vst [vmem:[#allocation3_spill] sm:$0xff] %v1160_v31 }
  0x7a   :  { %1828 = vst [vmem:[#allocation4_spill] sm:$0xff] %v1163_v32 }
  0x7b   :  { %1829 = vst [vmem:[#allocation5_spill] sm:$0xff] %v1166_v33 }
  0x7c   :  { %1026 = vset.pattern.permute.xlu2 %v1030_v0 }
  0x7d   :  { %v55_v35 = vpop.permute.xlu1 %54  ;;  %599 = vperm.xlu2 %1026, %v1087_v7   ;;  %v1255_v7 = vmul.f32 %v1143_v24, %v70_v21 }
  0x7e   :  { %1025 = vset.pattern.permute.xlu1 %v1030_v0  ;;  %v40_v36 = vpop.permute.xlu0 %39  ;;  %v453_v37 = vpop.permute.xlu2 %452  ;;  %v1239_v0 = vperm.slane %v976_v49, 0  ;;  %v1276_v17 = vmul.f32 %v1141_v23, %v55_v35  ;;  %v1286_v22 = vmul.f32 %v1145_v25, %v55_v35  ;;  %v1289_v27 = vmul.f32 %v1147_v26, %v55_v35 }
  0x7f   :  { %603 = vperm.xlu1 %1025, %v1098_v9   ;;  %v1173_v38 = vmul.f32 %v1141_v23, %v40_v36  ;;  %v1176_v39 = vmul.f32 %v1143_v24, %v40_v36  ;;  %v1179_v40 = vmul.f32 %v1145_v25, %v40_v36  ;;  %v1182_v41 = vmul.f32 %v1147_v26, %v40_v36 }
  0x80   :  { %v1261_v9 = vmul.f32 %v1147_v26, %v70_v21  ;;  %1847 = vst [vmem:[#allocation23_spill] sm:$0xff] %v1276_v17  ;;  %v1283_v21 = vmul.f32 %v1143_v24, %v55_v35  ;;  %v1292_v29 = vmul.f32 %v1188_v45, %v453_v37  ;;  %v1295_v36 = vmul.f32 %v1190_v46, %v453_v37 }
  0x81   :  { %1830 = vst [vmem:[#allocation6_spill] sm:$0xff] %v1173_v38  ;;  %v1298_v42 = vmul.f32 %v1192_v47, %v453_v37  ;;  %v669_v49 = vmul.f32 %v1263_v10, %v1152_v28 }
  0x82   :  { %1831 = vst [vmem:[#allocation7_spill] sm:$0xff] %v1176_v39 }
  0x83   :  { %1832 = vst [vmem:[#allocation8_spill] sm:$0xff] %v1179_v40  ;;  %v1310_v40 = vmul.f32 %v1270_v15, %v1152_v28 }
  0x84   :  { %1833 = vst [vmem:[#allocation9_spill] sm:$0xff] %v1182_v41 }
  0x85   :  { %1029 = vset.pattern.permute.xlu2 %v1031_v1  ;;  %1848 = vst [vmem:[#allocation24_spill] sm:$0xff] %v1283_v21 }
  0x86   :  { %v286_v43 = vpop.permute.xlu1 %285  ;;  %v45_v44 = vpop.permute.xlu0 %44  ;;  %1849 = vst [vmem:[#allocation25_spill] sm:$0xff] %v1286_v22 }
  0x87   :  { %v274_v48 = vpop.permute.xlu2 %273  ;;  %1028 = vset.pattern.permute.xlu1 %v1031_v1  ;;  %v1199_v50 = vmul.f32 %v1141_v23, %v45_v44  ;;  %v1202_v51 = vmul.f32 %v1143_v24, %v45_v44  ;;  %v1205_v52 = vmul.f32 %v1145_v25, %v45_v44  ;;  %v1208_v53 = vmul.f32 %v1147_v26, %v45_v44 }
  0x88   :  { %v1241_v1 = vperm.slane %v978_v54, 0  ;;  %1850 = vst [vmem:[#allocation26_spill] sm:$0xff] %v1289_v27  ;;  %v1301_v44 = vmul.f32 %v1222_v58, %v453_v37  ;;  %v325_v54 = vmul.f32 %v1239_v0, %v286_v43  ;;  %v326_v35 = vmul.f32 %v1248_v4, %v286_v43 }
  0x89   :  { %1834 = vst [vmem:[#allocation10_spill] sm:$0xff] %v1199_v50  ;;  %v327_v41 = vmul.f32 %v1250_v5, %v286_v43  ;;  %v328_v39 = vmul.f32 %v1252_v6, %v286_v43  ;;  %v1314_v38 = vmul.f32 %v1239_v0, %v274_v48  ;;  %v1317_v37 = vmul.f32 %v1248_v4, %v274_v48 }
  0x8a   :  { %1835 = vst [vmem:[#allocation11_spill] sm:$0xff] %v1202_v51  ;;  %v667_v19 = vmul.f32 %v1241_v1, %v1152_v28 }
  0x8b   :  { %1836 = vst [vmem:[#allocation12_spill] sm:$0xff] %v1205_v52  ;;  %v1323_v52 = vmul.f32 %v1252_v6, %v274_v48 }
  0x8c   :  { %1837 = vst [vmem:[#allocation13_spill] sm:$0xff] %v1208_v53  ;;  %v1320_v53 = vmul.f32 %v1250_v5, %v274_v48 }
  0x8d   :  { %1851 = vst [vmem:[#allocation27_spill] sm:$0xff] %v1314_v38 }
  0x8e   :  { %v282_v14 = vpop.permute.xlu1 %281  ;;  %1852 = vst [vmem:[#allocation28_spill] sm:$0xff] %v1317_v37 }
  0x8f   :  { %v75_v18 = vpop.permute.xlu0 %74  ;;  %1853 = vst [vmem:[#allocation29_spill] sm:$0xff] %v1320_v53  ;;  %v1326_v51 = vmul.f32 %v1239_v0, %v282_v14  ;;  %v1329_v28 = vmul.f32 %v1248_v4, %v282_v14  ;;  %v1333_v50 = vmul.f32 %v1250_v5, %v282_v14  ;;  %v1336_v33 = vmul.f32 %v1252_v6, %v282_v14 }
  0x90   :  { %v624_v34 = vpop.permute.xlu2 %623  ;;  %1854 = vst [vmem:[#allocation30_spill] sm:$0xff] %v1323_v52  ;;  %v114_v43 = vmul.f32 %v1141_v23, %v75_v18  ;;  %v115_v32 = vmul.f32 %v1143_v24, %v75_v18  ;;  %v116_v31 = vmul.f32 %v1145_v25, %v75_v18  ;;  %v117_v48 = vmul.f32 %v1147_v26, %v75_v18 }
  0x91   :  { %v1342_v30 = vmul.f32 %v1241_v1, %v624_v34  ;;  %v1345_v27 = vmul.f32 %v1243_v2, %v624_v34  ;;  %v1348_v23 = vmul.f32 %v1263_v10, %v624_v34  ;;  %v1351_v21 = vmul.f32 %v1270_v15, %v624_v34 }
  0x96   :  { %v278_v22 = vpop.permute.xlu1 %277 }
  0x97   :  { %v1354_v14 = vmul.f32 %v1239_v0, %v278_v22  ;;  %v1357_v24 = vmul.f32 %v1248_v4, %v278_v22  ;;  %v1360_v25 = vmul.f32 %v1250_v5, %v278_v22  ;;  %v156_v26 = vpop.permute.xlu0 %155  ;;  %v1365_v38 = vmul.f32 %v1252_v6, %v278_v22 }
  0x98   :  { %v186_v18 = vadd.f32 %v156_v26, %v114_v43  ;;  %v357_v17 = vadd.f32 %v325_v54, %v156_v26  ;;  %v528_v52 = vadd.f32 %v496_v11, %v156_v26  ;;  %v699_v59 = vadd.f32 %v667_v19, %v156_v26 }
  0x99   :  { %1855 = vst [vmem:[#allocation31_spill] sm:$0xff] %v1357_v24  ;;  %v1362_v53 = vpop.permute.xlu2 %444  ;;  %v187_v57 = vadd.f32 %v156_v26, %v115_v32  ;;  %v358_v37 = vadd.f32 %v326_v35, %v156_v26  ;;  %v529_v34 = vadd.f32 %v497_v12, %v156_v26  ;;  %v700_v56 = vadd.f32 %v668_v20, %v156_v26 }
  0x9a   :  { %1856 = vst [vmem:[#allocation32_spill] sm:$0xff] %v1360_v25  ;;  %v1369_v55 = vmul.f32 %v1188_v45, %v1362_v53  ;;  %v1373_v63 = vmul.f32 %v1190_v46, %v1362_v53  ;;  %v1377_v11 = vmul.f32 %v1192_v47, %v1362_v53  ;;  %v218_v19 = vmax.f32 %v186_v18, 0.0 }
  0x9b   :  { %1857 = vst [vmem:[#allocation33_spill] sm:$0xff] %v1365_v38  ;;  %v389_v32 = vmax.f32 %v357_v17, 0.0  ;;  %v560_v54 = vmax.f32 %v528_v52, 0.0  ;;  %v731_v12 = vmax.f32 %v699_v59, 0.0  ;;  %v219_v20 = vmax.f32 %v187_v57, 0.0 }
  0x9c   :  { %1858 = vst [vmem:[#allocation34_spill] sm:$0xff] %v1369_v55  ;;  %v390_v35 = vmax.f32 %v358_v37, 0.0  ;;  %v561_v22 = vmax.f32 %v529_v34, 0.0  ;;  %v732_v43 = vmax.f32 %v700_v56, 0.0  ;;  %v188_v25 = vadd.f32 %v156_v26, %v116_v31 }
  0x9d   :  { %1859 = vst [vmem:[#allocation35_spill] sm:$0xff] %v1373_v63  ;;  %v421_v38 = vadd.f32 %v389_v32, %v218_v19  ;;  %v359_v62 = vadd.f32 %v327_v41, %v156_v26  ;;  %v530_v55 = vadd.f32 %v1268_v13, %v156_v26  ;;  %v701_v61 = vadd.f32 %v669_v49, %v156_v26 }
  0x9e   :  { %1860 = vst [vmem:[#allocation36_spill] sm:$0xff] %v1377_v11  ;;  %v422_v24 = vadd.f32 %v390_v35, %v219_v20  ;;  %v189_v63 = vadd.f32 %v156_v26, %v117_v48  ;;  %v360_v6 = vadd.f32 %v328_v39, %v156_v26  ;;  %v220_v18 = vmax.f32 %v188_v25, 0.0 }
  0x9f   :  { %v1380_v5 = vpop.permute.xlu0 %150  ;;  %v592_v11 = vadd.f32 %v560_v54, %v421_v38  ;;  %v391_v17 = vmax.f32 %v359_v62, 0.0  ;;  %v562_v52 = vmax.f32 %v530_v55, 0.0  ;;  %v733_v37 = vmax.f32 %v701_v61, 0.0 }
  0xa0   :  { %v1382_v59 = vpop.permute.xlu1 %145  ;;  %v593_v57 = vadd.f32 %v561_v22, %v422_v24  ;;  %v221_v56 = vmax.f32 %v189_v63, 0.0  ;;  %v392_v34 = vmax.f32 %v360_v6, 0.0  ;;  %v531_v13 = vadd.f32 %v1273_v16, %v156_v26 }
  0xa1   :  { %v763_v31 = vadd.f32 %v731_v12, %v592_v11  ;;  %v423_v41 = vadd.f32 %v391_v17, %v220_v18  ;;  %v702_v49 = vadd.f32 %v1310_v40, %v156_v26  ;;  %v182_v38 = vadd.f32 %v1380_v5, %v1246_v3 }
  0xa2   :  { %v764_v48 = vadd.f32 %v732_v43, %v593_v57  ;;  %v424_v39 = vadd.f32 %v392_v34, %v221_v56  ;;  %v1386_v19 = vpop.permute.xlu2 %135  ;;  %v353_v55 = vadd.f32 %v1326_v51, %v1380_v5  ;;  %v563_v62 = vmax.f32 %v531_v13, 0.0 }
  0xa3   :  { %792 = vmatpush.msra.mxu0 %v763_v31  ;;  %v594_v61 = vadd.f32 %v562_v52, %v423_v41  ;;  %v734_v63 = vmax.f32 %v702_v49, 0.0  ;;  %v524_v6 = vadd.f32 %v1292_v29, %v1380_v5  ;;  %v214_v16 = vmax.f32 %v182_v38, 0.0 }
  0xa4   :  { %821 = vmatpush.msra.mxu1 %v764_v48  ;;  %v385_v40 = vmax.f32 %v353_v55, 0.0  ;;  %v695_v24 = vadd.f32 %v1342_v30, %v1380_v5  ;;  %v183_v25 = vadd.f32 %v1380_v5, %v1255_v7  ;;  %v595_v26 = vadd.f32 %v563_v62, %v424_v39 }
  0xa5   :  { %v765_v3 = vadd.f32 %v733_v37, %v594_v61  ;;  %v556_v11 = vmax.f32 %v524_v6, 0.0  ;;  %v354_v51 = vadd.f32 %v1329_v28, %v1380_v5  ;;  %v525_v29 = vadd.f32 %v1295_v36, %v1380_v5 }
  0xa6   :  { %v417_v32 = vadd.f32 %v385_v40, %v214_v16  ;;  %v727_v54 = vmax.f32 %v695_v24, 0.0  ;;  %v215_v12 = vmax.f32 %v183_v25, 0.0  ;;  %v766_v20 = vadd.f32 %v734_v63, %v595_v26 }
  0xa7   :  { %850 = vmatpush.msra.mxu2 %v765_v3  ;;  %v386_v35 = vmax.f32 %v354_v51, 0.0  ;;  %v696_v30 = vadd.f32 %v1345_v27, %v1380_v5  ;;  %v184_v7 = vadd.f32 %v1380_v5, %v1258_v8  ;;  %v1406_v22 = vpop.permute.xlu0 %140  ;;  %v557_v18 = vmax.f32 %v525_v29, 0.0 }
  0xa8   :  { %v588_v43 = vadd.f32 %v556_v11, %v417_v32  ;;  %v355_v28 = vadd.f32 %v1333_v50, %v1380_v5  ;;  %v526_v17 = vadd.f32 %v1298_v42, %v1380_v5  ;;  %879 = vmatpush.msra.mxu3 %v766_v20  ;;  %v697_v27 = vadd.f32 %v1348_v23, %v1380_v5  ;;  %v1861_v20 = vld [vmem:[#allocation21_spill] sm:$0xff] }
  0xa9   :  { %v449_v36 = vpop.permute.xlu1 %448  ;;  %v418_v52 = vadd.f32 %v386_v35, %v215_v12  ;;  %v728_v57 = vmax.f32 %v696_v30, 0.0  ;;  %v216_v37 = vmax.f32 %v184_v7, 0.0  ;;  %v1416_v8 = vmul.f32 %v1222_v58, %v1362_v53 }
  0xaa   :  { %v488_v56 = vmul.f32 %v1188_v45, %v449_v36  ;;  %v489_v34 = vmul.f32 %v1190_v46, %v449_v36  ;;  %v1421_v50 = vmul.f32 %v1192_v47, %v449_v36  ;;  %v1424_v42 = vmul.f32 %v1222_v58, %v449_v36 }
  0xab   :  { %v759_v31 = vadd.f32 %v727_v54, %v588_v43  ;;  %v589_v41 = vadd.f32 %v557_v18, %v418_v52  ;;  %v387_v13 = vmax.f32 %v355_v28, 0.0  ;;  %v616_v49 = vpop.permute.xlu2 %615  ;;  %v558_v48 = vmax.f32 %v526_v17, 0.0  ;;  %v1862_v18 = vld [vmem:[#allocation22_spill] sm:$0xff] }
  0xac   :  { %v185_v23 = vadd.f32 %v1380_v5, %v1261_v9  ;;  %v356_v53 = vadd.f32 %v1336_v33, %v1380_v5  ;;  %v527_v39 = vadd.f32 %v1301_v44, %v1380_v5  ;;  %v729_v61 = vmax.f32 %v697_v27, 0.0 }
  0xad   :  { %793 = vmatpush.msra.mxu0 %v759_v31  ;;  %v760_v38 = vadd.f32 %v728_v57, %v589_v41  ;;  %v419_v55 = vadd.f32 %v387_v13, %v216_v37  ;;  %v698_v62 = vadd.f32 %v1351_v21, %v1380_v5  ;;  %v1435_v40 = vmul.f32 %v1241_v1, %v616_v49  ;;  %v1863_v37 = vld [vmem:[#allocation18_spill] sm:$0xff] }
  0xae   :  { %v217_v63 = vmax.f32 %v185_v23, 0.0  ;;  %v388_v6 = vmax.f32 %v356_v53, 0.0  ;;  %v559_v16 = vmax.f32 %v527_v39, 0.0  ;;  %v1438_v33 = vmul.f32 %v1243_v2, %v616_v49 }
  0xaf   :  { %822 = vmatpush.msra.mxu1 %v760_v38  ;;  %v590_v9 = vadd.f32 %v558_v48, %v419_v55  ;;  %v730_v24 = vmax.f32 %v698_v62, 0.0  ;;  %v1441_v44 = vmul.f32 %v1263_v10, %v616_v49  ;;  %v178_v5 = vadd.f32 %v1382_v59, %v1228_v60  ;;  %v1865_v55 = vld [vmem:[#allocation31_spill] sm:$0xff] }
  0xb0   :  { %v420_v25 = vadd.f32 %v388_v6, %v217_v63  ;;  %v266_v3 = vpop.permute.xlu0 %265  ;;  %v349_v21 = vadd.f32 %v1354_v14, %v1382_v59  ;;  %v520_v26 = vadd.f32 %v488_v56, %v1382_v59  ;;  %v1449_v51 = vmul.f32 %v1270_v15, %v616_v49  ;;  %v1866_v6 = vld [vmem:[#allocation19_spill] sm:$0xff] }
  0xb1   :  { %v761_v11 = vadd.f32 %v729_v61, %v590_v9  ;;  %v1452_v32 = vmul.f32 %v1239_v0, %v266_v3  ;;  %v1455_v54 = vmul.f32 %v1248_v4, %v266_v3  ;;  %v1458_v35 = vmul.f32 %v1861_v20, %v266_v3  ;;  %v1867_v9 = vld [vmem:[#allocation32_spill] sm:$0xff] }
  0xb2   :  { %v591_v12 = vadd.f32 %v559_v16, %v420_v25  ;;  %v270_v29 = vpop.permute.xlu1 %269  ;;  %v210_v60 = vmax.f32 %v178_v5, 0.0  ;;  %v381_v30 = vmax.f32 %v349_v21, 0.0  ;;  %v1465_v52 = vmul.f32 %v1862_v18, %v266_v3 }
  0xb3   :  { %851 = vmatpush.msra.mxu2 %v761_v11  ;;  %v309_v14 = vmul.f32 %v1239_v0, %v270_v29  ;;  %v310_v7 = vmul.f32 %v1248_v4, %v270_v29  ;;  %v311_v43 = vmul.f32 %v1861_v20, %v270_v29  ;;  %v312_v28 = vmul.f32 %v1862_v18, %v270_v29 }
  0xb4   :  { %v762_v17 = vadd.f32 %v730_v24, %v591_v12  ;;  %v262_v36 = vpop.permute.xlu2 %261  ;;  %v552_v57 = vmax.f32 %v520_v26, 0.0  ;;  %v179_v27 = vadd.f32 %v1382_v59, %v1863_v37  ;;  %v413_v13 = vadd.f32 %v381_v30, %v210_v60  ;;  %v1868_v26 = vld [vmem:[#allocation20_spill] sm:$0xff]  ;;  %v1869_v12 = vld [vmem:[#allocation33_spill] sm:$0xff] }
  0xb5   :  { %v1470_v56 = vadd.f32 %v309_v14, %v1386_v19  ;;  %v1473_v31 = vadd.f32 %v310_v7, %v1386_v19  ;;  %v1476_v41 = vadd.f32 %v311_v43, %v1386_v19  ;;  %v1479_v49 = vadd.f32 %v312_v28, %v1386_v19 }
  0xb6   :  { %880 = vmatpush.msra.mxu3 %v762_v17  ;;  %v1482_v48 = vmul.f32 %v1239_v0, %v262_v36  ;;  %v1485_v23 = vmul.f32 %v1248_v4, %v262_v36  ;;  %v1488_v53 = vmul.f32 %v1861_v20, %v262_v36  ;;  %v1491_v39 = vmul.f32 %v1862_v18, %v262_v36 }
  0xb7   :  { %v211_v38 = vmax.f32 %v179_v27, 0.0  ;;  %v350_v61 = vadd.f32 %v1865_v55, %v1382_v59  ;;  %v521_v62 = vadd.f32 %v489_v34, %v1382_v59  ;;  %v584_v63 = vadd.f32 %v552_v57, %v413_v13 }
  0xb8   :  { %1864 = vst [vmem:[#allocation21_spill] sm:$0xff] %v1491_v39  ;;  %v180_v16 = vadd.f32 %v1382_v59, %v1866_v6  ;;  %v351_v24 = vadd.f32 %v1867_v9, %v1382_v59  ;;  %v522_v25 = vadd.f32 %v1421_v50, %v1382_v59  ;;  %v181_v11 = vadd.f32 %v1382_v59, %v1868_v26  ;;  %v1870_v26 = vld [vmem:[#allocation14_spill] sm:$0xff] }
  0xb9   :  { %v437_v3 = vpop.permute.xlu0 %436  ;;  %v382_v5 = vmax.f32 %v350_v61, 0.0  ;;  %v553_v21 = vmax.f32 %v521_v62, 0.0  ;;  %v352_v29 = vadd.f32 %v1869_v12, %v1382_v59  ;;  %v523_v50 = vadd.f32 %v1424_v42, %v1382_v59 }
  0xba   :  { %v1507_v34 = vmul.f32 %v1188_v45, %v437_v3  ;;  %v1510_v60 = vmul.f32 %v1190_v46, %v437_v3  ;;  %v1513_v30 = vmul.f32 %v1192_v47, %v437_v3  ;;  %v212_v43 = vmax.f32 %v180_v16, 0.0 }
  0xbb   :  { %v620_v14 = vpop.permute.xlu1 %619  ;;  %v414_v7 = vadd.f32 %v382_v5, %v211_v38  ;;  %v383_v28 = vmax.f32 %v351_v24, 0.0  ;;  %v554_v17 = vmax.f32 %v522_v25, 0.0  ;;  %v213_v62 = vmax.f32 %v181_v11, 0.0  ;;  %v1871_v11 = vld [vmem:[#allocation27_spill] sm:$0xff] }
  0xbc   :  { %v659_v36 = vmul.f32 %v1241_v1, %v620_v14  ;;  %v660_v57 = vmul.f32 %v1243_v2, %v620_v14  ;;  %v661_v37 = vmul.f32 %v1263_v10, %v620_v14  ;;  %v662_v27 = vmul.f32 %v1270_v15, %v620_v14 }
  0xbd   :  { %v1521_v13 = vpop.permute.xlu2 %125  ;;  %v585_v55 = vadd.f32 %v553_v21, %v414_v7  ;;  %v415_v61 = vadd.f32 %v383_v28, %v212_v43  ;;  %v384_v6 = vmax.f32 %v352_v29, 0.0  ;;  %v555_v9 = vmax.f32 %v523_v50, 0.0 }
  0xbe   :  { %v691_v42 = vadd.f32 %v659_v36, %v1382_v59  ;;  %v692_v38 = vadd.f32 %v660_v57, %v1382_v59  ;;  %v693_v16 = vadd.f32 %v661_v37, %v1382_v59  ;;  %v694_v5 = vadd.f32 %v662_v27, %v1382_v59  ;;  %v1872_v36 = vld [vmem:[#allocation34_spill] sm:$0xff] }
  0xbf   :  { %v586_v24 = vadd.f32 %v554_v17, %v415_v61  ;;  %v416_v25 = vadd.f32 %v384_v6, %v213_v62  ;;  %v174_v12 = vadd.f32 %v1406_v22, %v1870_v26  ;;  %v345_v29 = vadd.f32 %v1871_v11, %v1406_v22  ;;  %v1873_v6 = vld [vmem:[#allocation15_spill] sm:$0xff] }
  0xc0   :  { %v723_v14 = vmax.f32 %v691_v42, 0.0  ;;  %v724_v39 = vmax.f32 %v692_v38, 0.0  ;;  %v725_v21 = vmax.f32 %v693_v16, 0.0  ;;  %v726_v43 = vmax.f32 %v694_v5, 0.0 }
  0xc1   :  { %v587_v7 = vadd.f32 %v555_v9, %v416_v25  ;;  %v206_v28 = vmax.f32 %v174_v12, 0.0  ;;  %v516_v57 = vadd.f32 %v1872_v36, %v1406_v22  ;;  %v377_v61 = vmax.f32 %v345_v29, 0.0  ;;  %v1874_v9 = vld [vmem:[#allocation28_spill] sm:$0xff] }
  0xc2   :  { %v755_v50 = vadd.f32 %v723_v14, %v584_v63  ;;  %v756_v17 = vadd.f32 %v724_v39, %v585_v55  ;;  %v757_v37 = vadd.f32 %v725_v21, %v586_v24  ;;  %v687_v62 = vadd.f32 %v1435_v40, %v1406_v22  ;;  %v1875_v63 = vld [vmem:[#allocation35_spill] sm:$0xff] }
  0xc3   :  { %v758_v59 = vadd.f32 %v726_v43, %v587_v7  ;;  %v548_v27 = vmax.f32 %v516_v57, 0.0  ;;  %v175_v42 = vadd.f32 %v1406_v22, %v1873_v6  ;;  %v409_v16 = vadd.f32 %v377_v61, %v206_v28  ;;  %v1876_v7 = vld [vmem:[#allocation16_spill] sm:$0xff]  ;;  %v1877_v43 = vld [vmem:[#allocation29_spill] sm:$0xff] }
  0xc4   :  { %v441_v38 = vpop.permute.xlu1 %440  ;;  %794 = vmatpush.msra.mxu0 %v755_v50  ;;  %823 = vmatpush.msra.mxu1 %v756_v17  ;;  %v346_v25 = vadd.f32 %v1874_v9, %v1406_v22  ;;  %v517_v39 = vadd.f32 %v1875_v63, %v1406_v22  ;;  %v1542_v55 = vmul.f32 %v1222_v58, %v437_v3  ;;  %v373_v5 = vmax.f32 %v1470_v56, 0.0  ;;  %v1878_v17 = vld [vmem:[#allocation36_spill] sm:$0xff]  ;;  %v1879_v6 = vld [vmem:[#allocation17_spill] sm:$0xff] }
  0xc5   :  { %v480_v24 = vmul.f32 %v1188_v45, %v441_v38  ;;  %v481_v40 = vmul.f32 %v1190_v46, %v441_v38  ;;  %852 = vmatpush.msra.mxu2 %v757_v37  ;;  %881 = vmatpush.msra.mxu3 %v758_v59  ;;  %v580_v26 = vadd.f32 %v548_v27, %v409_v16  ;;  %v719_v12 = vmax.f32 %v687_v62, 0.0 }
  0xc6   :  { %v207_v14 = vmax.f32 %v175_v42, 0.0  ;;  %v378_v21 = vmax.f32 %v346_v25, 0.0  ;;  %v549_v11 = vmax.f32 %v517_v39, 0.0  ;;  %v688_v29 = vadd.f32 %v1438_v33, %v1406_v22  ;;  %v433_v36 = vpop.permute.xlu2 %432  ;;  %v1880_v25 = vld [vmem:[#allocation30_spill] sm:$0xff] }
  0xc7   :  { %v176_v3 = vadd.f32 %v1406_v22, %v1876_v7  ;;  %v347_v28 = vadd.f32 %v1877_v43, %v1406_v22  ;;  %v751_v57 = vadd.f32 %v719_v12, %v580_v26  ;;  %v518_v37 = vadd.f32 %v1878_v17, %v1406_v22 }
  0xc8   :  { %v410_v50 = vadd.f32 %v378_v21, %v207_v14  ;;  %v689_v61 = vadd.f32 %v1441_v44, %v1406_v22  ;;  %v720_v59 = vmax.f32 %v688_v29, 0.0  ;;  %v177_v33 = vadd.f32 %v1406_v22, %v1879_v6 }
  0xc9   :  { %v208_v27 = vmax.f32 %v176_v3, 0.0  ;;  %v379_v62 = vmax.f32 %v347_v28, 0.0  ;;  %795 = vmatpush.msra.mxu0 %v751_v57  ;;  %v550_v16 = vmax.f32 %v518_v37, 0.0  ;;  %v348_v63 = vadd.f32 %v1880_v25, %v1406_v22  ;;  %v1882_v25 = vld [vmem:[#allocation24_spill] sm:$0xff] }
  0xca   :  { %v581_v42 = vadd.f32 %v549_v11, %v410_v50  ;;  %v721_v9 = vmax.f32 %v689_v61, 0.0  ;;  %v209_v26 = vmax.f32 %v177_v33, 0.0  ;;  %v519_v12 = vadd.f32 %v1416_v8, %v1406_v22  ;;  %v608_v11 = vpop.permute.xlu0 %607 }
  0xcb   :  { %v411_v39 = vadd.f32 %v379_v62, %v208_v27  ;;  %v690_v44 = vadd.f32 %v1449_v51, %v1406_v22  ;;  %v482_v14 = vmul.f32 %v1192_v47, %v441_v38  ;;  %v483_v21 = vmul.f32 %v1222_v58, %v441_v38 }
  0xcc   :  { %v752_v29 = vadd.f32 %v720_v59, %v581_v42  ;;  %v380_v7 = vmax.f32 %v348_v63, 0.0  ;;  %v551_v43 = vmax.f32 %v519_v12, 0.0  ;;  %v1568_v28 = vmul.f32 %v1188_v45, %v433_v36  ;;  %v1881_v42 = vld [vmem:[#allocation23_spill] sm:$0xff] }
  0xcd   :  { %v582_v3 = vadd.f32 %v550_v16, %v411_v39  ;;  %v1571_v57 = vmul.f32 %v1190_v46, %v433_v36  ;;  %v1573_v50 = vpop.permute.xlu1 %130  ;;  %v722_v22 = vmax.f32 %v690_v44, 0.0  ;;  %v1576_v51 = vmul.f32 %v1192_v47, %v433_v36 }
  0xce   :  { %824 = vmatpush.msra.mxu1 %v752_v29  ;;  %v412_v8 = vadd.f32 %v380_v7, %v209_v26  ;;  %v1579_v38 = vmul.f32 %v1222_v58, %v433_v36  ;;  %v647_v37 = vmul.f32 %v1241_v1, %v608_v11  ;;  %v1583_v61 = vmul.f32 %v1243_v2, %v608_v11  ;;  %v1588_v27 = vpop.permute.xlu2 %428 }
  0xcf   :  { %v753_v17 = vadd.f32 %v721_v9, %v582_v3  ;;  %v1586_v59 = vmul.f32 %v1263_v10, %v608_v11  ;;  %v1591_v6 = vmul.f32 %v1270_v15, %v608_v11  ;;  %v1595_v33 = vmul.f32 %v1188_v45, %v1588_v27  ;;  %v1883_v45 = vld [vmem:[#allocation25_spill] sm:$0xff] }
  0xd0   :  { %v583_v62 = vadd.f32 %v551_v43, %v412_v8  ;;  %v1599_v36 = vmul.f32 %v1190_v46, %v1588_v27  ;;  %v170_v16 = vadd.f32 %v1386_v19, %v1881_v42  ;;  %v512_v9 = vadd.f32 %v480_v24, %v1386_v19  ;;  %v1884_v8 = vld [vmem:[#allocation26_spill] sm:$0xff] }
  0xd1   :  { %853 = vmatpush.msra.mxu2 %v753_v17  ;;  %v171_v63 = vadd.f32 %v1386_v19, %v1882_v25  ;;  %v374_v39 = vmax.f32 %v1473_v31, 0.0  ;;  %v513_v12 = vadd.f32 %v481_v40, %v1386_v19  ;;  %v172_v44 = vadd.f32 %v1386_v19, %v1883_v45  ;;  %v1885_v25 = vld [vmem:[#allocation2_spill] sm:$0xff] }
  0xd2   :  { %v754_v26 = vadd.f32 %v722_v22, %v583_v62  ;;  %v375_v46 = vmax.f32 %v1476_v41, 0.0  ;;  %v202_v29 = vmax.f32 %v170_v16, 0.0  ;;  %v544_v7 = vmax.f32 %v512_v9, 0.0 }
  0xd3   :  { %v203_v11 = vmax.f32 %v171_v63, 0.0  ;;  %v514_v3 = vadd.f32 %v482_v14, %v1386_v19  ;;  %v545_v24 = vmax.f32 %v513_v12, 0.0  ;;  %v204_v43 = vmax.f32 %v172_v44, 0.0 }
  0xd4   :  { %882 = vmatpush.msra.mxu3 %v754_v26  ;;  %v173_v17 = vadd.f32 %v1386_v19, %v1884_v8  ;;  %v376_v31 = vmax.f32 %v1479_v49, 0.0  ;;  %v405_v40 = vadd.f32 %v373_v5, %v202_v29  ;;  %v515_v41 = vadd.f32 %v483_v21, %v1386_v19 }
  0xd5   :  { %v406_v22 = vadd.f32 %v374_v39, %v203_v11  ;;  %v546_v62 = vmax.f32 %v514_v3, 0.0  ;;  %v407_v16 = vadd.f32 %v375_v46, %v204_v43  ;;  %v166_v14 = vadd.f32 %v1573_v50, %v1885_v25 }
  0xd6   :  { %v612_v42 = vpop.permute.xlu1 %611  ;;  %v205_v9 = vmax.f32 %v173_v17, 0.0  ;;  %v337_v63 = vadd.f32 %v1452_v32, %v1573_v50  ;;  %v576_v39 = vadd.f32 %v544_v7, %v405_v40  ;;  %v547_v11 = vmax.f32 %v515_v41, 0.0  ;;  %v1886_v41 = vld [vmem:[#allocation3_spill] sm:$0xff] }
  0xd7   :  { %v651_v26 = vmul.f32 %v1241_v1, %v612_v42  ;;  %v652_v49 = vmul.f32 %v1243_v2, %v612_v42  ;;  %v653_v56 = vmul.f32 %v1263_v10, %v612_v42  ;;  %v654_v5 = vmul.f32 %v1270_v15, %v612_v42 }
  0xd8   :  { %v577_v12 = vadd.f32 %v545_v24, %v406_v22  ;;  %v578_v21 = vadd.f32 %v546_v62, %v407_v16  ;;  %v408_v45 = vadd.f32 %v376_v31, %v205_v9  ;;  %v198_v3 = vmax.f32 %v166_v14, 0.0 }
  0xd9   :  { %v683_v44 = vadd.f32 %v651_v26, %v1386_v19  ;;  %v684_v46 = vadd.f32 %v652_v49, %v1386_v19  ;;  %v685_v29 = vadd.f32 %v653_v56, %v1386_v19  ;;  %v686_v32 = vadd.f32 %v654_v5, %v1386_v19 }
  0xda   :  { %v369_v43 = vmax.f32 %v337_v63, 0.0  ;;  %v508_v8 = vadd.f32 %v1507_v34, %v1573_v50  ;;  %v579_v24 = vadd.f32 %v547_v11, %v408_v45  ;;  %v679_v62 = vadd.f32 %v647_v37, %v1573_v50 }
  0xdb   :  { %v715_v17 = vmax.f32 %v683_v44, 0.0  ;;  %v716_v42 = vmax.f32 %v684_v46, 0.0  ;;  %v717_v7 = vmax.f32 %v685_v29, 0.0  ;;  %v718_v40 = vmax.f32 %v686_v32, 0.0 }
  0xdc   :  { %v401_v31 = vadd.f32 %v369_v43, %v198_v3  ;;  %v540_v22 = vmax.f32 %v508_v8, 0.0  ;;  %v167_v19 = vadd.f32 %v1573_v50, %v1886_v41  ;;  %v1637_v14 = vmul.f32 %v1192_v47, %v1588_v27  ;;  %v1671_v8 = vpop.permute.xlu2 %599  ;;  %v1889_v41 = vld [vmem:[#allocation10_spill] sm:$0xff] }
  0xdd   :  { %v747_v16 = vadd.f32 %v715_v17, %v576_v39  ;;  %v748_v9 = vadd.f32 %v716_v42, %v577_v12  ;;  %v749_v25 = vadd.f32 %v717_v7, %v578_v21  ;;  %v750_v34 = vadd.f32 %v718_v40, %v579_v24  ;;  %v1887_v39 = vld [vmem:[#allocation4_spill] sm:$0xff] }
  0xde   :  { %v572_v63 = vadd.f32 %v540_v22, %v401_v31  ;;  %v338_v26 = vadd.f32 %v1455_v54, %v1573_v50  ;;  %v711_v56 = vmax.f32 %v679_v62, 0.0  ;;  %v199_v37 = vmax.f32 %v167_v19, 0.0 }
  0xdf   :  { %v258_v49 = vpop.permute.xlu1 %257  ;;  %796 = vmatpush.msra.mxu0 %v747_v16  ;;  %825 = vmatpush.msra.mxu1 %v748_v9  ;;  %v509_v5 = vadd.f32 %v1510_v60, %v1573_v50  ;;  %v168_v12 = vadd.f32 %v1573_v50, %v1887_v39  ;;  %v680_v54 = vadd.f32 %v1583_v61, %v1573_v50  ;;  %v1888_v61 = vld [vmem:[#allocation5_spill] sm:$0xff] }
  0xe0   :  { %v1646_v21 = vmul.f32 %v1239_v0, %v258_v49  ;;  %v1649_v47 = vmul.f32 %v1248_v4, %v258_v49  ;;  %v1652_v45 = vmul.f32 %v1861_v20, %v258_v49  ;;  %854 = vmatpush.msra.mxu2 %v749_v25  ;;  %v1657_v44 = vmul.f32 %v1862_v18, %v258_v49  ;;  %v1890_v49 = vld [vmem:[#allocation11_spill] sm:$0xff] }
  0xe1   :  { %883 = vmatpush.msra.mxu3 %v750_v34  ;;  %v743_v60 = vadd.f32 %v711_v56, %v572_v63  ;;  %v370_v46 = vmax.f32 %v338_v26, 0.0  ;;  %v541_v29 = vmax.f32 %v509_v5, 0.0  ;;  %v200_v11 = vmax.f32 %v168_v12, 0.0 }
  0xe2   :  { %v339_v0 = vadd.f32 %v1458_v35, %v1573_v50  ;;  %v510_v4 = vadd.f32 %v1513_v30, %v1573_v50  ;;  %v681_v20 = vadd.f32 %v1586_v59, %v1573_v50  ;;  %v169_v18 = vadd.f32 %v1573_v50, %v1888_v61 }
  0xe3   :  { %797 = vmatpush.msra.mxu0 %v743_v60  ;;  %v402_v32 = vadd.f32 %v370_v46, %v199_v37  ;;  %v340_v3 = vadd.f32 %v1465_v52, %v1573_v50  ;;  %v511_v43 = vadd.f32 %v1542_v55, %v1573_v50  ;;  %v712_v35 = vmax.f32 %v680_v54, 0.0 }
  0xe4   :  { %v371_v17 = vmax.f32 %v339_v0, 0.0  ;;  %v542_v42 = vmax.f32 %v510_v4, 0.0  ;;  %v682_v30 = vadd.f32 %v1591_v6, %v1573_v50  ;;  %v713_v7 = vmax.f32 %v681_v20, 0.0  ;;  %v1891_v0 = vld [vmem:[#allocation12_spill] sm:$0xff] }
  0xe5   :  { %v573_v59 = vadd.f32 %v541_v29, %v402_v32  ;;  %v201_v24 = vmax.f32 %v169_v18, 0.0  ;;  %v372_v40 = vmax.f32 %v340_v3, 0.0  ;;  %v543_v22 = vmax.f32 %v511_v43, 0.0  ;;  %v1892_v32 = vld [vmem:[#allocation13_spill] sm:$0xff] }
  0xe6   :  { %v403_v31 = vadd.f32 %v371_v17, %v200_v11  ;;  %v714_v62 = vmax.f32 %v682_v30, 0.0  ;;  %v639_v52 = vmul.f32 %v1241_v1, %v1671_v8  ;;  %v1679_v9 = vmul.f32 %v1243_v2, %v1671_v8  ;;  %v1893_v18 = vld [vmem:[#allocation21_spill] sm:$0xff] }
  0xe7   :  { %v744_v16 = vadd.f32 %v712_v35, %v573_v59  ;;  %v404_v55 = vadd.f32 %v372_v40, %v201_v24  ;;  %v1683_v25 = vmul.f32 %v1263_v10, %v1671_v8  ;;  %v162_v19 = vadd.f32 %v1521_v13, %v1889_v41  ;;  %v1894_v40 = vld [vmem:[#allocation6_spill] sm:$0xff] }
  0xe8   :  { %v574_v50 = vadd.f32 %v542_v42, %v403_v31  ;;  %v1685_v6 = vpop.permute.xlu1 %120  ;;  %v333_v34 = vadd.f32 %v1482_v48, %v1521_v13  ;;  %v504_v63 = vadd.f32 %v1568_v28, %v1521_v13  ;;  %v163_v56 = vadd.f32 %v1521_v13, %v1890_v49 }
  0xe9   :  { %826 = vmatpush.msra.mxu1 %v744_v16  ;;  %v575_v26 = vadd.f32 %v543_v22, %v404_v55  ;;  %v334_v37 = vadd.f32 %v1485_v23, %v1521_v13  ;;  %v505_v5 = vadd.f32 %v1571_v57, %v1521_v13  ;;  %v194_v12 = vmax.f32 %v162_v19, 0.0 }
  0xea   :  { %v745_v39 = vadd.f32 %v713_v7, %v574_v50  ;;  %v365_v54 = vmax.f32 %v333_v34, 0.0  ;;  %v536_v60 = vmax.f32 %v504_v63, 0.0  ;;  %v195_v48 = vmax.f32 %v163_v56, 0.0  ;;  %v1895_v50 = vld [vmem:[#allocation7_spill] sm:$0xff] }
  0xeb   :  { %v746_v46 = vadd.f32 %v714_v62, %v575_v26  ;;  %v366_v29 = vmax.f32 %v334_v37, 0.0  ;;  %v537_v11 = vmax.f32 %v505_v5, 0.0  ;;  %v164_v4 = vadd.f32 %v1521_v13, %v1891_v0 }
  0xec   :  { %855 = vmatpush.msra.mxu2 %v745_v39  ;;  %v397_v28 = vadd.f32 %v365_v54, %v194_v12  ;;  %v335_v20 = vadd.f32 %v1488_v53, %v1521_v13  ;;  %v506_v23 = vadd.f32 %v1576_v51, %v1521_v13  ;;  %v165_v61 = vadd.f32 %v1521_v13, %v1892_v32 }
  0xed   :  { %884 = vmatpush.msra.mxu3 %v746_v46  ;;  %v398_v57 = vadd.f32 %v366_v29, %v195_v48  ;;  %v336_v3 = vadd.f32 %v1893_v18, %v1521_v13  ;;  %v507_v43 = vadd.f32 %v1579_v38, %v1521_v13  ;;  %v196_v17 = vmax.f32 %v164_v4, 0.0 }
  0xee   :  { %v568_v35 = vadd.f32 %v536_v60, %v397_v28  ;;  %v367_v42 = vmax.f32 %v335_v20, 0.0  ;;  %v538_v30 = vmax.f32 %v506_v23, 0.0  ;;  %v197_v53 = vmax.f32 %v165_v61, 0.0 }
  0xef   :  { %v569_v59 = vadd.f32 %v537_v11, %v398_v57  ;;  %v368_v7 = vmax.f32 %v336_v3, 0.0  ;;  %v539_v24 = vmax.f32 %v507_v43, 0.0  ;;  %v158_v31 = vadd.f32 %v1685_v6, %v1894_v40 }
  0xf0   :  { %v399_v51 = vadd.f32 %v367_v42, %v196_v17  ;;  %v329_v22 = vadd.f32 %v1646_v21, %v1685_v6  ;;  %v500_v62 = vadd.f32 %v1595_v33, %v1685_v6  ;;  %v671_v55 = vadd.f32 %v639_v52, %v1685_v6  ;;  %v767_v17 = vld [vmem:[%s1820_s3] sm:$0xff] }
  0xf1   :  { %v604_v16 = vpop.permute.xlu1 %603  ;;  %v400_v38 = vadd.f32 %v368_v7, %v197_v53  ;;  %v159_v41 = vadd.f32 %v1685_v6, %v1895_v50  ;;  %v330_v19 = vadd.f32 %v1649_v47, %v1685_v6  ;;  %v190_v56 = vmax.f32 %v158_v31, 0.0 }
  0xf2   :  { %v643_v34 = vmul.f32 %v1241_v1, %v604_v16  ;;  %v644_v63 = vmul.f32 %v1243_v2, %v604_v16  ;;  %v645_v26 = vmul.f32 %v1263_v10, %v604_v16  ;;  %v646_v21 = vmul.f32 %v1270_v15, %v604_v16 }
  0xf3   :  { %v570_v49 = vadd.f32 %v538_v30, %v399_v51  ;;  %v571_v33 = vadd.f32 %v539_v24, %v400_v38  ;;  %v361_v37 = vmax.f32 %v329_v22, 0.0  ;;  %v532_v1 = vmax.f32 %v500_v62, 0.0  ;;  %v1897_v30 = vld [vmem:[#allocation9_spill] sm:$0xff]  ;;  %v917_v62 = vld [vmem:[%s1819_s4 + $0x8] sm:$0xff] }
  0xf4   :  { %v675_v52 = vadd.f32 %v643_v34, %v1521_v13  ;;  %v676_v5 = vadd.f32 %v644_v63, %v1521_v13  ;;  %v677_v39 = vadd.f32 %v645_v26, %v1521_v13  ;;  %v678_v47 = vadd.f32 %v646_v21, %v1521_v13  ;;  %v916_v13 = vld [vmem:[%s1819_s4] sm:$0xff]  ;;  %927 = vperm.xlu1 %1028, %v917_v62   ;;  %v919_v63 = vld [vmem:[%s1819_s4 + $0x18] sm:$0xff]  ;;  %v769_v26 = vld [vmem:[%s1820_s3 + $0x10] sm:$0xff] }
  0xf5   :  { %v393_v12 = vadd.f32 %v361_v37, %v190_v56  ;;  %v703_v54 = vmax.f32 %v671_v55, 0.0  ;;  %v191_v2 = vmax.f32 %v159_v41, 0.0  ;;  %v362_v11 = vmax.f32 %v330_v19, 0.0  ;;  %922 = vperm.xlu0 %1027, %v916_v13   ;;  %v768_v19 = vld [vmem:[%s1820_s3 + $0x8] sm:$0xff]  ;;  %v770_v21 = vld [vmem:[%s1820_s3 + $0x18] sm:$0xff] }
  0xf6   :  { %v707_v60 = vmax.f32 %v675_v52, 0.0  ;;  %v708_v10 = vmax.f32 %v676_v5, 0.0  ;;  %v709_v46 = vmax.f32 %v677_v39, 0.0  ;;  %v710_v48 = vmax.f32 %v678_v47, 0.0 }
  0xf7   :  { %v564_v29 = vadd.f32 %v532_v1, %v393_v12  ;;  %v501_v28 = vadd.f32 %v1599_v36, %v1685_v6  ;;  %v672_v0 = vadd.f32 %v1679_v9, %v1685_v6  ;;  %v642_v32 = vmul.f32 %v1270_v15, %v1671_v8  ;;  %v1896_v36 = vld [vmem:[#allocation8_spill] sm:$0xff] }
  0xf8   :  { %v739_v4 = vadd.f32 %v707_v60, %v568_v35  ;;  %v740_v20 = vadd.f32 %v708_v10, %v569_v59  ;;  %v741_v23 = vadd.f32 %v709_v46, %v570_v49  ;;  %v742_v57 = vadd.f32 %v710_v48, %v571_v33 }
  0xf9   :  { %v735_v61 = vadd.f32 %v703_v54, %v564_v29  ;;  %v394_v18 = vadd.f32 %v362_v11, %v191_v2  ;;  %v533_v3 = vmax.f32 %v501_v28, 0.0  ;;  %v160_v9 = vadd.f32 %v1685_v6, %v1896_v36 }
  0xfa   :  { %798 = vmatpush.msra.mxu0 %v739_v4  ;;  %827 = vmatpush.msra.mxu1 %v740_v20  ;;  %v331_v43 = vadd.f32 %v1652_v45, %v1685_v6  ;;  %v502_v35 = vadd.f32 %v1637_v14, %v1685_v6  ;;  %v471_v15 = vmul.f32 %v1222_v58, %v1588_v27  ;;  %v704_v42 = vmax.f32 %v672_v0, 0.0 }
  0xfb   :  { %856 = vmatpush.msra.mxu2 %v741_v23  ;;  %885 = vmatpush.msra.mxu3 %v742_v57  ;;  %v565_v8 = vadd.f32 %v533_v3, %v394_v18  ;;  %v161_v59 = vadd.f32 %v1685_v6, %v1897_v30  ;;  %v192_v45 = vmax.f32 %v160_v9, 0.0  ;;  %v673_v14 = vadd.f32 %v1683_v25, %v1685_v6 }
  0xfc   :  { %799 = vmatpush.msra.mxu0 %v735_v61  ;;  %v363_v53 = vmax.f32 %v331_v43, 0.0  ;;  %v332_v7 = vadd.f32 %v1657_v44, %v1685_v6  ;;  %v503_v58 = vadd.f32 %v471_v15, %v1685_v6  ;;  %v534_v40 = vmax.f32 %v502_v35, 0.0  ;;  %v918_v44 = vld [vmem:[%s1819_s4 + $0x10] sm:$0xff]  ;;  %937 = vperm.xlu1 %1028, %v919_v63  }
  0xfd   :  { %v736_v24 = vadd.f32 %v704_v42, %v565_v8  ;;  %v193_v51 = vmax.f32 %v161_v59, 0.0  ;;  %979 = vmatmul.msk.f32.vlgmr.msra.gmra.mxu0 %vm771_vm0, %v767_v17  ;;  %v674_v22 = vadd.f32 %v642_v32, %v1685_v6  ;;  %v705_v16 = vmax.f32 %v673_v14, 0.0  ;;  %932 = vperm.xlu2 %1029, %v918_v44  }
  0xfe   :  { %v395_v27 = vadd.f32 %v363_v53, %v192_v45  ;;  %v364_v31 = vmax.f32 %v332_v7, 0.0  ;;  %v535_v55 = vmax.f32 %v503_v58, 0.0 }
  0xff   :  { %828 = vmatpush.msra.mxu1 %v736_v24  ;;  %v706_v6 = vmax.f32 %v674_v22, 0.0 }
 0x100   :  { %v566_v25 = vadd.f32 %v534_v40, %v395_v27  ;;  %v396_v38 = vadd.f32 %v364_v31, %v193_v51  ;;  %983 = vmatmul.msk.f32.vlgmr.msra.gmra.mxu1 %vm771_vm0, %v767_v17 }
 0x102   :  { %v737_v50 = vadd.f32 %v705_v16, %v566_v25  ;;  %v567_v41 = vadd.f32 %v535_v55, %v396_v38 }
 0x104   :  { %857 = vmatpush.msra.mxu2 %v737_v50  ;;  %v738_v34 = vadd.f32 %v706_v6, %v567_v41 }
 0x105   :  { %987 = vmatmul.msk.f32.vlgmr.msra.gmra.mxu2 %vm771_vm0, %v767_v17  ;;  %980 = vmatmul.msk.f32.gmra.mxu0 %vm771_vm0, %v768_v19 }
 0x106   :  { %886 = vmatpush.msra.mxu3 %v738_v34 }
 0x107   :  { %991 = vmatmul.msk.f32.vlgmr.msra.gmra.mxu3 %vm771_vm0, %v767_v17 }
 0x108   :  { %984 = vmatmul.msk.f32.gmra.mxu1 %vm771_vm0, %v768_v19 }
 0x10d   :  { %988 = vmatmul.msk.f32.gmra.mxu2 %vm771_vm0, %v768_v19  ;;  %981 = vmatmul.msk.f32.gmra.mxu0 %vm771_vm0, %v769_v26 }
 0x10f   :  { %992 = vmatmul.msk.f32.gmra.mxu3 %vm771_vm0, %v768_v19 }
 0x110   :  { %985 = vmatmul.msk.f32.gmra.mxu1 %vm771_vm0, %v769_v26 }
 0x115   :  { %989 = vmatmul.msk.f32.gmra.mxu2 %vm771_vm0, %v769_v26  ;;  %982 = vmatmul.msk.f32.gmra.mxu0 %vm771_vm0, %v770_v21 }
 0x117   :  { %993 = vmatmul.msk.f32.gmra.mxu3 %vm771_vm0, %v769_v26 }
 0x118   :  { %986 = vmatmul.msk.f32.gmra.mxu1 %vm771_vm0, %v770_v21 }
 0x11d   :  { %990 = vmatmul.msk.f32.gmra.mxu2 %vm771_vm0, %v770_v21 }
 0x11f   :  { %994 = vmatmul.msk.f32.gmra.mxu3 %vm771_vm0, %v770_v21 }
 0x157   :  { %v933_v23 = vpop.permute.xlu2 %932 }
 0x166   :  { %v928_v54 = vpop.permute.xlu1 %927 }
 0x167   :  { %v923_v56 = vpop.permute.xlu0 %922 }
 0x16e   :  { %v938_v45 = vpop.permute.xlu1 %937 }
 0x17a   :  { %v801_v49 = vpop.f32.mrf.mxu0 }
 0x17b   :  { %v900_v33 = vmul.f32 0.25, %v801_v49 }
 0x17d   :  { %v830_v37 = vpop.f32.mrf.mxu1  ;;  %v940_v5 = vadd.f32 %v923_v56, %v900_v33 }
 0x17e   :  { %v901_v52 = vmul.f32 0.25, %v830_v37 }
 0x180   :  { %v941_v39 = vadd.f32 %v923_v56, %v901_v52 }
 0x182   :  { %v956_v47 = vpack.c.bf16 %v941_v39, %v940_v5  ;;  %v804_v12 = vpop.f32.mrf.mxu0 }
 0x183   :  { %v904_v1 = vmul.f32 0.25, %v804_v12 }
 0x184   :  { %964 = vst [vmem:[%s1821_s5] sm:$0xff] %v956_v47 }
 0x185   :  { %v833_v2 = vpop.f32.mrf.mxu1  ;;  %v944_v10 = vadd.f32 %v928_v54, %v904_v1 }
 0x186   :  { %v905_v60 = vmul.f32 0.25, %v833_v2 }
 0x188   :  { %v859_v46 = vpop.f32.mrf.mxu2  ;;  %v945_v48 = vadd.f32 %v928_v54, %v905_v60 }
 0x189   :  { %v902_v29 = vmul.f32 0.25, %v859_v46 }
 0x18a   :  { %v888_v11 = vpop.f32.mrf.mxu3  ;;  %v958_v28 = vpack.c.bf16 %v945_v48, %v944_v10  ;;  %v807_v0 = vpop.f32.mrf.mxu0 }
 0x18b   :  { %v903_v13 = vmul.f32 0.25, %v888_v11  ;;  %v942_v4 = vadd.f32 %v923_v56, %v902_v29  ;;  %v908_v20 = vmul.f32 0.25, %v807_v0 }
 0x18c   :  { %966 = vst [vmem:[%s1821_s5 + $0x10] sm:$0xff] %v958_v28 }
 0x18d   :  { %v943_v57 = vadd.f32 %v923_v56, %v903_v13  ;;  %v836_v32 = vpop.f32.mrf.mxu1  ;;  %v948_v18 = vadd.f32 %v933_v23, %v908_v20 }
 0x18e   :  { %v909_v61 = vmul.f32 0.25, %v836_v32 }
 0x18f   :  { %v957_v3 = vpack.c.bf16 %v943_v57, %v942_v4 }
 0x190   :  { %v862_v36 = vpop.f32.mrf.mxu2  ;;  %v949_v9 = vadd.f32 %v933_v23, %v909_v61 }
 0x191   :  { %965 = vst [vmem:[%s1821_s5 + $0x8] sm:$0xff] %v957_v3  ;;  %v906_v43 = vmul.f32 0.25, %v862_v36 }
 0x192   :  { %v891_v35 = vpop.f32.mrf.mxu3  ;;  %v960_v17 = vpack.c.bf16 %v949_v9, %v948_v18  ;;  %v810_v15 = vpop.f32.mrf.mxu0 }
 0x193   :  { %v907_v8 = vmul.f32 0.25, %v891_v35  ;;  %v946_v42 = vadd.f32 %v928_v54, %v906_v43  ;;  %v912_v30 = vmul.f32 0.25, %v810_v15 }
 0x194   :  { %968 = vst [vmem:[%s1821_s5 + $0x20] sm:$0xff] %v960_v17 }
 0x195   :  { %v947_v59 = vadd.f32 %v928_v54, %v907_v8  ;;  %v839_v53 = vpop.f32.mrf.mxu1  ;;  %v952_v14 = vadd.f32 %v938_v45, %v912_v30 }
 0x196   :  { %v913_v7 = vmul.f32 0.25, %v839_v53 }
 0x197   :  { %v959_v24 = vpack.c.bf16 %v947_v59, %v946_v42 }
 0x198   :  { %v865_v51 = vpop.f32.mrf.mxu2  ;;  %v953_v58 = vadd.f32 %v938_v45, %v913_v7 }
 0x199   :  { %967 = vst [vmem:[%s1821_s5 + $0x18] sm:$0xff] %v959_v24  ;;  %v910_v27 = vmul.f32 0.25, %v865_v51 }
 0x19a   :  { %v894_v40 = vpop.f32.mrf.mxu3  ;;  %v962_v31 = vpack.c.bf16 %v953_v58, %v952_v14 }
 0x19b   :  { %v911_v22 = vmul.f32 0.25, %v894_v40  ;;  %v950_v62 = vadd.f32 %v933_v23, %v910_v27 }
 0x19c   :  { %970 = vst [vmem:[%s1821_s5 + $0x30] sm:$0xff] %v962_v31 }
 0x19d   :  { %v951_v44 = vadd.f32 %v933_v23, %v911_v22 }
 0x19f   :  { %v961_v25 = vpack.c.bf16 %v951_v44, %v950_v62 }
 0x1a0   :  { %v868_v16 = vpop.f32.mrf.mxu2 }
 0x1a1   :  { %969 = vst [vmem:[%s1821_s5 + $0x28] sm:$0xff] %v961_v25  ;;  %v914_v38 = vmul.f32 0.25, %v868_v16 }
 0x1a2   :  { %v897_v55 = vpop.f32.mrf.mxu3 }
 0x1a3   :  { %v954_v50 = vadd.f32 %v938_v45, %v914_v38  ;;  %v915_v41 = vmul.f32 0.25, %v897_v55 }
 0x1a5   :  { %v955_v6 = vadd.f32 %v938_v45, %v915_v41 }
 0x1a7   :  { %v963_v19 = vpack.c.bf16 %v955_v6, %v954_v50 }
 0x1a9   :  { %971 = vst [vmem:[%s1821_s5 + $0x38] sm:$0xff] %v963_v19 }

// kernel: cloud_mask_forward.5
= control target key start
LH: loop header
LB: loop body
LE: loop exit
PB: predicated region body
PF: predicated region fallthrough
CT: control target
= control target key end

     0   :  { %8 = vsyncpa [#allocation3], 0  ;;  %s1126_s0 = inlined_call_operand.vmem [shape: f32[2,7,4,4], index: 0, kind: input, shape index: {}]   ;;  %s1127_s1 = inlined_call_operand.vmem [shape: f32[16,4], index: 1, kind: input, shape index: {}]   ;;  %s1128_s2 = inlined_call_operand.vmem [shape: f32[4,16], index: 2, kind: input, shape index: {}]   ;;  %s1129_s3 = inlined_call_operand.hbm [shape: f32[2,7,16,16], index: 3, kind: output, shape index: {}]  }
   0x1   :  { %10 = vsyncpa [#allocation3 + $0x1], 0  ;;  %s949_s12 = smov 0   ;;  %s951_s13 = smov 0  }
   0x2   :  { %s953_s14 = smov 0   ;;  %s955_s15 = smov 0  }
   0x3 LB: > { %s970_s16 = sadd.s32 4294967295, %s925_s15   ;;  %s726_s17 = sadd.s32 4294967294, %s925_s15   ;;  %s925_s15 = sphi %s955_s15, %s1135_s15   ;;  %s921_s14 = sphi %s953_s14, %s1134_s14   ;;  %s917_s13 = sphi %s951_s13, %s1133_s13   ;;  %s913_s12 = sphi %s949_s12, %s1132_s12  }
   0x4   : > { %s974_s18 = sadd.s32 1, %s925_s15   ;;  %s91_s19 = sadd.s32 1, %s921_s14 }
   0x5   : > { %s88_s20 = ssub.s32 %s925_s15, %s974_s18  ;;  %p101_p0 = scmp.ne.s32.totalorder %s921_s14, %s917_s13 }
   0x6   : > { %p89_p1 = scmp.eq.s32.totalorder %s88_s20, 0  ;;  %p102_p2 = scmp.eq.s32.totalorder %s970_s16, 1 }
   0x7   : > { %p107_p3 = scmp.ne.s32.totalorder %s917_s13, %s913_s12  ;;  %p108_p4 = scmp.eq.s32.totalorder %s726_s17, 1 }
   0x8   : > { %s985_s21 = scalar_select %p89_p1, %s921_s14, %s91_s19  }
   0x9   : > { %p987_p5 = por %p102_p2, %p101_p0  ;;  %p991_p6 = por %p108_p4, %p107_p3 }
   0xa   : > { %p729_p7 = scmp.ge.s32.totalorder %s925_s15, 1  ;;  %p140_p8 = scmp.lt.s32.totalorder %s925_s15, 3 }
   0xc   : > { %p141_p9 = pnand %p729_p7, %p140_p8 }
   0xd   : > { %p164_p10 = scmp.lt.s32.totalorder (!%p141_p9), %s970_s16, 1  ;;  %s161_s8 = sand.u32 (!%p141_p9), 1, %s917_s13  }
   0xe   : > { %144 = sbr.rel (%p141_p9) target bundleno = 502 (0x1f6), region = 32  ;;  %s649_s25 = scalar_lea.sflag (!%p141_p9), [#allocation3], %s161_s8 }
   0xf   : > { %s787_s9 = smul.u32 (!%p141_p9), 112, %s161_s8 }
  0x10   : > { %s789_s11 = smul.u32 (!%p141_p9), 112, %s970_s16 }
  0x11   : > { %s1062_s10 = scalar_lea.vmem (!%p141_p9), [#allocation2], %s787_s9 }
  0x12   : > { %s660_s20 = scalar_lea.hbm (!%p141_p9), %s1129_s3, %s789_s11 }
  0x13   : > { %v171_v0 = vld [vmem:[%s1128_s2] sm:$0xf]  ;;  %vm177_vm0 = vcmask 1043456   ;;  %s165_s26 = scalar_select %p164_p10, %s970_s16, 1  ;;  %vm173_vm1 = vcmask 31744   ;;  %v170_v8 = vld [vmem:[%s1127_s1 + $0x8] sm:$0xff] }
  0x14   : > { %731 = vmatpush.msk.msra.mxu0 %vm177_vm0, %v171_v0  ;;  %737 = vmatpush.msk.msra.mxu2 %vm177_vm0, %v171_v0  ;;  %v169_v5 = vld [vmem:[%s1127_s1] sm:$0xff]  ;;  %vm615_vm2 = vcmask 130048   ;;  %s661_s16 = sshll.u32 %s1062_s10, 4  ;;  %s663_s24 = sshll.u32 %s660_s20, 4  ;;  %s662_s16 = int_to_ptr.vmem [resolvable:$true] %s661_s16  ;;  %s664_s24 = int_to_ptr.hbm [resolvable:$true] %s663_s24 }
  0x15   : > { %s788_s27 = smul.u32 28, %s165_s26  ;;  %s877_s26 = sshra.s32 %s664_s24, 4  ;;  %s878_s26 = int_to_ptr.hbm [resolvable:$true] %s877_s26 }
  0x16   : > { %743 = vmatpush.msk.msrb.mxu0 %vm177_vm0, %v171_v0  ;;  %p884_p0 = scmp.lt.s32.totalorder %s878_s26, %s1129_s3 }
  0x17   : > { %s1008_s30 = scalar_lea.vmem %s1126_s0, %s788_s27  ;;  %s879_s27 = scalar_lea.hbm %s878_s26, 112 }
  0x18   : > { %v172_v1 = vld [vmem:[%s1008_s30] sm:$0xf]  ;;  %v736_v2 = vld [vmem:[%s1008_s30 + $0x4] sm:$0xf]  ;;  %v742_v3 = vld [vmem:[%s1008_s30 + $0x8] sm:$0xf]  ;;  %p880_p11 = scmp.ne.s32.totalorder %s878_s26, %s879_s27 }
  0x19   : > { %732 = vmatmul.msk.f32.vlgmr.msra.gmra.mxu0 %vm173_vm1, %v172_v1  ;;  %738 = vmatmul.msk.f32.vlgmr.msra.gmra.mxu2 %vm173_vm1, %v736_v2  ;;  %v748_v4 = vld [vmem:[%s1008_s30 + $0xc] sm:$0xf]  ;;  %v754_v11 = vld [vmem:[%s1008_s30 + $0x10] sm:$0xf]  ;;  %v760_v12 = vld [vmem:[%s1008_s30 + $0x14] sm:$0xf] }
  0x1a   : > { %749 = vmatpush.msk.msra.mxu0 %vm177_vm0, %v171_v0  ;;  %v766_v13 = vld [vmem:[%s1008_s30 + $0x18] sm:$0xf]  ;;  %p881_p12 = pnand %p880_p11, %p987_p5  ;;  %s883_s30 = scalar_lea.hbm %s1129_s3, 224 }
  0x1b   : > { %p885_p1 = scmp.lt.s32.totalorder %s883_s30, %s879_s27 }
  0x1c   : > { %p882_p13 = pneg %p881_p12 }
  0x1d   : > { %p886_p2 = por %p885_p1, %p884_p0 }
  0x1f   : > { %p887_p3 = pnand %p886_p2, %p882_p13 }
  0x21   : > { %744 = vmatmul.msk.f32.vlgmr.msrb.gmra.mxu0 %vm173_vm1, %v742_v3 }
  0x29   : > { %750 = vmatmul.msk.f32.vlgmr.msra.gmra.mxu0 %vm173_vm1, %v748_v4 }
  0x96   : > { %v198_v6 = vpop.f32.mrf.mxu0 }
  0x97   : > { %733 = vmatpush.msk.msra.mxu1 %vm177_vm0, %v198_v6 }
  0x98   : > { %734 = vmatmul.msk.f32.vlgmr.msra.gmra.mxu1 %vm173_vm1, %v169_v5 }
  0x9c   : > { %v255_v7 = vpop.f32.mrf.mxu2 }
  0x9d   : > { %739 = vmatpush.msk.msra.mxu3 %vm177_vm0, %v255_v7 }
  0x9e   : > { %740 = vmatmul.msk.f32.vlgmr.msra.gmra.mxu3 %vm173_vm1, %v169_v5  ;;  %v306_v9 = vpop.f32.mrf.mxu0 }
  0x9f   : > { %745 = vmatpush.msk.msrb.mxu2 %vm177_vm0, %v306_v9  ;;  %755 = vmatpush.msk.msrb.mxu3 %vm177_vm0, %v171_v0 }
  0xa0   : > { %735 = vmatmul.msk.f32.gmra.mxu1 %vm173_vm1, %v170_v8  ;;  %746 = vmatmul.msk.f32.vlgmr.msrb.gmra.mxu2 %vm173_vm1, %v169_v5 }
  0xa1   : > { %761 = vmatpush.msk.msra.mxu2 %vm177_vm0, %v171_v0 }
  0xa6   : > { %741 = vmatmul.msk.f32.gmra.mxu3 %vm173_vm1, %v170_v8  ;;  %v357_v10 = vpop.f32.mrf.mxu0 }
  0xa7   : > { %751 = vmatpush.msk.msrb.mxu1 %vm177_vm0, %v357_v10 }
  0xa8   : > { %747 = vmatmul.msk.f32.gmra.mxu2 %vm173_vm1, %v170_v8  ;;  %752 = vmatmul.msk.f32.vlgmr.msrb.gmra.mxu1 %vm173_vm1, %v169_v5 }
  0xa9   : > { %767 = vmatpush.msk.msra.mxu1 %vm177_vm0, %v171_v0 }
  0xae   : > { %756 = vmatmul.msk.f32.vlgmr.msrb.gmra.mxu3 %vm173_vm1, %v754_v11 }
  0xb0   : > { %753 = vmatmul.msk.f32.gmra.mxu1 %vm173_vm1, %v170_v8  ;;  %762 = vmatmul.msk.f32.vlgmr.msra.gmra.mxu2 %vm173_vm1, %v760_v12 }
  0xb8   : > { %768 = vmatmul.msk.f32.vlgmr.msra.gmra.mxu1 %vm173_vm1, %v766_v13 }
 0x115   : > { %v227_v14 = vpop.f32.mrf.mxu1 }
 0x11d   : > { %v230_v15 = vpop.f32.mrf.mxu1 }
 0x121   : > { %v278_v16 = vpop.f32.mrf.mxu3 }
 0x122   : > { %v539_v25 = vmax.f32 %v227_v14, %v278_v16 }
 0x123   : > { %v329_v17 = vpop.f32.mrf.mxu2 }
 0x124   : > { %v541_v26 = vmax.f32 %v539_v25, %v329_v17 }
 0x125   : > { %v380_v18 = vpop.f32.mrf.mxu1 }
 0x126   : > { %v543_v28 = vmax.f32 %v541_v26, %v380_v18 }
 0x129   : > { %v281_v19 = vpop.f32.mrf.mxu3 }
 0x12a   : > { %v540_v29 = vmax.f32 %v230_v15, %v281_v19 }
 0x12b   : > { %v332_v20 = vpop.f32.mrf.mxu2 }
 0x12c   : > { %v542_v32 = vmax.f32 %v540_v29, %v332_v20 }
 0x12d   : > { %v1046_v21 = vpop.f32.mrf.mxu1 }
 0x12e   : > { %v544_v37 = vmax.f32 %v542_v32, %v1046_v21 }
 0x131   : > { %v408_v22 = vpop.f32.mrf.mxu3 }
 0x132   : > { %757 = vmatpush.msk.msrb.mxu0 %vm177_vm0, %v408_v22 }
 0x133   : > { %758 = vmatmul.msk.f32.vlgmr.msrb.gmra.mxu0 %vm173_vm1, %v169_v5  ;;  %v459_v23 = vpop.f32.mrf.mxu2 }
 0x134   : > { %763 = vmatpush.msk.msra.mxu3 %vm177_vm0, %v459_v23 }
 0x135   : > { %764 = vmatmul.msk.f32.vlgmr.msra.gmra.mxu3 %vm173_vm1, %v169_v5  ;;  %v510_v24 = vpop.f32.mrf.mxu1 }
 0x136   : > { %769 = vmatpush.msk.msrb.mxu2 %vm177_vm0, %v510_v24 }
 0x137   : > { %770 = vmatmul.msk.f32.vlgmr.msrb.gmra.mxu2 %vm173_vm1, %v169_v5 }
 0x13b   : > { %759 = vmatmul.msk.f32.gmra.mxu0 %vm173_vm1, %v170_v8 }
 0x13d   : > { %765 = vmatmul.msk.f32.gmra.mxu3 %vm173_vm1, %v170_v8 }
 0x13f   : > { %771 = vmatmul.msk.f32.gmra.mxu2 %vm173_vm1, %v170_v8 }
 0x1b0   : > { %v431_v27 = vpop.f32.mrf.mxu0 }
 0x1b1   : > { %v545_v30 = vmax.f32 %v543_v28, %v431_v27 }
 0x1b8   : > { %v482_v31 = vpop.f32.mrf.mxu3  ;;  %v434_v36 = vpop.f32.mrf.mxu0 }
 0x1b9   : > { %v547_v33 = vmax.f32 %v545_v30, %v482_v31  ;;  %v546_v42 = vmax.f32 %v544_v37, %v434_v36 }
 0x1ba   : > { %v533_v34 = vpop.f32.mrf.mxu2 }
 0x1bb   : > { %v549_v35 = vmax.f32 %v547_v33, %v533_v34 }
 0x1bd   : > { %v551_v38 = vsub.f32 %v227_v14, %v549_v35  ;;  %v557_v39 = vsub.f32 %v278_v16, %v549_v35  ;;  %v563_v40 = vsub.f32 %v329_v17, %v549_v35  ;;  %v569_v41 = vsub.f32 %v380_v18, %v549_v35 }
 0x1be   : > { %v575_v45 = vsub.f32 %v431_v27, %v549_v35  ;;  %v581_v47 = vsub.f32 %v482_v31, %v549_v35  ;;  %v587_v53 = vsub.f32 %v533_v34, %v549_v35 }
 0x1bf   : > { %v553_v43 = vmul.f32 1.442695, %v551_v38  ;;  %v559_v44 = vmul.f32 1.442695, %v557_v39  ;;  %v565_v46 = vmul.f32 1.442695, %v563_v40 }
 0x1c0   : > { %v485_v48 = vpop.f32.mrf.mxu3  ;;  %v571_v50 = vmul.f32 1.442695, %v569_v41  ;;  %v577_v52 = vmul.f32 1.442695, %v575_v45  ;;  %v583_v55 = vmul.f32 1.442695, %v581_v47 }
 0x1c1   : > { %831 = vpow2.f32 %v553_v43  ;;  %v548_v49 = vmax.f32 %v546_v42, %v485_v48  ;;  %v589_v61 = vmul.f32 1.442695, %v587_v53 }
 0x1c2   : > { %833 = vpow2.f32 %v559_v44  ;;  %v536_v51 = vpop.f32.mrf.mxu2 }
 0x1c3   : > { %v550_v54 = vmax.f32 %v548_v49, %v536_v51  ;;  %835 = vpow2.f32 %v565_v46 }
 0x1c4   : > { %837 = vpow2.f32 %v571_v50 }
 0x1c5   : > { %v552_v56 = vsub.f32 %v230_v15, %v550_v54  ;;  %v558_v57 = vsub.f32 %v281_v19, %v550_v54  ;;  %v564_v58 = vsub.f32 %v332_v20, %v550_v54  ;;  %v570_v59 = vsub.f32 %v1046_v21, %v550_v54 }
 0x1c6   : > { %839 = vpow2.f32 %v577_v52  ;;  %v576_v2 = vsub.f32 %v434_v36, %v550_v54  ;;  %v582_v6 = vsub.f32 %v485_v48, %v550_v54  ;;  %v588_v10 = vsub.f32 %v536_v51, %v550_v54 }
 0x1c7   : > { %v832_v60 = vpop.eup %831  ;;  %v555_v62 = vmul.f32 1.442695, %v552_v56  ;;  %v561_v63 = vmul.f32 1.442695, %v558_v57  ;;  %841 = vpow2.f32 %v583_v55  ;;  %v567_v1 = vmul.f32 1.442695, %v564_v58 }
 0x1c8   : > { %v834_v0 = vpop.eup %833  ;;  %v573_v5 = vmul.f32 1.442695, %v570_v59  ;;  %v579_v9 = vmul.f32 1.442695, %v576_v2  ;;  %v585_v14 = vmul.f32 1.442695, %v582_v6 }
 0x1c9   : > { %v593_v3 = vadd.f32 %v834_v0, %v832_v60  ;;  %843 = vpow2.f32 %v555_v62  ;;  %v836_v4 = vpop.eup %835  ;;  %v591_v18 = vmul.f32 1.442695, %v588_v10 }
 0x1ca   : > { %845 = vpow2.f32 %v561_v63  ;;  %v838_v8 = vpop.eup %837 }
 0x1cb   : > { %847 = vpow2.f32 %v589_v61  ;;  %v595_v7 = vadd.f32 %v836_v4, %v593_v3 }
 0x1cc   : > { %849 = vpow2.f32 %v567_v1  ;;  %v840_v11 = vpop.eup %839 }
 0x1cd   : > { %v597_v12 = vadd.f32 %v838_v8, %v595_v7  ;;  %v842_v13 = vpop.eup %841  ;;  %851 = vpow2.f32 %v573_v5 }
 0x1ce   : > { %853 = vpow2.f32 %v579_v9 }
 0x1cf   : > { %v844_v15 = vpop.eup %843  ;;  %v599_v16 = vadd.f32 %v840_v11, %v597_v12  ;;  %855 = vpow2.f32 %v585_v14 }
 0x1d0   : > { %v846_v17 = vpop.eup %845  ;;  %857 = vpow2.f32 %v591_v18 }
 0x1d1   : > { %v848_v19 = vpop.eup %847  ;;  %v601_v20 = vadd.f32 %v842_v13, %v599_v16  ;;  %v594_v21 = vadd.f32 %v846_v17, %v844_v15 }
 0x1d2   : > { %v850_v22 = vpop.eup %849 }
 0x1d3   : > { %v603_v23 = vadd.f32 %v848_v19, %v601_v20  ;;  %v596_v24 = vadd.f32 %v850_v22, %v594_v21  ;;  %v852_v25 = vpop.eup %851 }
 0x1d4   : > { %v854_v27 = vpop.eup %853 }
 0x1d5   : > { %859 = vrcp.f32 %v603_v23  ;;  %v598_v26 = vadd.f32 %v852_v25, %v596_v24  ;;  %v856_v29 = vpop.eup %855 }
 0x1d6   : > { %v858_v31 = vpop.eup %857 }
 0x1d7   : > { %v600_v28 = vadd.f32 %v854_v27, %v598_v26 }
 0x1d9   : > { %v602_v30 = vadd.f32 %v856_v29, %v600_v28 }
 0x1db   : > { %v860_v32 = vpop.eup %859  ;;  %v604_v33 = vadd.f32 %v858_v31, %v602_v30 }
 0x1dc   : > { %v607_v34 = vmul.f32 %v860_v32, %v603_v23 }
 0x1dd   : > { %861 = vrcp.f32 %v604_v33 }
 0x1de   : > { %v609_v35 = vsub.f32 2.0, %v607_v34 }
 0x1e0   : > { %v611_v36 = vmul.f32 %v860_v32, %v609_v35 }
 0x1e2   : > { %v613_v37 = vmul.f32 %v832_v60, %v611_v36  ;;  %v618_v38 = vmul.f32 %v834_v0, %v611_v36  ;;  %v623_v39 = vmul.f32 %v836_v4, %v611_v36  ;;  %v628_v41 = vmul.f32 %v838_v8, %v611_v36 }
 0x1e3   : > { %v862_v40 = vpop.eup %861  ;;  %v633_v42 = vmul.f32 %v840_v11, %v611_v36  ;;  %v638_v44 = vmul.f32 %v842_v13, %v611_v36  ;;  %v643_v45 = vmul.f32 %v848_v19, %v611_v36 }
 0x1e4   : > { %616 = vst.msk [vmem:[%s1062_s10] sm:$0xff] %vm615_vm2, %v613_v37  ;;  %v608_v43 = vmul.f32 %v862_v40, %v604_v33 }
 0x1e5   : > { %772 = vst.msk [vmem:[%s1062_s10 + $0x10] sm:$0xff] %vm615_vm2, %v618_v38 }
 0x1e6   : > { %774 = vst.msk [vmem:[%s1062_s10 + $0x20] sm:$0xff] %vm615_vm2, %v623_v39  ;;  %v610_v46 = vsub.f32 2.0, %v608_v43 }
 0x1e7   : > { %776 = vst.msk [vmem:[%s1062_s10 + $0x30] sm:$0xff] %vm615_vm2, %v628_v41 }
 0x1e8   : > { %778 = vst.msk [vmem:[%s1062_s10 + $0x40] sm:$0xff] %vm615_vm2, %v633_v42  ;;  %v612_v47 = vmul.f32 %v862_v40, %v610_v46 }
 0x1e9   : > { %780 = vst.msk [vmem:[%s1062_s10 + $0x50] sm:$0xff] %vm615_vm2, %v638_v44 }
 0x1ea   : > { %782 = vst.msk [vmem:[%s1062_s10 + $0x60] sm:$0xff] %vm615_vm2, %v643_v45  ;;  %v614_v48 = vmul.f32 %v844_v15, %v612_v47  ;;  %v619_v49 = vmul.f32 %v846_v17, %v612_v47  ;;  %v624_v50 = vmul.f32 %v850_v22, %v612_v47  ;;  %v629_v51 = vmul.f32 %v852_v25, %v612_v47 }
 0x1eb   : > { %v634_v52 = vmul.f32 %v854_v27, %v612_v47  ;;  %v639_v53 = vmul.f32 %v856_v29, %v612_v47  ;;  %v644_v54 = vmul.f32 %v858_v31, %v612_v47 }
 0x1ec   : > { %617 = vst.msk [vmem:[%s1062_s10 + $0x8] sm:$0xff] %vm615_vm2, %v614_v48 }
 0x1ed   : > { %773 = vst.msk [vmem:[%s1062_s10 + $0x18] sm:$0xff] %vm615_vm2, %v619_v49 }
 0x1ee   : > { %775 = vst.msk [vmem:[%s1062_s10 + $0x28] sm:$0xff] %vm615_vm2, %v624_v50 }
 0x1ef   : > { %777 = vst.msk [vmem:[%s1062_s10 + $0x38] sm:$0xff] %vm615_vm2, %v629_v51 }
 0x1f0   : > { %779 = vst.msk [vmem:[%s1062_s10 + $0x48] sm:$0xff] %vm615_vm2, %v634_v52 }
 0x1f1   : > { %781 = vst.msk [vmem:[%s1062_s10 + $0x58] sm:$0xff] %vm615_vm2, %v639_v53 }
 0x1f2   : > { %783 = vst.msk [vmem:[%s1062_s10 + $0x68] sm:$0xff] %vm615_vm2, %v644_v54 }
 0x1f3   : > { %890 = shalt.err (!%p887_p3)
}
 0x1f4   : > { %s927_s6 = smov 128   ;;  %s928_s7 = smov 8  }
 0x1f5   : > { %790 = dma.vmem_to_hbm [thread:$0]  (%p987_p5), %s662_s16, 1792, %s664_s24, %s649_s25, %s927_s6, %s927_s6, %s928_s7  }
 0x1f6 PF: > { %p796_p4 = scmp.ge.s32.totalorder %s925_s15, 2  ;;  %s678_s8 = sand.u32 1, %s913_s12  }
 0x1f7   : > { %s679_s9 = scalar_lea.sflag [#allocation3], %s678_s8 }
 0x1f8   : > { %p793_p7 = pnand %p796_p4, %p991_p6 }
 0x1fa   : > { %p794_p8 = pneg %p793_p7 }
 0x1fc   : > { %908 = dma.done.wait (%p794_p8), %s679_s9, 1792  }
 0x1fd   : > { %910 = vsyncadd (%p794_p8), %s679_s9, 4294965504  ;;  %p13_p9 = scmp.ge.s32.totalorder %s974_s18, 4   ;;  %s1132_s12 = smov %s917_s13 }
 0x1fe   : > { %s1133_s13 = smov %s921_s14  ;;  %s1134_s14 = smov %s985_s21 }
 0x1ff   : > { %s1135_s15 = smov %s974_s18  ;;  %15 = sbr.rel (!%p13_p9) target bundleno = 3 (0x3), region = 79 }
 0x204   :  { %685 = vsyncpa [#allocation3], 1 }
 0x205   :  { %687 = vsyncpa [#allocation3 + $0x1], 1 }

// kernel: cloud_mask_forward.4
= control target key start
LH: loop header
LB: loop body
LE: loop exit
PB: predicated region body
PF: predicated region fallthrough
CT: control target
= control target key end

     0   :  { %vm439_vm0 = vcmask 523264   ;;  %vm782_vm14 = vcmask 130048   ;;  %s2699_s1 = inlined_call_operand.vmem [shape: bf16[512,64], index: 1, kind: input, shape index: {}]   ;;  %s2700_s2 = inlined_call_operand.vmem [shape: f32[1,64], index: 2, kind: input, shape index: {}]   ;;  %s2701_s0 = inlined_call_operand.vmem [shape: bf16[2,16,512], index: 0, kind: input, shape index: {}]   ;;  %s2702_s4 = inlined_call_operand.vmem [shape: bf16[64,64], index: 4, kind: input, shape index: {}]   ;;  %s2703_s5 = inlined_call_operand.vmem [shape: bf16[64,64], index: 5, kind: input, shape index: {}]   ;;  %s2704_s6 = inlined_call_operand.vmem [shape: bf16[64,64], index: 6, kind: input, shape index: {}]   ;;  %s2705_s3 = inlined_call_operand.vmem [shape: f32[2,64], index: 3, kind: input, shape index: {}]   ;;  %s2706_s7 = inlined_call_operand.vmem [shape: bf16[64,64], index: 7, kind: input, shape index: {}]   ;;  %s2707_s9 = inlined_call_operand.vmem [shape: bf16[64,256], index: 9, kind: input, shape index: {}]   ;;  %s2708_s8 = inlined_call_operand.vmem [shape: f32[2,64], index: 8, kind: input, shape index: {}]   ;;  %s2709_s11 = inlined_call_operand.vmem [shape: bf16[256,64], index: 11, kind: input, shape index: {}]   ;;  %s2710_s10 = inlined_call_operand.vmem [shape: f32[1,256], index: 10, kind: input, shape index: {}]   ;;  %s2711_s12 = inlined_call_operand.vmem [shape: f32[1,64], index: 12, kind: input, shape index: {}]   ;;  %s2712_s15 = inlined_call_operand.vmem [shape: f32[1,7], index: 15, kind: input, shape index: {}]   ;;  %s2713_s14 = inlined_call_operand.vmem [shape: bf16[64,7], index: 14, kind: input, shape index: {}]   ;;  %s2714_s13 = inlined_call_operand.vmem [shape: f32[2,64], index: 13, kind: input, shape index: {}]   ;;  %s2715_s16 = inlined_call_operand.vmem [shape: f32[2,16,7], index: 16, kind: output, shape index: {}]  }
   0x1   :  { %2717 = sst [smem:[#allocation2_spill]] %s2699_s1  ;;  %v1576_v32 = vld [vmem:[%s2701_s0] sm:$0xf]  ;;  %v1930_v33 = vld [vmem:[%s2701_s0 + $0xc] sm:$0xf0] }
   0x2   :  { %s2718_s23 = sld [smem:[#allocation2_spill]]  ;;  %v1928_v34 = vld [vmem:[%s2701_s0 + $0x4] sm:$0xf]  ;;  %v1578_v35 = vld [vmem:[%s2701_s0 + $0x10] sm:$0xf0]  ;;  %v1577_v40 = vor.u32 %v1930_v33, %v1576_v32 }
   0x3   :  { %v1584_v36 = vld [vmem:[%s2701_s0 + $0x8] sm:$0xf]  ;;  %v1931_v37 = vld [vmem:[%s2701_s0 + $0x14] sm:$0xf0]  ;;  %v1929_v38 = vld [vmem:[%s2701_s0 + $0xc] sm:$0xf]  ;;  %v1581_v41 = vor.u32 %v1928_v34, %v1578_v35 }
   0x4   :  { %v1586_v39 = vld [vmem:[%s2701_s0 + $0x18] sm:$0xf0]  ;;  %v1585_v42 = vor.u32 %v1931_v37, %v1584_v36  ;;  %v1600_v44 = vld [vmem:[%s2701_s0 + $0x28] sm:$0xf]  ;;  %v1592_v45 = vld [vmem:[%s2701_s0 + $0x20] sm:$0xf] }
   0x5   :  { %v1589_v43 = vor.u32 %v1929_v38, %v1586_v39  ;;  %v1934_v46 = vld [vmem:[%s2701_s0 + $0x2c] sm:$0xf0]  ;;  %v1932_v47 = vld [vmem:[%s2701_s0 + $0x24] sm:$0xf]  ;;  %v1594_v48 = vld [vmem:[%s2701_s0 + $0x30] sm:$0xf0] }
   0x6   :  { %v1935_v49 = vld [vmem:[%s2701_s0 + $0x34] sm:$0xf0]  ;;  %v1933_v50 = vld [vmem:[%s2701_s0 + $0x2c] sm:$0xf]  ;;  %v1602_v51 = vld [vmem:[%s2701_s0 + $0x38] sm:$0xf0]  ;;  %v1593_v52 = vor.u32 %v1934_v46, %v1592_v45  ;;  %v1597_v53 = vor.u32 %v1932_v47, %v1594_v48 }
   0x7   :  { %v1601_v54 = vor.u32 %v1935_v49, %v1600_v44  ;;  %v1605_v55 = vor.u32 %v1933_v50, %v1602_v51  ;;  %v2013_v56 = vld [vmem:[%s2700_s2] ss:$0 sm:$0xff] }
   0x8   :  { %v1943_v0 = vld [vmem:[%s2718_s23 + $0x38] sm:$0xff]  ;;  %v1942_v4 = vld [vmem:[%s2718_s23 + $0x30] sm:$0xff]  ;;  %v1941_v8 = vld [vmem:[%s2718_s23 + $0x28] sm:$0xff] }
   0x9   :  { %v1951_v1 = vld [vmem:[%s2718_s23 + $0x78] sm:$0xff]  ;;  %362 = vmatpush.bf16.msra.mxu0 %v1943_v0  ;;  %v1950_v5 = vld [vmem:[%s2718_s23 + $0x70] sm:$0xff]  ;;  %v1949_v9 = vld [vmem:[%s2718_s23 + $0x68] sm:$0xff] }
   0xa   :  { %v1959_v2 = vld [vmem:[%s2718_s23 + $0xb8] sm:$0xff]  ;;  %381 = vmatpush.bf16.msra.mxu1 %v1951_v1  ;;  %v1958_v6 = vld [vmem:[%s2718_s23 + $0xb0] sm:$0xff]  ;;  %v1957_v10 = vld [vmem:[%s2718_s23 + $0xa8] sm:$0xff] }
   0xb   :  { %v1967_v3 = vld [vmem:[%s2718_s23 + $0xf8] sm:$0xff]  ;;  %400 = vmatpush.bf16.msra.mxu2 %v1959_v2  ;;  %v1966_v7 = vld [vmem:[%s2718_s23 + $0xf0] sm:$0xff]  ;;  %v1965_v11 = vld [vmem:[%s2718_s23 + $0xe8] sm:$0xff] }
   0xc   :  { %419 = vmatpush.bf16.msra.mxu3 %v1967_v3  ;;  %v1940_v12 = vld [vmem:[%s2718_s23 + $0x20] sm:$0xff]  ;;  %v1939_v16 = vld [vmem:[%s2718_s23 + $0x18] sm:$0xff]  ;;  %v1938_v20 = vld [vmem:[%s2718_s23 + $0x10] sm:$0xff] }
   0xd   :  { %363 = vmatpush.bf16.msra.mxu0 %v1942_v4  ;;  %v1948_v13 = vld [vmem:[%s2718_s23 + $0x60] sm:$0xff]  ;;  %v1947_v17 = vld [vmem:[%s2718_s23 + $0x58] sm:$0xff]  ;;  %v1946_v21 = vld [vmem:[%s2718_s23 + $0x50] sm:$0xff] }
   0xe   :  { %382 = vmatpush.bf16.msra.mxu1 %v1950_v5  ;;  %v1956_v14 = vld [vmem:[%s2718_s23 + $0xa0] sm:$0xff]  ;;  %v1955_v18 = vld [vmem:[%s2718_s23 + $0x98] sm:$0xff]  ;;  %v1954_v22 = vld [vmem:[%s2718_s23 + $0x90] sm:$0xff] }
   0xf   :  { %401 = vmatpush.bf16.msra.mxu2 %v1958_v6  ;;  %v1964_v15 = vld [vmem:[%s2718_s23 + $0xe0] sm:$0xff]  ;;  %v1963_v19 = vld [vmem:[%s2718_s23 + $0xd8] sm:$0xff]  ;;  %v1962_v23 = vld [vmem:[%s2718_s23 + $0xd0] sm:$0xff] }
  0x10   :  { %420 = vmatpush.bf16.msra.mxu3 %v1966_v7  ;;  %v1937_v24 = vld [vmem:[%s2718_s23 + $0x8] sm:$0xff]  ;;  %v1936_v28 = vld [vmem:[%s2718_s23] sm:$0xff] }
  0x11   :  { %364 = vmatpush.bf16.msra.mxu0 %v1941_v8  ;;  %v1945_v25 = vld [vmem:[%s2718_s23 + $0x48] sm:$0xff]  ;;  %v1944_v29 = vld [vmem:[%s2718_s23 + $0x40] sm:$0xff] }
  0x12   :  { %383 = vmatpush.bf16.msra.mxu1 %v1949_v9  ;;  %v1953_v26 = vld [vmem:[%s2718_s23 + $0x88] sm:$0xff]  ;;  %v1952_v30 = vld [vmem:[%s2718_s23 + $0x80] sm:$0xff] }
  0x13   :  { %402 = vmatpush.bf16.msra.mxu2 %v1957_v10  ;;  %v1961_v27 = vld [vmem:[%s2718_s23 + $0xc8] sm:$0xff]  ;;  %v1960_v31 = vld [vmem:[%s2718_s23 + $0xc0] sm:$0xff] }
  0x14   :  { %421 = vmatpush.bf16.msra.mxu3 %v1965_v11 }
  0x15   :  { %365 = vmatpush.bf16.msra.mxu0 %v1940_v12 }
  0x16   :  { %384 = vmatpush.bf16.msra.mxu1 %v1948_v13 }
  0x17   :  { %403 = vmatpush.bf16.msra.mxu2 %v1956_v14 }
  0x18   :  { %422 = vmatpush.bf16.msra.mxu3 %v1964_v15 }
  0x19   :  { %366 = vmatpush.bf16.msra.mxu0 %v1939_v16 }
  0x1a   :  { %385 = vmatpush.bf16.msra.mxu1 %v1947_v17 }
  0x1b   :  { %404 = vmatpush.bf16.msra.mxu2 %v1955_v18 }
  0x1c   :  { %423 = vmatpush.bf16.msra.mxu3 %v1963_v19 }
  0x1d   :  { %367 = vmatpush.bf16.msra.mxu0 %v1938_v20 }
  0x1e   :  { %386 = vmatpush.bf16.msra.mxu1 %v1946_v21 }
  0x1f   :  { %405 = vmatpush.bf16.msra.mxu2 %v1954_v22 }
  0x20   :  { %424 = vmatpush.bf16.msra.mxu3 %v1962_v23 }
  0x21   :  { %368 = vmatpush.bf16.msra.mxu0 %v1937_v24 }
  0x22   :  { %387 = vmatpush.bf16.msra.mxu1 %v1945_v25 }
  0x23   :  { %406 = vmatpush.bf16.msra.mxu2 %v1953_v26 }
  0x24   :  { %425 = vmatpush.bf16.msra.mxu3 %v1961_v27 }
  0x25   :  { %369 = vmatpush.bf16.msra.mxu0 %v1936_v28 }
  0x26   :  { %388 = vmatpush.bf16.msra.mxu1 %v1944_v29  ;;  %v2074_v29 = vmov 64.0  }
  0x27   :  { %407 = vmatpush.bf16.msra.mxu2 %v1952_v30  ;;  %2016 = vrcp.f32 %v2074_v29  ;;  %v438_v29 = vld [vmem:[%s2705_s3] sm:$0x3] }
  0x28   :  { %426 = vmatpush.bf16.msra.mxu3 %v1960_v31  ;;  %370 = vmatmul.bf16.vlgmr.msra.gmra.mxu0 %v1577_v40 }
  0x29   :  { %389 = vmatmul.bf16.vlgmr.msra.gmra.mxu1 %v1581_v41 }
  0x2a   :  { %408 = vmatmul.bf16.vlgmr.msra.gmra.mxu2 %v1585_v42 }
  0x2b   :  { %427 = vmatmul.bf16.vlgmr.msra.gmra.mxu3 %v1589_v43 }
  0x2d   :  { %v2017_v30 = vpop.eup %2016 }
  0x2e   :  { %v453_v31 = vmul.f32 64.0, %v2017_v30  ;;  %vm457_vm1 = vweird.f32 %v2017_v30 }
  0x30   :  { %v454_v32 = vsub.f32 1.0, %v453_v31 }
  0x32   :  { %v455_v33 = vmul.f32 %v2017_v30, %v454_v32 }
  0x34   :  { %v456_v34 = vadd.f32 %v2017_v30, %v455_v33 }
  0x36   :  { %v2323_v35 = vsel %vm457_vm1, %v2017_v30, %v456_v34 }
  0x38   :  { %375 = vmatmul.bf16.gmra.mxu0 %v1593_v52 }
  0x39   :  { %394 = vmatmul.bf16.gmra.mxu1 %v1597_v53 }
  0x3a   :  { %413 = vmatmul.bf16.gmra.mxu2 %v1601_v54 }
  0x3b   :  { %432 = vmatmul.bf16.gmra.mxu3 %v1605_v55 }
  0xa5   :  { %v371_v57 = vpop.f32.mrf.mxu0 }
  0xa6   :  { %v390_v58 = vpop.f32.mrf.mxu1  ;;  %v372_v59 = vadd.f32 %v2013_v56, %v371_v57  ;;  %v1975_v57 = vld [vmem:[%s2703_s5 + $0x18] sm:$0xff] }
  0xa7   :  { %640 = vmatpush.bf16.msrb.mxu1 %v1975_v57 }
  0xa8   :  { %v391_v60 = vadd.f32 %v390_v58, %v372_v59  ;;  %v1979_v58 = vld [vmem:[%s2704_s6 + $0x18] sm:$0xff]  ;;  %v1970_v59 = vld [vmem:[%s2702_s4 + $0x10] sm:$0xff] }
  0xa9   :  { %691 = vmatpush.bf16.msrb.mxu2 %v1979_v58 }
  0xad   :  { %v409_v61 = vpop.f32.mrf.mxu2  ;;  %v373_v0 = vpop.f32.mrf.mxu0 }
  0xae   :  { %v428_v62 = vpop.f32.mrf.mxu3  ;;  %v410_v63 = vadd.f32 %v409_v61, %v391_v60  ;;  %v392_v1 = vpop.f32.mrf.mxu1  ;;  %v374_v3 = vadd.f32 %v2013_v56, %v373_v0  ;;  %v1974_v60 = vld [vmem:[%s2703_s5 + $0x10] sm:$0xff]  ;;  %v1977_v0 = vld [vmem:[%s2704_s6 + $0x8] sm:$0xff] }
  0xaf   :  { %v1978_v61 = vld [vmem:[%s2704_s6 + $0x10] sm:$0xff]  ;;  %641 = vmatpush.bf16.msrb.mxu1 %v1974_v60 }
  0xb0   :  { %v2307_v2 = vadd.f32 %v428_v62, %v410_v63  ;;  %v393_v5 = vadd.f32 %v392_v1, %v374_v3  ;;  %692 = vmatpush.bf16.msrb.mxu2 %v1978_v61  ;;  %v1969_v62 = vld [vmem:[%s2702_s4 + $0x8] sm:$0xff] }
  0xb1   :  { %v1973_v63 = vld [vmem:[%s2703_s5 + $0x8] sm:$0xff] }
  0xb2   :  { %v440_v4 = vsel %vm439_vm0, %v2307_v2, 0.0 }
  0xb3   :  { %441 = vadd.xlane.f32.xlu0 %v440_v4  ;;  %642 = vmatpush.bf16.msrb.mxu1 %v1973_v63  ;;  %v1968_v4 = vld [vmem:[%s2702_s4] sm:$0xff] }
  0xb4   :  { %693 = vmatpush.bf16.msrb.mxu2 %v1977_v0 }
  0xb5   :  { %v411_v6 = vpop.f32.mrf.mxu2  ;;  %v376_v9 = vpop.f32.mrf.mxu0 }
  0xb6   :  { %v430_v7 = vpop.f32.mrf.mxu3  ;;  %v412_v8 = vadd.f32 %v411_v6, %v393_v5  ;;  %v377_v10 = vadd.f32 %v2013_v56, %v376_v9  ;;  %v395_v12 = vpop.f32.mrf.mxu1  ;;  %v1972_v5 = vld [vmem:[%s2703_s5] sm:$0xff] }
  0xb7   :  { %v1976_v6 = vld [vmem:[%s2704_s6] sm:$0xff]  ;;  %643 = vmatpush.bf16.msrb.mxu1 %v1972_v5 }
  0xb8   :  { %v2311_v11 = vadd.f32 %v430_v7, %v412_v8  ;;  %v396_v13 = vadd.f32 %v395_v12, %v377_v10  ;;  %694 = vmatpush.bf16.msrb.mxu2 %v1976_v6 }
  0xba   :  { %v443_v14 = vsel %vm439_vm0, %v2311_v11, 0.0 }
  0xbb   :  { %444 = vadd.xlane.f32.xlu0 %v443_v14 }
  0xbd   :  { %v414_v15 = vpop.f32.mrf.mxu2  ;;  %v378_v18 = vpop.f32.mrf.mxu0 }
  0xbe   :  { %v433_v16 = vpop.f32.mrf.mxu3  ;;  %v415_v17 = vadd.f32 %v414_v15, %v396_v13  ;;  %v379_v20 = vadd.f32 %v2013_v56, %v378_v18  ;;  %v397_v22 = vpop.f32.mrf.mxu1  ;;  %v1971_v56 = vld [vmem:[%s2702_s4 + $0x18] sm:$0xff] }
  0xbf   :  { %589 = vmatpush.bf16.msrb.mxu0 %v1971_v56 }
  0xc0   :  { %v2315_v19 = vadd.f32 %v433_v16, %v415_v17  ;;  %v398_v23 = vadd.f32 %v397_v22, %v379_v20 }
  0xc2   :  { %v446_v21 = vsel %vm439_vm0, %v2315_v19, 0.0 }
  0xc3   :  { %447 = vadd.xlane.f32.xlu1 %v446_v21  ;;  %590 = vmatpush.bf16.msrb.mxu0 %v1970_v59 }
  0xc5   :  { %v416_v24 = vpop.f32.mrf.mxu2 }
  0xc6   :  { %v417_v25 = vadd.f32 %v416_v24, %v398_v23  ;;  %v435_v26 = vpop.f32.mrf.mxu3 }
  0xc7   :  { %591 = vmatpush.bf16.msrb.mxu0 %v1969_v62 }
  0xc8   :  { %v2319_v27 = vadd.f32 %v435_v26, %v417_v25 }
  0xca   :  { %v449_v28 = vsel %vm439_vm0, %v2319_v27, 0.0 }
  0xcb   :  { %450 = vadd.xlane.f32.xlu1 %v449_v28  ;;  %592 = vmatpush.bf16.msrb.mxu0 %v1968_v4 }
 0x126   :  { %v442_v36 = vpop.xlane.xlu0 %441 }
 0x127   :  { %v459_v37 = vmul.f32 %v2323_v35, %v442_v36  ;;  %v535_v36 = vperm.slane %v438_v29, 0 }
 0x129   :  { %v2327_v38 = vsub.f32 %v2307_v2, %v459_v37 }
 0x12b   :  { %v467_v39 = vmul.f32 %v2327_v38, %v2327_v38 }
 0x12d   :  { %v471_v40 = vsel %vm439_vm0, %v467_v39, 0.0 }
 0x12e   :  { %472 = vadd.xlane.f32.xlu2 %v471_v40  ;;  %v445_v41 = vpop.xlane.xlu0 %444 }
 0x12f   :  { %v460_v42 = vmul.f32 %v2323_v35, %v445_v41 }
 0x131   :  { %v2334_v43 = vsub.f32 %v2311_v11, %v460_v42 }
 0x133   :  { %v468_v44 = vmul.f32 %v2334_v43, %v2334_v43 }
 0x135   :  { %v474_v45 = vsel %vm439_vm0, %v468_v44, 0.0 }
 0x136   :  { %v448_v46 = vpop.xlane.xlu1 %447  ;;  %475 = vadd.xlane.f32.xlu2 %v474_v45  ;;  %v540_v45 = vperm.slane %v438_v29, 1 }
 0x137   :  { %v461_v47 = vmul.f32 %v2323_v35, %v448_v46 }
 0x139   :  { %v2341_v48 = vsub.f32 %v2315_v19, %v461_v47 }
 0x13b   :  { %v469_v49 = vmul.f32 %v2341_v48, %v2341_v48 }
 0x13d   :  { %v477_v50 = vsel %vm439_vm0, %v469_v49, 0.0 }
 0x13e   :  { %v451_v51 = vpop.xlane.xlu1 %450  ;;  %478 = vadd.xlane.f32.xlu0 %v477_v50 }
 0x13f   :  { %v462_v52 = vmul.f32 %v2323_v35, %v451_v51 }
 0x141   :  { %v2348_v53 = vsub.f32 %v2319_v27, %v462_v52 }
 0x143   :  { %v470_v54 = vmul.f32 %v2348_v53, %v2348_v53 }
 0x145   :  { %v480_v55 = vsel %vm439_vm0, %v470_v54, 0.0 }
 0x146   :  { %481 = vadd.xlane.f32.xlu1 %v480_v55 }
 0x1a1   :  { %v473_v1 = vpop.xlane.xlu2 %472 }
 0x1a2   :  { %v483_v3 = vmul.f32 %v473_v1, %v2323_v35 }
 0x1a4   :  { %v487_v7 = vadd.f32 1e-06, %v483_v3 }
 0x1a6   :  { %2018 = vrsqrt.f32 %v487_v7  ;;  %vm497_vm3 = vweird.f32 %v487_v7 }
 0x1a9   :  { %v476_v8 = vpop.xlane.xlu2 %475 }
 0x1aa   :  { %v484_v9 = vmul.f32 %v476_v8, %v2323_v35 }
 0x1ac   :  { %v2019_v10 = vpop.eup %2018  ;;  %v488_v12 = vadd.f32 1e-06, %v484_v9 }
 0x1ad   :  { %v492_v13 = vmul.f32 %v2019_v10, %v487_v7  ;;  %vm498_vm2 = vweird.f32 %v2019_v10 }
 0x1ae   :  { %2020 = vrsqrt.f32 %v488_v12  ;;  %vm499_vm4 = vmor %vm497_vm3, %vm498_vm2  ;;  %vm507_vm6 = vweird.f32 %v488_v12 }
 0x1af   :  { %v493_v14 = vmul.f32 %v2019_v10, %v492_v13 }
 0x1b1   :  { %v494_v15 = vmul.f32 0.5, %v493_v14  ;;  %v479_v16 = vpop.xlane.xlu0 %478 }
 0x1b2   :  { %v485_v17 = vmul.f32 %v479_v16, %v2323_v35 }
 0x1b3   :  { %v495_v18 = vsub.f32 1.5, %v494_v15 }
 0x1b4   :  { %v2021_v20 = vpop.eup %2020  ;;  %v489_v21 = vadd.f32 1e-06, %v485_v17 }
 0x1b5   :  { %v496_v22 = vmul.f32 %v2019_v10, %v495_v18  ;;  %v502_v23 = vmul.f32 %v2021_v20, %v488_v12  ;;  %vm508_vm5 = vweird.f32 %v2021_v20 }
 0x1b6   :  { %2022 = vrsqrt.f32 %v489_v21  ;;  %vm509_vm7 = vmor %vm507_vm6, %vm508_vm5  ;;  %vm517_vm9 = vweird.f32 %v489_v21 }
 0x1b7   :  { %v503_v24 = vmul.f32 %v2021_v20, %v502_v23  ;;  %v500_v25 = vsel %vm499_vm4, %v2019_v10, %v496_v22 }
 0x1b8   :  { %v531_v33 = vmul.f32 %v500_v25, %v2327_v38 }
 0x1b9   :  { %v504_v26 = vmul.f32 0.5, %v503_v24  ;;  %v482_v28 = vpop.xlane.xlu1 %481 }
 0x1ba   :  { %v486_v30 = vmul.f32 %v482_v28, %v2323_v35  ;;  %v536_v44 = vmul.f32 %v535_v36, %v531_v33 }
 0x1bb   :  { %v505_v31 = vsub.f32 1.5, %v504_v26 }
 0x1bc   :  { %v2023_v32 = vpop.eup %2022  ;;  %v490_v34 = vadd.f32 1e-06, %v486_v30  ;;  %v541_v51 = vadd.f32 %v540_v45, %v536_v44 }
 0x1bd   :  { %v506_v37 = vmul.f32 %v2021_v20, %v505_v31  ;;  %v512_v39 = vmul.f32 %v2023_v32, %v489_v21  ;;  %vm518_vm8 = vweird.f32 %v2023_v32 }
 0x1be   :  { %2024 = vrsqrt.f32 %v490_v34  ;;  %vm519_vm10 = vmor %vm517_vm9, %vm518_vm8  ;;  %vm527_vm12 = vweird.f32 %v490_v34 }
 0x1bf   :  { %v510_v40 = vsel %vm509_vm7, %v2021_v20, %v506_v37  ;;  %v513_v41 = vmul.f32 %v2023_v32, %v512_v39 }
 0x1c0   :  { %v532_v42 = vmul.f32 %v510_v40, %v2334_v43 }
 0x1c1   :  { %v514_v46 = vmul.f32 0.5, %v513_v41 }
 0x1c2   :  { %v537_v47 = vmul.f32 %v535_v36, %v532_v42 }
 0x1c3   :  { %v515_v49 = vsub.f32 1.5, %v514_v46 }
 0x1c4   :  { %v2025_v50 = vpop.eup %2024  ;;  %v542_v52 = vadd.f32 %v540_v45, %v537_v47 }
 0x1c5   :  { %v516_v38 = vmul.f32 %v2023_v32, %v515_v49  ;;  %v522_v54 = vmul.f32 %v2025_v50, %v490_v34  ;;  %vm528_vm11 = vweird.f32 %v2025_v50 }
 0x1c6   :  { %v553_v55 = vpack.c.bf16 %v542_v52, %v541_v51  ;;  %vm529_vm13 = vmor %vm527_vm12, %vm528_vm11 }
 0x1c7   :  { %v523_v56 = vmul.f32 %v2025_v50, %v522_v54  ;;  %v520_v43 = vsel %vm519_vm10, %v2023_v32, %v516_v38 }
 0x1c8   :  { %1750 = vmatmul.msk.bf16.vlgmr.msrb.gmra.mxu0 %vm439_vm0, %v553_v55  ;;  %1768 = vmatmul.msk.bf16.vlgmr.msrb.gmra.mxu1 %vm439_vm0, %v553_v55  ;;  %v533_v59 = vmul.f32 %v520_v43, %v2341_v48 }
 0x1c9   :  { %v524_v57 = vmul.f32 0.5, %v523_v56  ;;  %1786 = vmatmul.msk.bf16.vlgmr.msrb.gmra.mxu2 %vm439_vm0, %v553_v55 }
 0x1ca   :  { %v538_v63 = vmul.f32 %v535_v36, %v533_v59 }
 0x1cb   :  { %v525_v58 = vsub.f32 1.5, %v524_v57 }
 0x1cc   :  { %v543_v1 = vadd.f32 %v540_v45, %v538_v63 }
 0x1cd   :  { %v526_v60 = vmul.f32 %v2025_v50, %v525_v58 }
 0x1cf   :  { %v530_v61 = vsel %vm529_vm13, %v2025_v50, %v526_v60 }
 0x1d0   :  { %v534_v62 = vmul.f32 %v530_v61, %v2348_v53 }
 0x1d2   :  { %v539_v0 = vmul.f32 %v535_v36, %v534_v62 }
 0x1d4   :  { %v544_v3 = vadd.f32 %v540_v45, %v539_v0 }
 0x1d6   :  { %v554_v4 = vpack.c.bf16 %v544_v3, %v543_v1 }
 0x1d8   :  { %1751 = vmatmul.msk.bf16.gmra.mxu0 %vm439_vm0, %v554_v4  ;;  %1769 = vmatmul.msk.bf16.gmra.mxu1 %vm439_vm0, %v554_v4 }
 0x1d9   :  { %1787 = vmatmul.msk.bf16.gmra.mxu2 %vm439_vm0, %v554_v4 }
 0x245   :  { %v594_v5 = vpop.f32.mrf.mxu0  ;;  %v645_v6 = vpop.f32.mrf.mxu1 }
 0x246   :  { %v710_v48 = vpack.c.bf16 %v645_v6, %v645_v6  ;;  %v706_v16 = vpack.c.bf16 %v594_v5, %v594_v5 }
 0x248   :  { %v725_v12 = vunpack.c.l.b16 %v710_v48  ;;  %v720_v26 = vunpack.c.l.b16 %v706_v16 }
 0x24c   :  { %v696_v7 = vpop.f32.mrf.mxu2 }
 0x24d   :  { %v596_v8 = vpop.f32.mrf.mxu0  ;;  %v647_v9 = vpop.f32.mrf.mxu1  ;;  %v714_v15 = vpack.c.bf16 %v696_v7, %v696_v7 }
 0x24e   :  { %v711_v10 = vpack.c.bf16 %v647_v9, %v647_v9  ;;  %v707_v13 = vpack.c.bf16 %v596_v8, %v596_v8 }
 0x24f   :  { %v838_v24 = vunpack.c.l.b16 %v714_v15 }
 0x250   :  { %v726_v53 = vunpack.c.l.b16 %v711_v10  ;;  %v721_v23 = vunpack.c.l.b16 %v707_v13 }
 0x252   :  { %v727_v14 = vpack.c.b16 %v726_v53, %v725_v12  ;;  %v722_v29 = vpack.c.b16 %v721_v23, %v720_v26 }
 0x254   :  { %v698_v17 = vpop.f32.mrf.mxu2  ;;  %v732_v18 = vsel %vm439_vm0, %v727_v14, 0 }
 0x255   :  { %v715_v20 = vpack.c.bf16 %v698_v17, %v698_v17  ;;  %v599_v21 = vpop.f32.mrf.mxu0  ;;  %v650_v22 = vpop.f32.mrf.mxu1  ;;  %741 = vmatpush.bf16.xpose.msrb.mxu3 %v732_v18 }
 0x256   :  { %v712_v30 = vpack.c.bf16 %v650_v22, %v650_v22  ;;  %v708_v42 = vpack.c.bf16 %v599_v21, %v599_v21 }
 0x257   :  { %v839_v25 = vunpack.c.l.b16 %v715_v20 }
 0x258   :  { %v755_v36 = vunpack.c.l.b16 %v712_v30  ;;  %v750_v51 = vunpack.c.l.b16 %v708_v42 }
 0x259   :  { %v840_v28 = vpack.c.b16 %v839_v25, %v838_v24  ;;  %v1983_v24 = vld [vmem:[%s2706_s7 + $0x18] sm:$0xff] }
 0x25a   :  { %931 = vmatpush.bf16.msra.mxu2 %v1983_v24  ;;  %v1991_v24 = vld [vmem:[%s2707_s9 + $0x34] sm:$0xf0] }
 0x25b   :  { %852 = vmatpush.bf16.msra.mxu0 %v840_v28 }
 0x25c   :  { %v701_v31 = vpop.f32.mrf.mxu2  ;;  %1788 = vmatmul.msk.bf16.vlgmr.msrb.gmra.mxu3 %vm439_vm0, %v722_v29 }
 0x25d   :  { %v652_v32 = vpop.f32.mrf.mxu1  ;;  %v601_v34 = vpop.f32.mrf.mxu0  ;;  %v716_v41 = vpack.c.bf16 %v701_v31, %v701_v31 }
 0x25e   :  { %v713_v33 = vpack.c.bf16 %v652_v32, %v652_v32  ;;  %v709_v39 = vpack.c.bf16 %v601_v34, %v601_v34 }
 0x25f   :  { %v866_v49 = vunpack.c.l.b16 %v716_v41 }
 0x260   :  { %v756_v37 = vunpack.c.l.b16 %v713_v33  ;;  %v751_v47 = vunpack.c.l.b16 %v709_v39 }
 0x262   :  { %v757_v40 = vpack.c.b16 %v756_v37, %v755_v36  ;;  %v752_v38 = vpack.c.b16 %v751_v47, %v750_v51  ;;  %v1981_v51 = vld [vmem:[%s2706_s7 + $0x8] sm:$0xff] }
 0x264   :  { %v703_v44 = vpop.f32.mrf.mxu2  ;;  %v762_v45 = vsel %vm439_vm0, %v757_v40, 0 }
 0x265   :  { %v717_v46 = vpack.c.bf16 %v703_v44, %v703_v44  ;;  %771 = vmatpush.bf16.xpose.msra.mxu3 %v762_v45 }
 0x267   :  { %v867_v50 = vunpack.c.l.b16 %v717_v46 }
 0x269   :  { %v868_v52 = vpack.c.b16 %v867_v50, %v866_v49  ;;  %v1982_v50 = vld [vmem:[%s2706_s7 + $0x10] sm:$0xff] }
 0x26a   :  { %932 = vmatpush.bf16.msra.mxu2 %v1982_v50  ;;  %v1984_v50 = vld [vmem:[%s2707_s9 + $0x4] sm:$0xf] }
 0x26b   :  { %880 = vmatpush.bf16.msra.mxu1 %v868_v52  ;;  %v1980_v52 = vld [vmem:[%s2706_s7] sm:$0xff] }
 0x26c   :  { %1789 = vmatmul.msk.bf16.vlgmr.msra.gmra.mxu3 %vm439_vm0, %v752_v38 }
 0x26e   :  { %933 = vmatpush.bf16.msra.mxu2 %v1981_v51 }
 0x272   :  { %934 = vmatpush.bf16.msra.mxu2 %v1980_v52 }
 0x2df   :  { %v743_v54 = vpop.f32.mrf.mxu3 }
 0x2e0   :  { %v778_v55 = vmul.f32 0.125, %v743_v54 }
 0x2e2   :  { %v783_v56 = vsel %vm782_vm14, %v778_v55, -inf }
 0x2e3   :  { %784 = vmax.xlane.f32.xlu2 %v783_v56 }
 0x2e7   :  { %v745_v43 = vpop.f32.mrf.mxu3 }
 0x2e8   :  { %v779_v57 = vmul.f32 0.125, %v745_v43 }
 0x2ea   :  { %v786_v58 = vsel %vm782_vm14, %v779_v57, -inf }
 0x2eb   :  { %787 = vmax.xlane.f32.xlu0 %v786_v58 }
 0x2ef   :  { %v773_v59 = vpop.f32.mrf.mxu3 }
 0x2f0   :  { %v780_v60 = vmul.f32 0.125, %v773_v59 }
 0x2f2   :  { %v789_v61 = vsel %vm782_vm14, %v780_v60, -inf }
 0x2f3   :  { %790 = vmax.xlane.f32.xlu1 %v789_v61 }
 0x2f7   :  { %v775_v62 = vpop.f32.mrf.mxu3 }
 0x2f8   :  { %v781_v63 = vmul.f32 0.125, %v775_v62 }
 0x2fa   :  { %v792_v0 = vsel %vm782_vm14, %v781_v63, -inf }
 0x2fb   :  { %793 = vmax.xlane.f32.xlu2 %v792_v0 }
 0x356   :  { %v785_v1 = vpop.xlane.xlu2 %784 }
 0x357   :  { %v795_v3 = vsub.f32 %v778_v55, %v785_v1 }
 0x359   :  { %v799_v4 = vmul.f32 1.442695, %v795_v3 }
 0x35b   :  { %2026 = vpow2.f32 %v799_v4 }
 0x35e   :  { %v788_v5 = vpop.xlane.xlu0 %787 }
 0x35f   :  { %v796_v6 = vsub.f32 %v779_v57, %v788_v5 }
 0x361   :  { %v2027_v48 = vpop.eup %2026  ;;  %v801_v7 = vmul.f32 1.442695, %v796_v6 }
 0x362   :  { %v807_v8 = vsel %vm782_vm14, %v2027_v48, 0.0 }
 0x363   :  { %2028 = vpow2.f32 %v801_v7  ;;  %808 = vadd.xlane.f32.xlu0 %v807_v8 }
 0x366   :  { %v791_v9 = vpop.xlane.xlu1 %790 }
 0x367   :  { %v797_v10 = vsub.f32 %v780_v60, %v791_v9 }
 0x369   :  { %v2029_v12 = vpop.eup %2028  ;;  %v803_v53 = vmul.f32 1.442695, %v797_v10 }
 0x36a   :  { %v810_v13 = vsel %vm782_vm14, %v2029_v12, 0.0 }
 0x36b   :  { %2030 = vpow2.f32 %v803_v53  ;;  %811 = vadd.xlane.f32.xlu1 %v810_v13 }
 0x36e   :  { %v794_v14 = vpop.xlane.xlu2 %793 }
 0x36f   :  { %v798_v15 = vsub.f32 %v781_v63, %v794_v14 }
 0x371   :  { %v2031_v16 = vpop.eup %2030  ;;  %v805_v17 = vmul.f32 1.442695, %v798_v15 }
 0x372   :  { %v813_v18 = vsel %vm782_vm14, %v2031_v16, 0.0 }
 0x373   :  { %2032 = vpow2.f32 %v805_v17  ;;  %814 = vadd.xlane.f32.xlu2 %v813_v18 }
 0x379   :  { %v2033_v20 = vpop.eup %2032 }
 0x37a   :  { %v816_v21 = vsel %vm782_vm14, %v2033_v20, 0.0 }
 0x37b   :  { %817 = vadd.xlane.f32.xlu0 %v816_v21 }
 0x3d6   :  { %v809_v22 = vpop.xlane.xlu0 %808 }
 0x3d7   :  { %2034 = vrcp.f32 %v809_v22 }
 0x3dd   :  { %v2035_v25 = vpop.eup %2034 }
 0x3de   :  { %v812_v23 = vpop.xlane.xlu1 %811  ;;  %v823_v26 = vmul.f32 %v2035_v25, %v2027_v48  ;;  %v1990_v25 = vld [vmem:[%s2707_s9 + $0x34] sm:$0xf] }
 0x3df   :  { %2036 = vrcp.f32 %v812_v23  ;;  %v1836_v23 = vld [vmem:[%s2707_s9 + $0x30] sm:$0xf] }
 0x3e0   :  { %v827_v29 = vpack.c.bf16 %v823_v26, %v823_v26  ;;  %v1837_v26 = vor.u32 %v1991_v24, %v1836_v23 }
 0x3e2   :  { %v833_v33 = vunpack.c.l.b16 %v827_v29  ;;  %1115 = vmatpush.bf16.msrb.mxu3 %v1837_v26 }
 0x3e5   :  { %v2037_v28 = vpop.eup %2036 }
 0x3e6   :  { %v824_v30 = vmul.f32 %v2037_v28, %v2029_v12  ;;  %v815_v31 = vpop.xlane.xlu2 %814  ;;  %v1838_v28 = vld [vmem:[%s2707_s9 + $0x38] sm:$0xf0] }
 0x3e7   :  { %2038 = vrcp.f32 %v815_v31  ;;  %v1841_v29 = vor.u32 %v1990_v25, %v1838_v28  ;;  %v1989_v31 = vld [vmem:[%s2707_s9 + $0x24] sm:$0xf0] }
 0x3e8   :  { %v828_v32 = vpack.c.bf16 %v824_v30, %v824_v30  ;;  %v1828_v30 = vld [vmem:[%s2707_s9 + $0x20] sm:$0xf] }
 0x3e9   :  { %1134 = vmatpush.bf16.msrb.mxu0 %v1841_v29 }
 0x3ea   :  { %v834_v34 = vunpack.c.l.b16 %v828_v32  ;;  %v1988_v32 = vld [vmem:[%s2707_s9 + $0x24] sm:$0xf] }
 0x3ec   :  { %v835_v36 = vpack.c.b16 %v834_v34, %v833_v33  ;;  %v1829_v33 = vor.u32 %v1989_v31, %v1828_v30  ;;  %v1830_v34 = vld [vmem:[%s2707_s9 + $0x28] sm:$0xf0] }
 0x3ed   :  { %v2039_v39 = vpop.eup %2038 }
 0x3ee   :  { %1790 = vmatmul.msk.bf16.vlgmr.msra.gmra.mxu0 %vm782_vm14, %v835_v36  ;;  %v818_v37 = vpop.xlane.xlu0 %817  ;;  %v825_v40 = vmul.f32 %v2039_v39, %v2031_v16  ;;  %v1833_v36 = vor.u32 %v1988_v32, %v1830_v34  ;;  %1116 = vmatpush.bf16.msrb.mxu3 %v1829_v33  ;;  %v1987_v39 = vld [vmem:[%s2707_s9 + $0x14] sm:$0xf0] }
 0x3ef   :  { %2040 = vrcp.f32 %v818_v37  ;;  %v1820_v37 = vld [vmem:[%s2707_s9 + $0x10] sm:$0xf] }
 0x3f0   :  { %v829_v42 = vpack.c.bf16 %v825_v40, %v825_v40  ;;  %1135 = vmatpush.bf16.msrb.mxu0 %v1833_v36  ;;  %v1986_v40 = vld [vmem:[%s2707_s9 + $0x14] sm:$0xf] }
 0x3f2   :  { %v861_v46 = vunpack.c.l.b16 %v829_v42  ;;  %v1822_v42 = vld [vmem:[%s2707_s9 + $0x18] sm:$0xf0] }
 0x3f5   :  { %v2041_v41 = vpop.eup %2040 }
 0x3f6   :  { %v826_v44 = vmul.f32 %v2041_v41, %v2033_v20  ;;  %v1821_v41 = vor.u32 %v1987_v39, %v1820_v37 }
 0x3f8   :  { %v830_v45 = vpack.c.bf16 %v826_v44, %v826_v44  ;;  %1117 = vmatpush.bf16.msrb.mxu3 %v1821_v41 }
 0x3fa   :  { %v862_v47 = vunpack.c.l.b16 %v830_v45  ;;  %v1825_v45 = vor.u32 %v1986_v40, %v1822_v42 }
 0x3fc   :  { %v863_v49 = vpack.c.b16 %v862_v47, %v861_v46  ;;  %1136 = vmatpush.bf16.msrb.mxu0 %v1825_v45  ;;  %v1812_v47 = vld [vmem:[%s2707_s9] sm:$0xf] }
 0x3fe   :  { %1791 = vmatmul.msk.bf16.vlgmr.msra.gmra.mxu1 %vm782_vm14, %v863_v49  ;;  %v1985_v49 = vld [vmem:[%s2707_s9 + $0x4] sm:$0xf0] }
 0x3ff   :  { %v1813_v52 = vor.u32 %v1985_v49, %v1812_v47 }
 0x401   :  { %1118 = vmatpush.bf16.msrb.mxu3 %v1813_v52  ;;  %v2007_v52 = vld [vmem:[%s2709_s11 + $0x78] sm:$0xff] }
 0x402   :  { %1372 = vmatpush.bf16.msrb.mxu2 %v2007_v52 }
 0x46b   :  { %v854_v38 = vpop.f32.mrf.mxu0 }
 0x473   :  { %v856_v54 = vpop.f32.mrf.mxu0 }
 0x474   :  { %v895_v55 = vpack.c.bf16 %v856_v54, %v854_v38  ;;  %v1814_v38 = vld [vmem:[%s2707_s9 + $0x8] sm:$0xf0] }
 0x475   :  { %v1817_v54 = vor.u32 %v1984_v50, %v1814_v38  ;;  %v2005_v38 = vld [vmem:[%s2709_s11 + $0x68] sm:$0xff] }
 0x476   :  { %1808 = vmatmul.msk.bf16.vlgmr.msra.gmra.mxu2 %vm439_vm0, %v895_v55 }
 0x477   :  { %1137 = vmatpush.bf16.msrb.mxu0 %v1817_v54  ;;  %v1998_v54 = vld [vmem:[%s2709_s11 + $0x30] sm:$0xff] }
 0x47b   :  { %v882_v56 = vpop.f32.mrf.mxu1 }
 0x483   :  { %v884_v43 = vpop.f32.mrf.mxu1 }
 0x484   :  { %v896_v57 = vpack.c.bf16 %v884_v43, %v882_v56 }
 0x486   :  { %1809 = vmatmul.msk.bf16.gmra.mxu2 %vm439_vm0, %v896_v57 }
 0x4f9   :  { %v936_v58 = vpop.f32.mrf.mxu2 }
 0x4fa   :  { %v2435_v59 = vadd.f32 %v936_v58, %v2307_v2 }
 0x4fc   :  { %v951_v60 = vsel %vm439_vm0, %v2435_v59, 0.0 }
 0x4fd   :  { %952 = vadd.xlane.f32.xlu1 %v951_v60 }
 0x501   :  { %v938_v61 = vpop.f32.mrf.mxu2 }
 0x502   :  { %v2440_v62 = vadd.f32 %v938_v61, %v2311_v11 }
 0x504   :  { %v954_v63 = vsel %vm439_vm0, %v2440_v62, 0.0 }
 0x505   :  { %955 = vadd.xlane.f32.xlu2 %v954_v63 }
 0x509   :  { %v941_v0 = vpop.f32.mrf.mxu2 }
 0x50a   :  { %v2445_v1 = vadd.f32 %v941_v0, %v2315_v19 }
 0x50c   :  { %v957_v2 = vsel %vm439_vm0, %v2445_v1, 0.0 }
 0x50d   :  { %958 = vadd.xlane.f32.xlu0 %v957_v2 }
 0x511   :  { %v943_v3 = vpop.f32.mrf.mxu2 }
 0x512   :  { %v2450_v4 = vadd.f32 %v943_v3, %v2319_v27 }
 0x514   :  { %v960_v11 = vsel %vm439_vm0, %v2450_v4, 0.0 }
 0x515   :  { %961 = vadd.xlane.f32.xlu1 %v960_v11 }
 0x570   :  { %v953_v5 = vpop.xlane.xlu1 %952 }
 0x571   :  { %v963_v6 = vmul.f32 %v953_v5, %v2323_v35 }
 0x573   :  { %v2456_v48 = vsub.f32 %v2435_v59, %v963_v6 }
 0x575   :  { %v971_v19 = vmul.f32 %v2456_v48, %v2456_v48 }
 0x577   :  { %v975_v7 = vsel %vm439_vm0, %v971_v19, 0.0 }
 0x578   :  { %976 = vadd.xlane.f32.xlu2 %v975_v7  ;;  %v956_v8 = vpop.xlane.xlu2 %955  ;;  %v950_v7 = vld [vmem:[%s2708_s8] sm:$0x3] }
 0x579   :  { %v964_v27 = vmul.f32 %v956_v8, %v2323_v35  ;;  %v1044_v24 = vperm.slane %v950_v7, 1 }
 0x57b   :  { %v2463_v9 = vsub.f32 %v2440_v62, %v964_v27 }
 0x57d   :  { %v972_v10 = vmul.f32 %v2463_v9, %v2463_v9 }
 0x57f   :  { %v978_v12 = vsel %vm439_vm0, %v972_v10, 0.0 }
 0x580   :  { %979 = vadd.xlane.f32.xlu0 %v978_v12  ;;  %v959_v53 = vpop.xlane.xlu0 %958 }
 0x581   :  { %v965_v13 = vmul.f32 %v959_v53, %v2323_v35 }
 0x583   :  { %v2470_v14 = vsub.f32 %v2445_v1, %v965_v13 }
 0x585   :  { %v973_v15 = vmul.f32 %v2470_v14, %v2470_v14 }
 0x587   :  { %v981_v16 = vsel %vm439_vm0, %v973_v15, 0.0  ;;  %v1039_v15 = vperm.slane %v950_v7, 0 }
 0x588   :  { %982 = vadd.xlane.f32.xlu1 %v981_v16  ;;  %v962_v17 = vpop.xlane.xlu1 %961 }
 0x589   :  { %v966_v18 = vmul.f32 %v962_v17, %v2323_v35 }
 0x58b   :  { %v2477_v20 = vsub.f32 %v2450_v4, %v966_v18 }
 0x58d   :  { %v974_v21 = vmul.f32 %v2477_v20, %v2477_v20 }
 0x58f   :  { %v984_v22 = vsel %vm439_vm0, %v974_v21, 0.0 }
 0x590   :  { %985 = vadd.xlane.f32.xlu2 %v984_v22 }
 0x5eb   :  { %v977_v44 = vpop.xlane.xlu2 %976 }
 0x5ec   :  { %v987_v46 = vmul.f32 %v977_v44, %v2323_v35 }
 0x5ee   :  { %v991_v51 = vadd.f32 1e-06, %v987_v46 }
 0x5f0   :  { %2042 = vrsqrt.f32 %v991_v51  ;;  %vm1001_vm1 = vweird.f32 %v991_v51 }
 0x5f3   :  { %v980_v55 = vpop.xlane.xlu0 %979 }
 0x5f4   :  { %v988_v56 = vmul.f32 %v980_v55, %v2323_v35  ;;  %v2004_v55 = vld [vmem:[%s2709_s11 + $0x60] sm:$0xff] }
 0x5f6   :  { %v2043_v43 = vpop.eup %2042  ;;  %v992_v57 = vadd.f32 1e-06, %v988_v56  ;;  %v1997_v56 = vld [vmem:[%s2709_s11 + $0x28] sm:$0xff] }
 0x5f7   :  { %v996_v58 = vmul.f32 %v2043_v43, %v991_v51  ;;  %vm1002_vm15 = vweird.f32 %v2043_v43 }
 0x5f8   :  { %2044 = vrsqrt.f32 %v992_v57  ;;  %vm1003_vm2 = vmor %vm1001_vm1, %vm1002_vm15  ;;  %vm1011_vm4 = vweird.f32 %v992_v57 }
 0x5f9   :  { %v997_v60 = vmul.f32 %v2043_v43, %v996_v58  ;;  %v2002_v58 = vld [vmem:[%s2709_s11 + $0x50] sm:$0xff] }
 0x5fb   :  { %v998_v61 = vmul.f32 0.5, %v997_v60  ;;  %v983_v63 = vpop.xlane.xlu1 %982  ;;  %v1059_v60 = vld [vmem:[%s2710_s10] sm:$0x3] }
 0x5fc   :  { %v989_v0 = vmul.f32 %v983_v63, %v2323_v35  ;;  %v2001_v63 = vld [vmem:[%s2709_s11 + $0x48] sm:$0xff]  ;;  %v1061_v7 = vperm.slane %v1059_v60, 0 }
 0x5fd   :  { %v999_v2 = vsub.f32 1.5, %v998_v61  ;;  %v1995_v61 = vld [vmem:[%s2709_s11 + $0x18] sm:$0xff] }
 0x5fe   :  { %v2045_v3 = vpop.eup %2044  ;;  %v993_v11 = vadd.f32 1e-06, %v989_v0  ;;  %v1062_v0 = vperm.slane %v1059_v60, 1 }
 0x5ff   :  { %v1000_v5 = vmul.f32 %v2043_v43, %v999_v2  ;;  %v1006_v6 = vmul.f32 %v2045_v3, %v992_v57  ;;  %vm1012_vm3 = vweird.f32 %v2045_v3  ;;  %v1996_v57 = vld [vmem:[%s2709_s11 + $0x20] sm:$0xff]  ;;  %v1994_v2 = vld [vmem:[%s2709_s11 + $0x10] sm:$0xff] }
 0x600   :  { %2046 = vrsqrt.f32 %v993_v11  ;;  %vm1013_vm5 = vmor %vm1011_vm4, %vm1012_vm3  ;;  %vm1021_vm7 = vweird.f32 %v993_v11 }
 0x601   :  { %v1007_v19 = vmul.f32 %v2045_v3, %v1006_v6  ;;  %v1004_v8 = vsel %vm1003_vm2, %v2043_v43, %v1000_v5  ;;  %v2003_v43 = vld [vmem:[%s2709_s11 + $0x58] sm:$0xff]  ;;  %v1993_v6 = vld [vmem:[%s2709_s11 + $0x8] sm:$0xff] }
 0x602   :  { %v1035_v16 = vmul.f32 %v1004_v8, %v2456_v48 }
 0x603   :  { %v1008_v27 = vmul.f32 0.5, %v1007_v19  ;;  %v986_v10 = vpop.xlane.xlu2 %985 }
 0x604   :  { %v990_v12 = vmul.f32 %v986_v10, %v2323_v35  ;;  %v1040_v25 = vmul.f32 %v1039_v15, %v1035_v16  ;;  %v1992_v10 = vld [vmem:[%s2709_s11] sm:$0xff] }
 0x605   :  { %v1009_v53 = vsub.f32 1.5, %v1008_v27 }
 0x606   :  { %v2047_v13 = vpop.eup %2046  ;;  %v994_v17 = vadd.f32 1e-06, %v990_v12  ;;  %v1045_v32 = vadd.f32 %v1044_v24, %v1040_v25 }
 0x607   :  { %v1010_v18 = vmul.f32 %v2045_v3, %v1009_v53  ;;  %v1016_v21 = vmul.f32 %v2047_v13, %v993_v11  ;;  %vm1022_vm6 = vweird.f32 %v2047_v13  ;;  %v2000_v11 = vld [vmem:[%s2709_s11 + $0x40] sm:$0xff] }
 0x608   :  { %2048 = vrsqrt.f32 %v994_v17  ;;  %vm1023_vm8 = vmor %vm1021_vm7, %vm1022_vm6  ;;  %vm1031_vm10 = vweird.f32 %v994_v17 }
 0x609   :  { %v1014_v22 = vsel %vm1013_vm5, %v2045_v3, %v1010_v18  ;;  %v1017_v23 = vmul.f32 %v2047_v13, %v1016_v21 }
 0x60a   :  { %v1036_v26 = vmul.f32 %v1014_v22, %v2463_v9 }
 0x60b   :  { %v1018_v28 = vmul.f32 0.5, %v1017_v23 }
 0x60c   :  { %v1041_v29 = vmul.f32 %v1039_v15, %v1036_v26 }
 0x60d   :  { %v1019_v30 = vsub.f32 1.5, %v1018_v28 }
 0x60e   :  { %v2049_v31 = vpop.eup %2048  ;;  %v1046_v33 = vadd.f32 %v1044_v24, %v1041_v29 }
 0x60f   :  { %v1020_v34 = vmul.f32 %v2047_v13, %v1019_v30  ;;  %v1026_v48 = vmul.f32 %v2049_v31, %v994_v17  ;;  %vm1032_vm9 = vweird.f32 %v2049_v31 }
 0x610   :  { %v1057_v36 = vpack.c.bf16 %v1046_v33, %v1045_v32  ;;  %vm1033_vm11 = vmor %vm1031_vm10, %vm1032_vm9  ;;  %vm1565_vm9 = vcmask 56320  }
 0x611   :  { %v1027_v37 = vmul.f32 %v2049_v31, %v1026_v48  ;;  %v1024_v39 = vsel %vm1023_vm8, %v2047_v13, %v1020_v34 }
 0x612   :  { %1842 = vmatmul.msk.bf16.vlgmr.msrb.gmra.mxu3 %vm439_vm0, %v1057_v36  ;;  %1844 = vmatmul.msk.bf16.vlgmr.msrb.gmra.mxu0 %vm439_vm0, %v1057_v36  ;;  %v1037_v41 = vmul.f32 %v1024_v39, %v2470_v14  ;;  %v2006_v14 = vld [vmem:[%s2709_s11 + $0x70] sm:$0xff] }
 0x613   :  { %v1028_v40 = vmul.f32 0.5, %v1027_v37  ;;  %1373 = vmatpush.bf16.msrb.mxu2 %v2006_v14 }
 0x614   :  { %v1042_v46 = vmul.f32 %v1039_v15, %v1037_v41 }
 0x615   :  { %v1029_v9 = vsub.f32 1.5, %v1028_v40 }
 0x616   :  { %v1047_v49 = vadd.f32 %v1044_v24, %v1042_v46 }
 0x617   :  { %v1030_v42 = vmul.f32 %v2049_v31, %v1029_v9  ;;  %1374 = vmatpush.bf16.msrb.mxu2 %v2005_v38 }
 0x619   :  { %v1034_v44 = vsel %vm1033_vm11, %v2049_v31, %v1030_v42 }
 0x61a   :  { %v1038_v45 = vmul.f32 %v1034_v44, %v2477_v20  ;;  %v1999_v20 = vld [vmem:[%s2709_s11 + $0x38] sm:$0xff] }
 0x61b   :  { %1353 = vmatpush.bf16.msrb.mxu1 %v1999_v20  ;;  %1375 = vmatpush.bf16.msrb.mxu2 %v2004_v55 }
 0x61c   :  { %v1043_v47 = vmul.f32 %v1039_v15, %v1038_v45 }
 0x61e   :  { %v1048_v50 = vadd.f32 %v1044_v24, %v1043_v47 }
 0x61f   :  { %1354 = vmatpush.bf16.msrb.mxu1 %v1998_v54  ;;  %1376 = vmatpush.bf16.msrb.mxu2 %v2003_v43 }
 0x620   :  { %v1058_v51 = vpack.c.bf16 %v1048_v50, %v1047_v49 }
 0x622   :  { %1843 = vmatmul.msk.bf16.gmra.mxu3 %vm439_vm0, %v1058_v51  ;;  %1845 = vmatmul.msk.bf16.gmra.mxu0 %vm439_vm0, %v1058_v51 }
 0x623   :  { %1355 = vmatpush.bf16.msrb.mxu1 %v1997_v56  ;;  %1377 = vmatpush.bf16.msrb.mxu2 %v2002_v58 }
 0x627   :  { %1356 = vmatpush.bf16.msrb.mxu1 %v1996_v57  ;;  %1378 = vmatpush.bf16.msrb.mxu2 %v2001_v63 }
 0x62b   :  { %1357 = vmatpush.bf16.msrb.mxu1 %v1995_v61  ;;  %1379 = vmatpush.bf16.msrb.mxu2 %v2000_v11 }
 0x62f   :  { %1358 = vmatpush.bf16.msrb.mxu1 %v1994_v2 }
 0x633   :  { %1359 = vmatpush.bf16.msrb.mxu1 %v1993_v6 }
 0x637   :  { %1360 = vmatpush.bf16.msrb.mxu1 %v1992_v10 }
 0x68f   :  { %v1139_v3 = vpop.f32.mrf.mxu0 }
 0x690   :  { %v2590_v5 = vadd.f32 %v1139_v3, %v1062_v0 }
 0x692   :  { %v1150_v19 = vmul.f32 %v2590_v5, %v2590_v5 }
 0x694   :  { %v1158_v8 = vmul.f32 %v1150_v19, %v2590_v5 }
 0x695   :  { %v1120_v27 = vpop.f32.mrf.mxu3 }
 0x696   :  { %v1166_v12 = vmul.f32 0.044715, %v1158_v8  ;;  %v2601_v53 = vadd.f32 %v1120_v27, %v1061_v7 }
 0x697   :  { %v1141_v13 = vpop.f32.mrf.mxu0 }
 0x698   :  { %v1174_v15 = vadd.f32 %v1166_v12, %v2590_v5  ;;  %v1149_v16 = vmul.f32 %v2601_v53, %v2601_v53  ;;  %v1142_v17 = vadd.f32 %v1141_v13, %v1062_v0 }
 0x69a   :  { %v1182_v18 = vmul.f32 0.7978846, %v1174_v15  ;;  %v1157_v21 = vmul.f32 %v1149_v16, %v2601_v53  ;;  %v1152_v22 = vmul.f32 %v1142_v17, %v1142_v17 }
 0x69c   :  { %v1165_v23 = vmul.f32 0.044715, %v1157_v21  ;;  %v1160_v24 = vmul.f32 %v1152_v22, %v1142_v17  ;;  %2050 = vtanh.f32 %v1182_v18 }
 0x69d   :  { %v1122_v25 = vpop.f32.mrf.mxu3 }
 0x69e   :  { %v1173_v26 = vadd.f32 %v1165_v23, %v2601_v53  ;;  %v1168_v28 = vmul.f32 0.044715, %v1160_v24  ;;  %v1123_v29 = vadd.f32 %v1122_v25, %v1061_v7 }
 0x69f   :  { %v1144_v30 = vpop.f32.mrf.mxu0 }
 0x6a0   :  { %v1181_v31 = vmul.f32 0.7978846, %v1173_v26  ;;  %v1176_v32 = vadd.f32 %v1168_v28, %v1142_v17  ;;  %v1151_v33 = vmul.f32 %v1123_v29, %v1123_v29  ;;  %v2608_v34 = vadd.f32 %v1144_v30, %v1062_v0 }
 0x6a2   :  { %v1184_v48 = vmul.f32 0.7978846, %v1176_v32  ;;  %v1159_v36 = vmul.f32 %v1151_v33, %v1123_v29  ;;  %v1154_v37 = vmul.f32 %v2608_v34, %v2608_v34  ;;  %2052 = vtanh.f32 %v1181_v31  ;;  %v2051_v39 = vpop.eup %2050 }
 0x6a3   :  { %v1198_v46 = vadd.f32 1.0, %v2051_v39 }
 0x6a4   :  { %2054 = vtanh.f32 %v1184_v48  ;;  %v1167_v40 = vmul.f32 0.044715, %v1159_v36  ;;  %v1162_v9 = vmul.f32 %v1154_v37, %v2608_v34 }
 0x6a5   :  { %v1125_v41 = vpop.f32.mrf.mxu3  ;;  %v1206_v56 = vmul.f32 0.5, %v1198_v46 }
 0x6a6   :  { %v1175_v42 = vadd.f32 %v1167_v40, %v1123_v29  ;;  %v1170_v44 = vmul.f32 0.044715, %v1162_v9  ;;  %v2613_v45 = vadd.f32 %v1125_v41, %v1061_v7 }
 0x6a7   :  { %v1146_v47 = vpop.f32.mrf.mxu0 }
 0x6a8   :  { %v1183_v49 = vmul.f32 0.7978846, %v1175_v42  ;;  %v1178_v50 = vadd.f32 %v1170_v44, %v2608_v34  ;;  %v1153_v51 = vmul.f32 %v2613_v45, %v2613_v45  ;;  %v1147_v52 = vadd.f32 %v1146_v47, %v1062_v0  ;;  %v2053_v14 = vpop.eup %2052 }
 0x6a9   :  { %v1197_v60 = vadd.f32 1.0, %v2053_v14  ;;  %v1214_v0 = vmul.f32 %v1206_v56, %v2590_v5 }
 0x6aa   :  { %v2055_v20 = vpop.eup %2054  ;;  %2056 = vtanh.f32 %v1183_v49  ;;  %v1161_v38 = vmul.f32 %v1153_v51, %v2613_v45  ;;  %v1156_v54 = vmul.f32 %v1147_v52, %v1147_v52  ;;  %v1186_v55 = vmul.f32 0.7978846, %v1178_v50  ;;  %v2014_v50 = vld [vmem:[%s2711_s12] ss:$0 sm:$0xff] }
 0x6ab   :  { %v1200_v43 = vadd.f32 1.0, %v2055_v20  ;;  %v1205_v12 = vmul.f32 0.5, %v1197_v60 }
 0x6ac   :  { %v1169_v57 = vmul.f32 0.044715, %v1161_v38  ;;  %v1164_v58 = vmul.f32 %v1156_v54, %v1147_v52  ;;  %2058 = vtanh.f32 %v1186_v55 }
 0x6ad   :  { %v1208_v61 = vmul.f32 0.5, %v1200_v43  ;;  %v1127_v63 = vpop.f32.mrf.mxu3 }
 0x6ae   :  { %v1177_v2 = vadd.f32 %v1169_v57, %v2613_v45  ;;  %v1172_v3 = vmul.f32 0.044715, %v1164_v58  ;;  %v1128_v11 = vadd.f32 %v1127_v63, %v1061_v7  ;;  %v1213_v7 = vmul.f32 %v1205_v12, %v2601_v53 }
 0x6af   :  { %v1216_v6 = vmul.f32 %v1208_v61, %v1142_v17 }
 0x6b0   :  { %v2057_v19 = vpop.eup %2056  ;;  %v1180_v8 = vadd.f32 %v1172_v3, %v1147_v52  ;;  %v1155_v27 = vmul.f32 %v1128_v11, %v1128_v11  ;;  %v1185_v10 = vmul.f32 0.7978846, %v1177_v2 }
 0x6b1   :  { %v1199_v13 = vadd.f32 1.0, %v2057_v19  ;;  %v1254_v15 = vpack.c.bf16 %v1216_v6, %v1214_v0 }
 0x6b2   :  { %v1163_v16 = vmul.f32 %v1155_v27, %v1128_v11  ;;  %v1188_v18 = vmul.f32 0.7978846, %v1180_v8  ;;  %2060 = vtanh.f32 %v1185_v10  ;;  %v2059_v22 = vpop.eup %2058 }
 0x6b3   :  { %v1207_v21 = vmul.f32 0.5, %v1199_v13  ;;  %1380 = vmatmul.bf16.vlgmr.msrb.gmra.mxu2 %v1254_v15  ;;  %v1202_v25 = vadd.f32 1.0, %v2059_v22 }
 0x6b4   :  { %v1171_v23 = vmul.f32 0.044715, %v1163_v16  ;;  %2062 = vtanh.f32 %v1188_v18 }
 0x6b5   :  { %v1215_v24 = vmul.f32 %v1207_v21, %v1123_v29  ;;  %v1210_v32 = vmul.f32 0.5, %v1202_v25  ;;  %v2011_v25 = vld [vmem:[%s2713_s14 + $0x18] sm:$0xff] }
 0x6b6   :  { %v1179_v5 = vadd.f32 %v1171_v23, %v1128_v11  ;;  %1550 = vmatpush.bf16.msra.mxu3 %v2011_v25 }
 0x6b7   :  { %v1253_v17 = vpack.c.bf16 %v1215_v24, %v1213_v7  ;;  %v1218_v36 = vmul.f32 %v1210_v32, %v2608_v34 }
 0x6b8   :  { %v1187_v26 = vmul.f32 0.7978846, %v1179_v5  ;;  %v2061_v28 = vpop.eup %2060 }
 0x6b9   :  { %1361 = vmatmul.bf16.vlgmr.msrb.gmra.mxu1 %v1253_v17  ;;  %v1201_v48 = vadd.f32 1.0, %v2061_v28  ;;  %v2009_v28 = vld [vmem:[%s2713_s14 + $0x8] sm:$0xff] }
 0x6ba   :  { %v2063_v30 = vpop.eup %2062  ;;  %2064 = vtanh.f32 %v1187_v26  ;;  %v2010_v26 = vld [vmem:[%s2713_s14 + $0x10] sm:$0xff] }
 0x6bb   :  { %v1204_v31 = vadd.f32 1.0, %v2063_v30  ;;  %v1209_v53 = vmul.f32 0.5, %v1201_v48  ;;  %1551 = vmatpush.bf16.msra.mxu3 %v2010_v26 }
 0x6bd   :  { %v1212_v33 = vmul.f32 0.5, %v1204_v31  ;;  %v1217_v41 = vmul.f32 %v1209_v53, %v2613_v45 }
 0x6bf   :  { %v1220_v37 = vmul.f32 %v1212_v33, %v1147_v52  ;;  %1552 = vmatpush.bf16.msra.mxu3 %v2009_v28  ;;  %v2008_v33 = vld [vmem:[%s2713_s14] sm:$0xff] }
 0x6c0   :  { %v2065_v39 = vpop.eup %2064 }
 0x6c1   :  { %v1256_v40 = vpack.c.bf16 %v1220_v37, %v1218_v36  ;;  %v1203_v9 = vadd.f32 1.0, %v2065_v39 }
 0x6c3   :  { %1385 = vmatmul.bf16.gmra.mxu2 %v1256_v40  ;;  %v1211_v29 = vmul.f32 0.5, %v1203_v9  ;;  %1553 = vmatpush.bf16.msra.mxu3 %v2008_v33 }
 0x6c5   :  { %v1219_v42 = vmul.f32 %v1211_v29, %v1128_v11 }
 0x6c7   :  { %v1255_v44 = vpack.c.bf16 %v1219_v42, %v1217_v41 }
 0x6c9   :  { %1366 = vmatmul.bf16.gmra.mxu1 %v1255_v44 }
 0x736   :  { %v1362_v46 = vpop.f32.mrf.mxu1  ;;  %v1381_v47 = vpop.f32.mrf.mxu2 }
 0x737   :  { %v1382_v49 = vadd.f32 %v1381_v47, %v1362_v46 }
 0x739   :  { %v1391_v34 = vadd.f32 %v1382_v49, %v2435_v59 }
 0x73b   :  { %v1399_v51 = vadd.f32 %v2014_v50, %v1391_v34  ;;  %v1403_v34 = vld [vmem:[%s2714_s13] sm:$0x3] }
 0x73d   :  { %v1404_v52 = vsel %vm439_vm0, %v1399_v51, 0.0 }
 0x73e   :  { %v1364_v14 = vpop.f32.mrf.mxu1  ;;  %v1383_v20 = vpop.f32.mrf.mxu2  ;;  %1405 = vadd.xlane.f32.xlu0 %v1404_v52 }
 0x73f   :  { %v1384_v38 = vadd.f32 %v1383_v20, %v1364_v14 }
 0x741   :  { %v1392_v45 = vadd.f32 %v1384_v38, %v2440_v62 }
 0x743   :  { %v1400_v54 = vadd.f32 %v2014_v50, %v1392_v45 }
 0x745   :  { %v1407_v55 = vsel %vm439_vm0, %v1400_v54, 0.0 }
 0x746   :  { %1408 = vadd.xlane.f32.xlu1 %v1407_v55  ;;  %v1367_v56 = vpop.f32.mrf.mxu1  ;;  %v1386_v43 = vpop.f32.mrf.mxu2 }
 0x747   :  { %v1387_v57 = vadd.f32 %v1386_v43, %v1367_v56 }
 0x749   :  { %v1393_v58 = vadd.f32 %v1387_v57, %v2445_v1 }
 0x74b   :  { %v1401_v60 = vadd.f32 %v2014_v50, %v1393_v58 }
 0x74d   :  { %v1410_v59 = vsel %vm439_vm0, %v1401_v60, 0.0 }
 0x74e   :  { %v1388_v61 = vpop.f32.mrf.mxu2  ;;  %1411 = vadd.xlane.f32.xlu2 %v1410_v59  ;;  %v1369_v63 = vpop.f32.mrf.mxu1  ;;  %v1497_v59 = vperm.slane %v1403_v34, 1 }
 0x74f   :  { %v1389_v2 = vadd.f32 %v1388_v61, %v1369_v63 }
 0x751   :  { %v1394_v3 = vadd.f32 %v1389_v2, %v2450_v4 }
 0x753   :  { %v1402_v11 = vadd.f32 %v2014_v50, %v1394_v3 }
 0x755   :  { %v1413_v62 = vsel %vm439_vm0, %v1402_v11, 0.0 }
 0x756   :  { %1414 = vadd.xlane.f32.xlu0 %v1413_v62 }
 0x7b1   :  { %v1406_v0 = vpop.xlane.xlu0 %1405 }
 0x7b2   :  { %v1416_v6 = vmul.f32 %v1406_v0, %v2323_v35 }
 0x7b4   :  { %v2636_v19 = vsub.f32 %v1399_v51, %v1416_v6 }
 0x7b6   :  { %v1424_v1 = vmul.f32 %v2636_v19, %v2636_v19 }
 0x7b8   :  { %v1428_v8 = vsel %vm439_vm0, %v1424_v1, 0.0 }
 0x7b9   :  { %1429 = vadd.xlane.f32.xlu1 %v1428_v8  ;;  %v1409_v27 = vpop.xlane.xlu1 %1408 }
 0x7ba   :  { %v1417_v10 = vmul.f32 %v1409_v27, %v2323_v35 }
 0x7bc   :  { %v2642_v12 = vsub.f32 %v1400_v54, %v1417_v10  ;;  %v1492_v54 = vperm.slane %v1403_v34, 0 }
 0x7be   :  { %v1425_v4 = vmul.f32 %v2642_v12, %v2642_v12 }
 0x7c0   :  { %v1431_v13 = vsel %vm439_vm0, %v1425_v4, 0.0 }
 0x7c1   :  { %v1412_v15 = vpop.xlane.xlu2 %1411  ;;  %1432 = vadd.xlane.f32.xlu2 %v1431_v13 }
 0x7c2   :  { %v1418_v16 = vmul.f32 %v1412_v15, %v2323_v35 }
 0x7c4   :  { %v2648_v18 = vsub.f32 %v1401_v60, %v1418_v16 }
 0x7c6   :  { %v1426_v21 = vmul.f32 %v2648_v18, %v2648_v18 }
 0x7c8   :  { %v1434_v22 = vsel %vm439_vm0, %v1426_v21, 0.0 }
 0x7c9   :  { %1435 = vadd.xlane.f32.xlu0 %v1434_v22  ;;  %v1415_v23 = vpop.xlane.xlu0 %1414 }
 0x7ca   :  { %v1419_v7 = vmul.f32 %v1415_v23, %v2323_v35 }
 0x7cc   :  { %v2654_v24 = vsub.f32 %v1402_v11, %v1419_v7 }
 0x7ce   :  { %v1427_v5 = vmul.f32 %v2654_v24, %v2654_v24 }
 0x7d0   :  { %v1437_v17 = vsel %vm439_vm0, %v1427_v5, 0.0 }
 0x7d1   :  { %1438 = vadd.xlane.f32.xlu1 %v1437_v17  ;;  %v2015_v17 = vld [vmem:[%s2712_s15] ss:$0 sm:$0xff] }
 0x82c   :  { %v1430_v30 = vpop.xlane.xlu1 %1429 }
 0x82d   :  { %v1440_v31 = vmul.f32 %v1430_v30, %v2323_v35 }
 0x82f   :  { %v1444_v32 = vadd.f32 1e-06, %v1440_v31 }
 0x831   :  { %2066 = vrsqrt.f32 %v1444_v32  ;;  %vm1454_vm13 = vweird.f32 %v1444_v32 }
 0x834   :  { %v1433_v48 = vpop.xlane.xlu2 %1432 }
 0x835   :  { %v1441_v36 = vmul.f32 %v1433_v48, %v2323_v35 }
 0x837   :  { %v2067_v37 = vpop.eup %2066  ;;  %v1445_v39 = vadd.f32 1e-06, %v1441_v36 }
 0x838   :  { %v1449_v40 = vmul.f32 %v2067_v37, %v1444_v32  ;;  %vm1455_vm12 = vweird.f32 %v2067_v37 }
 0x839   :  { %2068 = vrsqrt.f32 %v1445_v39  ;;  %vm1456_vm14 = vmor %vm1454_vm13, %vm1455_vm12  ;;  %vm1464_vm1 = vweird.f32 %v1445_v39 }
 0x83a   :  { %v1450_v9 = vmul.f32 %v2067_v37, %v1449_v40 }
 0x83c   :  { %v1451_v53 = vmul.f32 0.5, %v1450_v9  ;;  %v1436_v29 = vpop.xlane.xlu0 %1435 }
 0x83d   :  { %v1442_v41 = vmul.f32 %v1436_v29, %v2323_v35 }
 0x83e   :  { %v1452_v42 = vsub.f32 1.5, %v1451_v53 }
 0x83f   :  { %v2069_v44 = vpop.eup %2068  ;;  %v1446_v46 = vadd.f32 1e-06, %v1442_v41 }
 0x840   :  { %v1453_v47 = vmul.f32 %v2067_v37, %v1452_v42  ;;  %v1459_v49 = vmul.f32 %v2069_v44, %v1445_v39  ;;  %vm1465_vm15 = vweird.f32 %v2069_v44 }
 0x841   :  { %2070 = vrsqrt.f32 %v1446_v46  ;;  %vm1466_vm2 = vmor %vm1464_vm1, %vm1465_vm15  ;;  %vm1474_vm4 = vweird.f32 %v1446_v46 }
 0x842   :  { %v1460_v50 = vmul.f32 %v2069_v44, %v1459_v49  ;;  %v1457_v51 = vsel %vm1456_vm14, %v2067_v37, %v1453_v47 }
 0x843   :  { %v1488_v55 = vmul.f32 %v1457_v51, %v2636_v19 }
 0x844   :  { %v1461_v52 = vmul.f32 0.5, %v1460_v50  ;;  %v1439_v14 = vpop.xlane.xlu1 %1438 }
 0x845   :  { %v1443_v20 = vmul.f32 %v1439_v14, %v2323_v35  ;;  %v1493_v61 = vmul.f32 %v1492_v54, %v1488_v55 }
 0x846   :  { %v1462_v38 = vsub.f32 1.5, %v1461_v52 }
 0x847   :  { %v2071_v45 = vpop.eup %2070  ;;  %v1447_v56 = vadd.f32 1e-06, %v1443_v20  ;;  %v1498_v62 = vadd.f32 %v1497_v59, %v1493_v61 }
 0x848   :  { %v1463_v43 = vmul.f32 %v2069_v44, %v1462_v38  ;;  %v1469_v57 = vmul.f32 %v2071_v45, %v1446_v46  ;;  %vm1475_vm3 = vweird.f32 %v2071_v45 }
 0x849   :  { %2072 = vrsqrt.f32 %v1447_v56  ;;  %vm1476_vm5 = vmor %vm1474_vm4, %vm1475_vm3  ;;  %vm1484_vm7 = vweird.f32 %v1447_v56 }
 0x84a   :  { %v1467_v58 = vsel %vm1466_vm2, %v2069_v44, %v1463_v43  ;;  %v1470_v60 = vmul.f32 %v2071_v45, %v1469_v57 }
 0x84b   :  { %v1489_v63 = vmul.f32 %v1467_v58, %v2642_v12 }
 0x84c   :  { %v1471_v2 = vmul.f32 0.5, %v1470_v60 }
 0x84d   :  { %v1494_v35 = vmul.f32 %v1492_v54, %v1489_v63 }
 0x84e   :  { %v1472_v3 = vsub.f32 1.5, %v1471_v2 }
 0x84f   :  { %v2073_v11 = vpop.eup %2072  ;;  %v1499_v0 = vadd.f32 %v1497_v59, %v1494_v35 }
 0x850   :  { %v1473_v6 = vmul.f32 %v2071_v45, %v1472_v3  ;;  %v1479_v19 = vmul.f32 %v2073_v11, %v1447_v56  ;;  %vm1485_vm6 = vweird.f32 %v2073_v11 }
 0x851   :  { %v1510_v1 = vpack.c.bf16 %v1499_v0, %v1498_v62  ;;  %vm1486_vm8 = vmor %vm1484_vm7, %vm1485_vm6 }
 0x852   :  { %v1480_v8 = vmul.f32 %v2073_v11, %v1479_v19  ;;  %v1477_v27 = vsel %vm1476_vm5, %v2071_v45, %v1473_v6 }
 0x853   :  { %1926 = vmatmul.msk.bf16.vlgmr.msra.gmra.mxu3 %vm439_vm0, %v1510_v1  ;;  %v1490_v12 = vmul.f32 %v1477_v27, %v2648_v18 }
 0x854   :  { %v1481_v10 = vmul.f32 0.5, %v1480_v8 }
 0x855   :  { %v1495_v21 = vmul.f32 %v1492_v54, %v1490_v12 }
 0x856   :  { %v1482_v4 = vsub.f32 1.5, %v1481_v10 }
 0x857   :  { %v1500_v23 = vadd.f32 %v1497_v59, %v1495_v21 }
 0x858   :  { %v1483_v13 = vmul.f32 %v2073_v11, %v1482_v4 }
 0x85a   :  { %v1487_v15 = vsel %vm1486_vm8, %v2073_v11, %v1483_v13 }
 0x85b   :  { %v1491_v16 = vmul.f32 %v1487_v15, %v2654_v24 }
 0x85d   :  { %v1496_v22 = vmul.f32 %v1492_v54, %v1491_v16 }
 0x85f   :  { %v1501_v7 = vadd.f32 %v1497_v59, %v1496_v22 }
 0x861   :  { %v1511_v5 = vpack.c.bf16 %v1501_v7, %v1500_v23 }
 0x863   :  { %1927 = vmatmul.msk.bf16.gmra.mxu3 %vm439_vm0, %v1511_v5 }
 0x8d6   :  { %v1555_v25 = vpop.f32.mrf.mxu3 }
 0x8d7   :  { %v1556_v18 = vadd.f32 %v2015_v17, %v1555_v25 }
 0x8d9   :  { %1566 = vst.msk [vmem:[%s2715_s16] sm:$0xff] %vm1565_vm9, %v1556_v18 }
 0x8de   :  { %v1557_v26 = vpop.f32.mrf.mxu3 }
 0x8df   :  { %v1558_v24 = vadd.f32 %v2015_v17, %v1557_v26 }
 0x8e1   :  { %1567 = vst.msk [vmem:[%s2715_s16 + $0x8] sm:$0xff] %vm1565_vm9, %v1558_v24 }
 0x8e6   :  { %v1560_v28 = vpop.f32.mrf.mxu3 }
 0x8e7   :  { %v1561_v30 = vadd.f32 %v2015_v17, %v1560_v28 }
 0x8e9   :  { %1568 = vst.msk [vmem:[%s2715_s16 + $0x10] sm:$0xff] %vm1565_vm9, %v1561_v30 }
 0x8ee   :  { %v1562_v31 = vpop.f32.mrf.mxu3 }
 0x8ef   :  { %v1563_v32 = vadd.f32 %v2015_v17, %v1562_v31 }
 0x8f1   :  { %1569 = vst.msk [vmem:[%s2715_s16 + $0x18] sm:$0xff] %vm1565_vm9, %v1563_v32 }

</bundles_post_ra>
